<compile_context>
chip_gen: v7x
topology: tpu7x:2x2x1
jax: 0.10.0
libtpu: 0.0.40
codegen_flags: <defaults>
</compile_context>

<pallas_src>
import math
import functools

import jax
import jax.numpy as jnp
from jax import lax
from jax.experimental import pallas as pl
from jax.experimental.pallas import tpu as pltpu


# ------------------------------ configuration ------------------------------

_VMEM_LIMIT = 32 * 1024 * 1024       # sized for v7x's 64 MiB per TensorCore
_TILE_BUDGET = 6 * 1024 * 1024       # per-kernel working-set target
_LANES = 128


def _compiler_params():
    return pltpu.CompilerParams(
        dimension_semantics=("parallel", "parallel"),
        vmem_limit_bytes=_VMEM_LIMIT,
    )


def _round_up(x, m):
    return (x + m - 1) // m * m


def _pick_tile_rows(H, row_bytes, multiple=2):
    """Largest multiple-of-`multiple` divisor of H whose per-row working set
    fits the budget; falls back to the smallest usable divisor / full H."""
    cap = max(multiple, _TILE_BUDGET // max(1, row_bytes))
    divs = [d for d in range(multiple, H + 1, multiple) if H % d == 0]
    fit = [d for d in divs if d <= cap]
    if fit:
        return max(fit)
    if divs:
        return min(divs)
    return H


# ------------------------------ shared helpers ------------------------------

def _layernorm2d(x, w, b, eps):
    """Per-pixel LayerNorm over the channel (last) axis.  x: (..., C) f32."""
    mu = jnp.mean(x, axis=-1, keepdims=True)
    xc = x - mu
    var = jnp.mean(xc * xc, axis=-1, keepdims=True)
    return xc * lax.rsqrt(var + eps) * w + b


def _conv3x3_mm(xv, w, rows_out, W):
    """3x3 conv (zero column padding) as 3 accumulating MXU matmuls, one per
    row offset dy (K = 3*Cin each), so the largest live im2col value is a
    third of the full (rows*W, 9*Cin) patch matrix.
      xv : (rows_out+2, W, Cin) f32 value (includes a 1-row halo top/bottom)
      w  : (9*Cin, Cout) bf16 value, feature order (dy, dx, c)
    Returns (rows_out*W, Cout) f32.
    Note: the (rows, W, 3Cin) -> (rows*W, 3Cin) merge is layout-trivial only
    when W % 8 == 0 (asserted by the wrapper)."""
    Cin = xv.shape[-1]
    Cout = w.shape[-1]
    zc = jnp.zeros((xv.shape[0], 1, Cin), jnp.float32)
    xp = jnp.concatenate([zc, xv, zc], axis=1)            # (rows+2, W+2, Cin)
    acc = jnp.zeros((rows_out * W, Cout), jnp.float32)
    for dy in range(3):
        slab = jnp.concatenate(
            [xp[dy:dy + rows_out, dx:dx + W, :] for dx in range(3)], axis=-1)
        slab = slab.reshape(rows_out * W, 3 * Cin).astype(jnp.bfloat16)
        acc = acc + jnp.dot(slab, w[dy * 3 * Cin:(dy + 1) * 3 * Cin, :],
                            preferred_element_type=jnp.float32)
    return acc


# ----------------------- Gaussian high-frequency kernel --------------------

def _gaussian_taps(sigma=1.0):
    xs = [i - 2 for i in range(5)]
    pdf = [math.exp(-0.5 * (t / sigma) ** 2) for t in xs]
    s = sum(pdf)
    return [p / s for p in pdf]


def make_gauss_kernel(WC, C, TH, taps):
    W = WC // C

    def kernel(xt_ref, xm_ref, xb_ref, hf_ref, xlow_ref):
        h = pl.program_id(1)
        nH = pl.num_programs(1)

        mid = xm_ref[0]                                   # (TH, W*C) f32
        top = xt_ref[0][6:8]                              # rows h*TH-2 .. -1
        bot = xb_ref[0][0:2]                              # rows (h+1)*TH .. +1

        # reflect padding at the image borders (GaussianBlur uses reflect).
        top = jnp.where(h == 0,
                        jnp.concatenate([mid[2:3], mid[1:2]], axis=0), top)
        bot = jnp.where(h == nH - 1,
                        jnp.concatenate([mid[TH - 2:TH - 1],
                                         mid[TH - 3:TH - 2]], axis=0), bot)

        xv = jnp.concatenate([top, mid, bot], axis=0)     # (TH+4, W*C)
        # reflect-pad 2 columns left/right; a column shift = lane offset of C.
        xp = jnp.concatenate(
            [xv[:, 2 * C:3 * C], xv[:, C:2 * C], xv,
             xv[:, (W - 2) * C:(W - 1) * C], xv[:, (W - 3) * C:(W - 2) * C]],
            axis=1)                                       # (TH+4, (W+4)*C)

        # separable 5x5 blur: horizontal (lane-offset slices) then vertical.
        tmp = (taps[0] * xp[:, 0:WC] + taps[1] * xp[:, C:WC + C] +
               taps[2] * xp[:, 2 * C:WC + 2 * C] +
               taps[3] * xp[:, 3 * C:WC + 3 * C] +
               taps[4] * xp[:, 4 * C:WC + 4 * C])         # (TH+4, W*C)
        blur = (taps[0] * tmp[0:TH] + taps[1] * tmp[1:TH + 1] +
                taps[2] * tmp[2:TH + 2] + taps[3] * tmp[3:TH + 3] +
                taps[4] * tmp[4:TH + 4])                  # (TH, W*C)

        hf_ref[0] = (mid - blur).astype(hf_ref.dtype)
        xlow_ref[0] = mid.astype(xlow_ref.dtype)

    return kernel


def gaussian_split(x_nhwc):
    """Returns (hf, x) = (x - GaussianBlur5x5(x), x), both bf16.  Runs on the
    lane-fused (N, H, W*C) view; outputs are lane-dense slabs."""
    N, H, W, C = x_nhwc.shape
    WC = W * C
    x_flat = x_nhwc.reshape(N, H, WC)
    taps = _gaussian_taps(1.0)

    row_bytes = _round_up(WC + 4 * C, _LANES) * 4 * 8
    TH = _pick_tile_rows(H, row_bytes, multiple=8)        # H % 8 == 0 (assert)
    nH = H // TH
    t8 = TH // 8

    in_specs = [
        # 8-row halo blocks keep the second-minor block dim a multiple of 8;
        # only the last 2 / first 2 rows are used.
        pl.BlockSpec((1, 8, WC), lambda n, h: (n, jnp.maximum(h * t8 - 1, 0), 0)),
        pl.BlockSpec((1, TH, WC), lambda n, h: (n, h, 0)),
        pl.BlockSpec((1, 8, WC),
                     lambda n, h: (n, jnp.minimum((h + 1) * t8, H // 8 - 1), 0)),
    ]
    out_spec = pl.BlockSpec((1, TH, WC), lambda n, h: (n, h, 0))

    hf, xlow = pl.pallas_call(
        make_gauss_kernel(WC, C, TH, taps),
        out_shape=(jax.ShapeDtypeStruct((N, H, WC), jnp.bfloat16),
                   jax.ShapeDtypeStruct((N, H, WC), jnp.bfloat16)),
        grid=(N, nH),
        in_specs=in_specs,
        out_specs=(out_spec, out_spec),
        compiler_params=_compiler_params(),
    )(x_flat, x_flat, x_flat)
    return hf.reshape(N, H, W, C), xlow.reshape(N, H, W, C)


# ------------------------------ 3x3 conv kernel ----------------------------

def make_conv3x3_kernel(TH, W, Cout, act):
    def kernel(xt, xm, xb, w_ref, b_ref, o_ref):
        h = pl.program_id(1)
        nH = pl.num_programs(1)
        top = xt[0].astype(jnp.float32)
        mid = xm[0].astype(jnp.float32)
        bot = xb[0].astype(jnp.float32)
        top = jnp.where(h == 0, jnp.zeros_like(top), top)         # zero pad
        bot = jnp.where(h == nH - 1, jnp.zeros_like(bot), bot)
        xv = jnp.concatenate([top, mid, bot], axis=0)             # (TH+2,W,Cin)

        acc = _conv3x3_mm(xv, w_ref[...], TH, W) + b_ref[...]
        if act == "gelu":
            acc = jax.nn.gelu(acc, approximate=True)
        o_ref[0] = acc.reshape(TH, W, Cout).astype(o_ref.dtype)

    return kernel


def conv3x3(x, w, b, act=None, out_dtype=jnp.bfloat16):
    """x: (N,H,W,Cin) bf16; w: (3,3,Cin,Cout) f32 HWIO; b: (Cout,) f32."""
    N, H, W, Cin = x.shape
    Cout = w.shape[-1]
    w2 = w.reshape(9 * Cin, Cout).astype(jnp.bfloat16)
    b2 = b.reshape(1, Cout).astype(jnp.float32)

    row_bytes = W * _LANES * 4 * 10          # lane padding of C<128 accounted
    TH = _pick_tile_rows(H, row_bytes, multiple=2)
    nH = H // TH
    const = lambda n, h: (0, 0)
    in_specs = [
        pl.BlockSpec((1, 1, W, Cin),
                     lambda n, h: (n, jnp.maximum(h * TH - 1, 0), 0, 0)),
        pl.BlockSpec((1, TH, W, Cin), lambda n, h: (n, h, 0, 0)),
        pl.BlockSpec((1, 1, W, Cin),
                     lambda n, h: (n, jnp.minimum((h + 1) * TH, H - 1), 0, 0)),
        pl.BlockSpec((9 * Cin, Cout), const),
        pl.BlockSpec((1, Cout), const),
    ]
    flops = 2 * N * H * W * 9 * Cin * Cout
    bytes_accessed = int(x.size * x.dtype.itemsize + w2.size * 2 +
                         N * H * W * Cout * jnp.dtype(out_dtype).itemsize)
    return pl.pallas_call(
        make_conv3x3_kernel(TH, W, Cout, act),
        out_shape=jax.ShapeDtypeStruct((N, H, W, Cout), out_dtype),
        grid=(N, nH),
        in_specs=in_specs,
        out_specs=pl.BlockSpec((1, TH, W, Cout), lambda n, h: (n, h, 0, 0)),
        compiler_params=_compiler_params(),
        cost_estimate=pl.CostEstimate(flops=flops, transcendentals=0,
                                      bytes_accessed=bytes_accessed),
    )(x, x, x, w2, b2)


# --------------- fused double 3x3 conv (head+hfb / tail+upsample) ----------

def make_double_conv_kernel(TH, W, Cmid, Cout, *, layernorm, gelu_out,
                            fuse_add, eps):
    def kernel(*args):
        if fuse_add:
            (xt, xm, xb, yt, ym, yb, gamma_ref, lnw_ref, lnb_ref,
             w1_ref, b1_ref, w2_ref, b2_ref, o_ref) = args
        else:
            (xt, xm, xb, lnw_ref, lnb_ref,
             w1_ref, b1_ref, w2_ref, b2_ref, o_ref) = args
            yt = ym = yb = None
        h = pl.program_id(1)
        nH = pl.num_programs(1)

        g = gamma_ref[0, 0] if fuse_add else None
        pieces = []
        for xr, yr in ((xt, yt), (xm, ym), (xb, yb)):
            v = xr[0].astype(jnp.float32)
            if fuse_add:
                v = g * v + yr[0].astype(jnp.float32)
            if layernorm:
                v = _layernorm2d(v, lnw_ref[...], lnb_ref[...], eps)
        # zero-pad only the halo rows that fall outside the image.
            pieces.append(v)
        top, mid, bot = pieces
        top = jnp.where(h == 0, jnp.zeros_like(top), top)
        bot = jnp.where(h == nH - 1, jnp.zeros_like(bot), bot)
        z = jnp.concatenate([top, mid, bot], axis=0)              # (TH+4,W,Cin)

        m1 = _conv3x3_mm(z, w1_ref[...], TH + 2, W) + b1_ref[...]
        m1 = m1.reshape(TH + 2, W, Cmid)
        # second conv zero-pads its *own* input at the image borders.
        t1 = jnp.where(h == 0, jnp.zeros_like(m1[:1]), m1[:1])
        b1r = jnp.where(h == nH - 1, jnp.zeros_like(m1[TH + 1:]), m1[TH + 1:])
        m1 = jnp.concatenate([t1, m1[1:TH + 1], b1r], axis=0)

        m2 = _conv3x3_mm(m1, w2_ref[...], TH, W) + b2_ref[...]    # (TH*W,Cout)
        if gelu_out:
            m2 = jax.nn.gelu(m2, approximate=True)
        o_ref[0] = m2.reshape(TH, W, Cout).astype(o_ref.dtype)

    return kernel


def double_conv(x, w1, b1, w2, b2, *, y=None, gamma=None, ln_w=None, ln_b=None,
                layernorm=False, gelu_out=False, eps=1e-6,
                out_dtype=jnp.bfloat16):
    """Fused  [z = gamma*x + y] -> [LayerNorm2d] -> conv3x3 -> conv3x3 ->
    [GELU].  The intermediate activation never leaves VMEM."""
    N, H, W, Cin = x.shape
    Cmid = w1.shape[-1]
    Cout = w2.shape[-1]
    fuse_add = y is not None
    w1r = w1.reshape(9 * Cin, Cmid).astype(jnp.bfloat16)
    b1r = b1.reshape(1, Cmid).astype(jnp.float32)
    w2r = w2.reshape(9 * Cmid, Cout).astype(jnp.bfloat16)
    b2r = b2.reshape(1, Cout).astype(jnp.float32)
    lnw = (ln_w if ln_w is not None else jnp.ones((Cin,), jnp.float32))
    lnb = (ln_b if ln_b is not None else jnp.zeros((Cin,), jnp.float32))
    lnw = lnw.reshape(1, Cin).astype(jnp.float32)
    lnb = lnb.reshape(1, Cin).astype(jnp.float32)

    row_bytes = W * _LANES * 4 * (14 if fuse_add else 12)
    TH = _pick_tile_rows(H, row_bytes, multiple=2)
    nH = H // TH
    t2 = TH // 2
    const = lambda n, h: (0, 0)
    top_map = lambda n, h: (n, jnp.maximum(h * t2 - 1, 0), 0, 0)
    mid_map = lambda n, h: (n, h, 0, 0)
    bot_map = lambda n, h: (n, jnp.minimum((h + 1) * t2, H // 2 - 1), 0, 0)

    in_specs = [pl.BlockSpec((1, 2, W, Cin), top_map),
                pl.BlockSpec((1, TH, W, Cin), mid_map),
                pl.BlockSpec((1, 2, W, Cin), bot_map)]
    inputs = [x, x, x]
    if fuse_add:
        in_specs += [pl.BlockSpec((1, 2, W, Cin), top_map),
                     pl.BlockSpec((1, TH, W, Cin), mid_map),
                     pl.BlockSpec((1, 2, W, Cin), bot_map),
                     pl.BlockSpec((1, 1), const)]
        inputs += [y, y, y, gamma.reshape(1, 1).astype(jnp.float32)]
    in_specs += [pl.BlockSpec((1, Cin), const), pl.BlockSpec((1, Cin), const),
                 pl.BlockSpec((9 * Cin, Cmid), const),
                 pl.BlockSpec((1, Cmid), const),
                 pl.BlockSpec((9 * Cmid, Cout), const),
                 pl.BlockSpec((1, Cout), const)]
    inputs += [lnw, lnb, w1r, b1r, w2r, b2r]

    flops = 2 * N * H * W * 9 * (Cin * Cmid + Cmid * Cout)
    tcend = N * H * W * Cout if gelu_out else 0
    bytes_accessed = int(x.size * x.dtype.itemsize +
                         (y.size * y.dtype.itemsize if fuse_add else 0) +
                         (w1r.size + w2r.size) * 2 +
                         N * H * W * Cout * jnp.dtype(out_dtype).itemsize)
    return pl.pallas_call(
        make_double_conv_kernel(TH, W, Cmid, Cout, layernorm=layernorm,
                                gelu_out=gelu_out, fuse_add=fuse_add, eps=eps),
        out_shape=jax.ShapeDtypeStruct((N, H, W, Cout), out_dtype),
        grid=(N, nH),
        in_specs=in_specs,
        out_specs=pl.BlockSpec((1, TH, W, Cout), lambda n, h: (n, h, 0, 0)),
        compiler_params=_compiler_params(),
        cost_estimate=pl.CostEstimate(flops=flops, transcendentals=tcend,
                                      bytes_accessed=bytes_accessed),
    )(*inputs)


# -------------------- fused SimplifiedRepNAFBlock kernel -------------------

def make_naf_kernel(TH, W, C, *, layernorm, residual, eps):
    def kernel(xt, xm, xb, lnw_ref, lnb_ref, w1_ref, b1_ref, w3_ref, b3_ref,
               o_ref):
        h = pl.program_id(1)
        nH = pl.num_programs(1)

        mid_raw = xm[0].astype(jnp.float32)               # residual source
        pieces = []
        for r, raw in ((xt, None), (xm, mid_raw), (xb, None)):
            v = raw if raw is not None else r[0].astype(jnp.float32)
            if layernorm:
                v = _layernorm2d(v, lnw_ref[...], lnb_ref[...], eps)
            pieces.append(v)
        top, mid, bot = pieces
        top = jnp.where(h == 0, jnp.zeros_like(top), top)
        bot = jnp.where(h == nH - 1, jnp.zeros_like(bot), bot)
        z = jnp.concatenate([top, mid, bot], axis=0)      # (TH+2, W, C)

        acc = _conv3x3_mm(z, w1_ref[...], TH, W) + b1_ref[...]   # (TH*W, 2C)
        gate = acc[:, :C] * acc[:, C:]                    # SimpleGate, f32
        yv = jnp.dot(gate.astype(jnp.bfloat16), w3_ref[...],
                     preferred_element_type=jnp.float32) + b3_ref[...]
        if residual:
            yv = yv + mid_raw.reshape(TH * W, C)
        o_ref[0] = yv.reshape(TH, W, C).astype(o_ref.dtype)

    return kernel


def naf_block(x, blk, layernorm=True, residual=True, eps=1e-6):
    N, H, W, C = x.shape
    w1 = blk["w1"].reshape(9 * C, 2 * C).astype(jnp.bfloat16)
    b1 = blk["b1"].reshape(1, 2 * C).astype(jnp.float32)
    w3 = blk["w3"].astype(jnp.bfloat16)
    b3 = blk["b3"].reshape(1, C).astype(jnp.float32)
    lnw = blk["ln_w"].reshape(1, C).astype(jnp.float32)
    lnb = blk["ln_b"].reshape(1, C).astype(jnp.float32)

    row_bytes = W * _LANES * 4 * 12
    TH = _pick_tile_rows(H, row_bytes, multiple=2)
    nH = H // TH
    const = lambda n, h: (0, 0)
    in_specs = [
        pl.BlockSpec((1, 1, W, C),
                     lambda n, h: (n, jnp.maximum(h * TH - 1, 0), 0, 0)),
        pl.BlockSpec((1, TH, W, C), lambda n, h: (n, h, 0, 0)),
        pl.BlockSpec((1, 1, W, C),
                     lambda n, h: (n, jnp.minimum((h + 1) * TH, H - 1), 0, 0)),
        pl.BlockSpec((1, C), const), pl.BlockSpec((1, C), const),
        pl.BlockSpec((9 * C, 2 * C), const), pl.BlockSpec((1, 2 * C), const),
        pl.BlockSpec((C, C), const), pl.BlockSpec((1, C), const),
    ]
    flops = 2 * N * H * W * (9 * C * 2 * C + C * C)
    bytes_accessed = int(2 * x.size * x.dtype.itemsize + (w1.size + w3.size) * 2)
    return pl.pallas_call(
        make_naf_kernel(TH, W, C, layernorm=layernorm, residual=residual,
                        eps=eps),
        out_shape=jax.ShapeDtypeStruct((N, H, W, C), jnp.bfloat16),
        grid=(N, nH),
        in_specs=in_specs,
        out_specs=pl.BlockSpec((1, TH, W, C), lambda n, h: (n, h, 0, 0)),
        compiler_params=_compiler_params(),
        cost_estimate=pl.CostEstimate(flops=flops, transcendentals=0,
                                      bytes_accessed=bytes_accessed),
    )(x, x, x, lnw, lnb, w1, b1, w3, b3)


# ------------------------------ JAX glue ops -------------------------------

def pixel_unshuffle_nhwc(x, r):
    N, H, W, C = x.shape
    x = x.reshape(N, H // r, r, W // r, r, C)
    x = x.transpose(0, 1, 3, 5, 2, 4)                     # N, H/r, W/r, C, i, j
    return x.reshape(N, H // r, W // r, C * r * r)


def pixel_shuffle_nhwc(x, r):
    N, H, W, C = x.shape
    Co = C // (r * r)
    x = x.reshape(N, H, W, Co, r, r)
    x = x.transpose(0, 1, 4, 2, 5, 3)                     # N, H, i, W, j, Co
    return x.reshape(N, H * r, W * r, Co)


# ------------------------------- parameters --------------------------------

def init_params(key, num_channels, num_feats, num_blocks, upscale):
    keys = jax.random.split(key, 4 + 2 * num_blocks)
    ki = iter(keys)

    def conv_w(k, kh, kw, cin, cout):
        std = 1.0 / math.sqrt(cin * kh * kw)
        kw_, kb_ = jax.random.split(k)
        w = jax.random.normal(kw_, (kh, kw, cin, cout), jnp.float32) * std
        b = jax.random.uniform(kb_, (cout,), jnp.float32, -std, std)
        return w, b

    p = {}
    p["gamma"] = jnp.zeros((1,), jnp.float32)             # nn.Parameter(zeros(1))
    p["head_w"], p["head_b"] = conv_w(next(ki), 3, 3, num_channels * 4, num_feats)
    p["hfb_w"], p["hfb_b"] = conv_w(next(ki), 3, 3, num_feats, num_feats)
    body = []
    for _ in range(num_blocks):
        w1, b1 = conv_w(next(ki), 3, 3, num_feats, 2 * num_feats)
        w3, b3 = conv_w(next(ki), 1, 1, num_feats, num_feats)
        body.append({
            "ln_w": jnp.ones((num_feats,), jnp.float32),
            "ln_b": jnp.zeros((num_feats,), jnp.float32),
            "w1": w1, "b1": b1,
            "w3": w3.reshape(num_feats, num_feats), "b3": b3,
        })
    p["body"] = body
    p["tail_ln_w"] = jnp.ones((num_feats,), jnp.float32)
    p["tail_ln_b"] = jnp.zeros((num_feats,), jnp.float32)
    p["tail_w"], p["tail_b"] = conv_w(next(ki), 3, 3, num_feats, num_feats)
    cout_up = num_channels * (2 * upscale) ** 2
    p["up_w"], p["up_b"] = conv_w(next(ki), 3, 3, num_feats, cout_up)
    return p


# -------------------------------- forward ----------------------------------

def rt4ksr_rep_forward(x_nchw, p, upscale=2, forget=True,
                       layernorm=True, residual=True):
    N, C, H, W = x_nchw.shape
    assert H % 8 == 0 and W % 16 == 0, (
        "this implementation requires H % 8 == 0 and W % 16 == 0")
    x = jnp.transpose(x_nchw, (0, 2, 3, 1)).astype(jnp.float32)   # -> NHWC

    hf, x_low = gaussian_split(x)                # hf = x - gaussian(x), bf16
    x_unsh = pixel_unshuffle_nhwc(x_low, 2)      # self.down
    hf_unsh = pixel_unshuffle_nhwc(hf, 2)

    # self.head on the lr branch (single conv)
    shallow_lr = conv3x3(x_unsh, p["head_w"], p["head_b"])
    # hf branch: self.head + self.hfb (RepResBlock) + GELU, fused in one kernel
    hf_feats = double_conv(hf_unsh, p["head_w"], p["head_b"],
                           p["hfb_w"], p["hfb_b"], gelu_out=True)

    deep = shallow_lr                            # self.body
    for blk in p["body"]:
        deep = naf_block(deep, blk, layernorm=layernorm, residual=residual)

    # (gamma*deep + hf_feats) -> tail LayerNorm2d -> tail conv -> upsample
    # conv, fused in one kernel (PixelShuffle stays in XLA).
    up = double_conv(deep, p["tail_w"], p["tail_b"], p["up_w"], p["up_b"],
                     y=hf_feats if forget else None,
                     gamma=p["gamma"] if forget else None,
                     ln_w=p["tail_ln_w"], ln_b=p["tail_ln_b"],
                     layernorm=True, out_dtype=jnp.float32)

    out = pixel_shuffle_nhwc(up, 2 * upscale)
    return jnp.transpose(out, (0, 3, 1, 2))      # -> NCHW


# ---------------------------------- main ------------------------------------

if __name__ == "__main__":
    N, C, H, W = 2, 3, 16, 16
    num_feats, num_blocks, upscale = 16, 2, 2

    x = jax.random.normal(jax.random.PRNGKey(0), (N, C, H, W), jnp.float32)
    params = init_params(jax.random.PRNGKey(1), C, num_feats, num_blocks,
                         upscale)

    fwd = jax.jit(functools.partial(rt4ksr_rep_forward, upscale=upscale,
                                    forget=True, layernorm=True,
                                    residual=True))
    out = jax.block_until_ready(fwd(x, params))

    assert out.shape == (N, C, H * upscale, W * upscale), out.shape
    assert bool(jnp.all(jnp.isfinite(out)))
    print("KERNEL_OK")
</pallas_src>

<mosaic_0001>
module attributes {stable_mosaic.version = 11 : i64} {
  func.func @kernel(%arg0: i32, %arg1: i32, %arg2: memref<1x8x48xf32, #tpu.memory_space<vmem>>, %arg3: memref<1x16x48xf32, #tpu.memory_space<vmem>>, %arg4: memref<1x8x48xf32, #tpu.memory_space<vmem>>, %arg5: memref<1x16x48xbf16, #tpu.memory_space<vmem>>, %arg6: memref<1x16x48xbf16, #tpu.memory_space<vmem>>) attributes {dimension_semantics = [#tpu.dimension_semantics<parallel>, #tpu.dimension_semantics<parallel>], iteration_bounds = array<i64: 2, 1>, scalar_prefetch = 0 : i64, scratch_operands = 0 : i64, tpu.core_type = #tpu.core_type<tc>, window_params = [{transform_indices = @transform_0, window_bounds = array<i64: 1, 8, 48>}, {transform_indices = @transform_1, window_bounds = array<i64: 1, 16, 48>}, {transform_indices = @transform_2, window_bounds = array<i64: 1, 8, 48>}, {transform_indices = @transform_3, window_bounds = array<i64: 1, 16, 48>}, {transform_indices = @transform_4, window_bounds = array<i64: 1, 16, 48>}]} {
    %c0 = arith.constant 0 : index
    %c0_0 = arith.constant 0 : index
    %c0_1 = arith.constant 0 : index
    %0 = vector.load %arg3[%c0, %c0_0, %c0_1] : memref<1x16x48xf32, #tpu.memory_space<vmem>>, vector<1x16x48xf32>
    %1 = vector.shape_cast %0 : vector<1x16x48xf32> to vector<16x48xf32>
    %c0_2 = arith.constant 0 : index
    %c0_3 = arith.constant 0 : index
    %c0_4 = arith.constant 0 : index
    %2 = vector.load %arg2[%c0_2, %c0_3, %c0_4] : memref<1x8x48xf32, #tpu.memory_space<vmem>>, vector<1x8x48xf32>
    %3 = vector.shape_cast %2 : vector<1x8x48xf32> to vector<8x48xf32>
    %4 = vector.extract_strided_slice %3 {offsets = [6, 0], sizes = [2, 48], strides = [1, 1]} : vector<8x48xf32> to vector<2x48xf32>
    %c0_5 = arith.constant 0 : index
    %c0_6 = arith.constant 0 : index
    %c0_7 = arith.constant 0 : index
    %5 = vector.load %arg4[%c0_5, %c0_6, %c0_7] : memref<1x8x48xf32, #tpu.memory_space<vmem>>, vector<1x8x48xf32>
    %6 = vector.shape_cast %5 : vector<1x8x48xf32> to vector<8x48xf32>
    %7 = vector.extract_strided_slice %6 {offsets = [0, 0], sizes = [2, 48], strides = [1, 1]} : vector<8x48xf32> to vector<2x48xf32>
    %c0_i32 = arith.constant 0 : i32
    %8 = arith.cmpi eq, %arg1, %c0_i32 : i32
    %9 = vector.extract_strided_slice %1 {offsets = [2, 0], sizes = [1, 48], strides = [1, 1]} : vector<16x48xf32> to vector<1x48xf32>
    %10 = vector.extract_strided_slice %1 {offsets = [1, 0], sizes = [1, 48], strides = [1, 1]} : vector<16x48xf32> to vector<1x48xf32>
    %11 = tpu.concatenate %9, %10 in 0 : vector<1x48xf32>, vector<1x48xf32> -> vector<2x48xf32>
    %12 = arith.select %8, %11, %4 : vector<2x48xf32>
    %c0_i32_8 = arith.constant 0 : i32
    %13 = arith.cmpi eq, %arg1, %c0_i32_8 : i32
    %14 = vector.extract_strided_slice %1 {offsets = [14, 0], sizes = [1, 48], strides = [1, 1]} : vector<16x48xf32> to vector<1x48xf32>
    %15 = vector.extract_strided_slice %1 {offsets = [13, 0], sizes = [1, 48], strides = [1, 1]} : vector<16x48xf32> to vector<1x48xf32>
    %16 = tpu.concatenate %14, %15 in 0 : vector<1x48xf32>, vector<1x48xf32> -> vector<2x48xf32>
    %17 = arith.select %13, %16, %7 : vector<2x48xf32>
    %18 = tpu.concatenate %12, %1, %17 in 0 : vector<2x48xf32>, vector<16x48xf32>, vector<2x48xf32> -> vector<20x48xf32>
    %19 = vector.extract_strided_slice %18 {offsets = [0, 6], sizes = [20, 3], strides = [1, 1]} : vector<20x48xf32> to vector<20x3xf32>
    %20 = vector.extract_strided_slice %18 {offsets = [0, 3], sizes = [20, 3], strides = [1, 1]} : vector<20x48xf32> to vector<20x3xf32>
    %21 = vector.extract_strided_slice %18 {offsets = [0, 42], sizes = [20, 3], strides = [1, 1]} : vector<20x48xf32> to vector<20x3xf32>
    %22 = vector.extract_strided_slice %18 {offsets = [0, 39], sizes = [20, 3], strides = [1, 1]} : vector<20x48xf32> to vector<20x3xf32>
    %23 = tpu.concatenate %19, %20, %18, %21, %22 in 1 : vector<20x3xf32>, vector<20x3xf32>, vector<20x48xf32>, vector<20x3xf32>, vector<20x3xf32> -> vector<20x60xf32>
    %24 = vector.extract_strided_slice %23 {offsets = [0, 0], sizes = [20, 48], strides = [1, 1]} : vector<20x60xf32> to vector<20x48xf32>
    %cst = arith.constant 0.054488685 : f32
    %25 = vector.broadcast %cst : f32 to vector<20x48xf32>
    %26 = arith.mulf %25, %24 : vector<20x48xf32>
    %27 = vector.extract_strided_slice %23 {offsets = [0, 3], sizes = [20, 48], strides = [1, 1]} : vector<20x60xf32> to vector<20x48xf32>
    %cst_9 = arith.constant 0.244201347 : f32
    %28 = vector.broadcast %cst_9 : f32 to vector<20x48xf32>
    %29 = arith.mulf %28, %27 : vector<20x48xf32>
    %30 = arith.addf %26, %29 : vector<20x48xf32>
    %31 = vector.extract_strided_slice %23 {offsets = [0, 6], sizes = [20, 48], strides = [1, 1]} : vector<20x60xf32> to vector<20x48xf32>
    %cst_10 = arith.constant 0.402619958 : f32
    %32 = vector.broadcast %cst_10 : f32 to vector<20x48xf32>
    %33 = arith.mulf %32, %31 : vector<20x48xf32>
    %34 = arith.addf %30, %33 : vector<20x48xf32>
    %35 = vector.extract_strided_slice %23 {offsets = [0, 9], sizes = [20, 48], strides = [1, 1]} : vector<20x60xf32> to vector<20x48xf32>
    %cst_11 = arith.constant 0.244201347 : f32
    %36 = vector.broadcast %cst_11 : f32 to vector<20x48xf32>
    %37 = arith.mulf %36, %35 : vector<20x48xf32>
    %38 = arith.addf %34, %37 : vector<20x48xf32>
    %39 = vector.extract_strided_slice %23 {offsets = [0, 12], sizes = [20, 48], strides = [1, 1]} : vector<20x60xf32> to vector<20x48xf32>
    %cst_12 = arith.constant 0.054488685 : f32
    %40 = vector.broadcast %cst_12 : f32 to vector<20x48xf32>
    %41 = arith.mulf %40, %39 : vector<20x48xf32>
    %42 = arith.addf %38, %41 : vector<20x48xf32>
    %43 = vector.extract_strided_slice %42 {offsets = [0, 0], sizes = [16, 48], strides = [1, 1]} : vector<20x48xf32> to vector<16x48xf32>
    %cst_13 = arith.constant 0.054488685 : f32
    %44 = vector.broadcast %cst_13 : f32 to vector<16x48xf32>
    %45 = arith.mulf %44, %43 : vector<16x48xf32>
    %46 = vector.extract_strided_slice %42 {offsets = [1, 0], sizes = [16, 48], strides = [1, 1]} : vector<20x48xf32> to vector<16x48xf32>
    %cst_14 = arith.constant 0.244201347 : f32
    %47 = vector.broadcast %cst_14 : f32 to vector<16x48xf32>
    %48 = arith.mulf %47, %46 : vector<16x48xf32>
    %49 = arith.addf %45, %48 : vector<16x48xf32>
    %50 = vector.extract_strided_slice %42 {offsets = [2, 0], sizes = [16, 48], strides = [1, 1]} : vector<20x48xf32> to vector<16x48xf32>
    %cst_15 = arith.constant 0.402619958 : f32
    %51 = vector.broadcast %cst_15 : f32 to vector<16x48xf32>
    %52 = arith.mulf %51, %50 : vector<16x48xf32>
    %53 = arith.addf %49, %52 : vector<16x48xf32>
    %54 = vector.extract_strided_slice %42 {offsets = [3, 0], sizes = [16, 48], strides = [1, 1]} : vector<20x48xf32> to vector<16x48xf32>
    %cst_16 = arith.constant 0.244201347 : f32
    %55 = vector.broadcast %cst_16 : f32 to vector<16x48xf32>
    %56 = arith.mulf %55, %54 : vector<16x48xf32>
    %57 = arith.addf %53, %56 : vector<16x48xf32>
    %58 = vector.extract_strided_slice %42 {offsets = [4, 0], sizes = [16, 48], strides = [1, 1]} : vector<20x48xf32> to vector<16x48xf32>
    %cst_17 = arith.constant 0.054488685 : f32
    %59 = vector.broadcast %cst_17 : f32 to vector<16x48xf32>
    %60 = arith.mulf %59, %58 : vector<16x48xf32>
    %61 = arith.addf %57, %60 : vector<16x48xf32>
    %62 = arith.subf %1, %61 : vector<16x48xf32>
    %63 = arith.truncf %62 : vector<16x48xf32> to vector<16x48xbf16>
    %c0_18 = arith.constant 0 : index
    %c0_19 = arith.constant 0 : index
    %c0_20 = arith.constant 0 : index
    %64 = vector.load %arg5[%c0_18, %c0_19, %c0_20] : memref<1x16x48xbf16, #tpu.memory_space<vmem>>, vector<1x16x48xbf16>
    %65 = vector.shape_cast %64 : vector<1x16x48xbf16> to vector<16x48xbf16>
    %66 = vector.shape_cast %63 : vector<16x48xbf16> to vector<1x16x48xbf16>
    tpu.vector_store %arg5[%c0_18, %c0_19, %c0_20], %66 {strides = array<i32>} : memref<1x16x48xbf16, #tpu.memory_space<vmem>>, vector<1x16x48xbf16>,
    %67 = arith.truncf %1 : vector<16x48xf32> to vector<16x48xbf16>
    %c0_21 = arith.constant 0 : index
    %c0_22 = arith.constant 0 : index
    %c0_23 = arith.constant 0 : index
    %68 = vector.load %arg6[%c0_21, %c0_22, %c0_23] : memref<1x16x48xbf16, #tpu.memory_space<vmem>>, vector<1x16x48xbf16>
    %69 = vector.shape_cast %68 : vector<1x16x48xbf16> to vector<16x48xbf16>
    %70 = vector.shape_cast %67 : vector<16x48xbf16> to vector<1x16x48xbf16>
    tpu.vector_store %arg6[%c0_21, %c0_22, %c0_23], %70 {strides = array<i32>} : memref<1x16x48xbf16, #tpu.memory_space<vmem>>, vector<1x16x48xbf16>,
    return
  }
  func.func @transform_0(%arg0: i32, %arg1: i32) -> (i32, i32, i32) {
    %c2_i32 = arith.constant 2 : i32
    %0 = arith.muli %arg1, %c2_i32 : i32
    %c1_i32 = arith.constant 1 : i32
    %1 = arith.subi %0, %c1_i32 : i32
    %c0_i32 = arith.constant 0 : i32
    %2 = arith.maxsi %1, %c0_i32 : i32
    %c0_i32_0 = arith.constant 0 : i32
    %c0_i32_1 = arith.constant 0 : i32
    return %arg0, %2, %c0_i32_0 : i32, i32, i32
  }
  func.func @transform_1(%arg0: i32, %arg1: i32) -> (i32, i32, i32) {
    %c0_i32 = arith.constant 0 : i32
    %c0_i32_0 = arith.constant 0 : i32
    return %arg0, %arg1, %c0_i32 : i32, i32, i32
  }
  func.func @transform_2(%arg0: i32, %arg1: i32) -> (i32, i32, i32) {
    %c1_i32 = arith.constant 1 : i32
    %0 = arith.addi %arg1, %c1_i32 : i32
    %c2_i32 = arith.constant 2 : i32
    %1 = arith.muli %0, %c2_i32 : i32
    %c1_i32_0 = arith.constant 1 : i32
    %2 = arith.minsi %1, %c1_i32_0 : i32
    %c0_i32 = arith.constant 0 : i32
    %c0_i32_1 = arith.constant 0 : i32
    return %arg0, %2, %c0_i32 : i32, i32, i32
  }
  func.func @transform_3(%arg0: i32, %arg1: i32) -> (i32, i32, i32) {
    %c0_i32 = arith.constant 0 : i32
    %c0_i32_0 = arith.constant 0 : i32
    return %arg0, %arg1, %c0_i32 : i32, i32, i32
  }
  func.func @transform_4(%arg0: i32, %arg1: i32) -> (i32, i32, i32) {
    %c0_i32 = arith.constant 0 : i32
    %c0_i32_0 = arith.constant 0 : i32
    return %arg0, %arg1, %c0_i32 : i32, i32, i32
  }
}

module attributes {stable_mosaic.version = 11 : i64} {
  func.func @kernel(%arg0: i32, %arg1: i32, %arg2: memref<1x1x8x12xbf16, #tpu.memory_space<vmem>>, %arg3: memref<1x8x8x12xbf16, #tpu.memory_space<vmem>>, %arg4: memref<1x1x8x12xbf16, #tpu.memory_space<vmem>>, %arg5: memref<108x16xbf16, #tpu.memory_space<vmem>>, %arg6: memref<1x16xf32, #tpu.memory_space<vmem>>, %arg7: memref<1x8x8x16xbf16, #tpu.memory_space<vmem>>) attributes {dimension_semantics = [#tpu.dimension_semantics<parallel>, #tpu.dimension_semantics<parallel>], iteration_bounds = array<i64: 2, 1>, scalar_prefetch = 0 : i64, scratch_operands = 0 : i64, tpu.core_type = #tpu.core_type<tc>, window_params = [{transform_indices = @transform_0, window_bounds = array<i64: 1, 1, 8, 12>}, {transform_indices = @transform_1, window_bounds = array<i64: 1, 8, 8, 12>}, {transform_indices = @transform_2, window_bounds = array<i64: 1, 1, 8, 12>}, {pipeline_mode = #tpu.pipeline_mode<synchronous>, transform_indices = @transform_3, window_bounds = array<i64: 108, 16>}, {pipeline_mode = #tpu.pipeline_mode<synchronous>, transform_indices = @transform_4, window_bounds = array<i64: 1, 16>}, {transform_indices = @transform_5, window_bounds = array<i64: 1, 8, 8, 16>}]} {
    %c0 = arith.constant 0 : index
    %c0_0 = arith.constant 0 : index
    %c0_1 = arith.constant 0 : index
    %c0_2 = arith.constant 0 : index
    %0 = vector.load %arg2[%c0, %c0_0, %c0_1, %c0_2] : memref<1x1x8x12xbf16, #tpu.memory_space<vmem>>, vector<1x1x8x12xbf16>
    %1 = vector.shape_cast %0 : vector<1x1x8x12xbf16> to vector<1x8x12xbf16>
    %2 = arith.extf %1 : vector<1x8x12xbf16> to vector<1x8x12xf32>
    %c0_3 = arith.constant 0 : index
    %c0_4 = arith.constant 0 : index
    %c0_5 = arith.constant 0 : index
    %c0_6 = arith.constant 0 : index
    %3 = vector.load %arg3[%c0_3, %c0_4, %c0_5, %c0_6] : memref<1x8x8x12xbf16, #tpu.memory_space<vmem>>, vector<1x8x8x12xbf16>
    %4 = vector.shape_cast %3 : vector<1x8x8x12xbf16> to vector<8x8x12xbf16>
    %5 = arith.extf %4 : vector<8x8x12xbf16> to vector<8x8x12xf32>
    %c0_7 = arith.constant 0 : index
    %c0_8 = arith.constant 0 : index
    %c0_9 = arith.constant 0 : index
    %c0_10 = arith.constant 0 : index
    %6 = vector.load %arg4[%c0_7, %c0_8, %c0_9, %c0_10] : memref<1x1x8x12xbf16, #tpu.memory_space<vmem>>, vector<1x1x8x12xbf16>
    %7 = vector.shape_cast %6 : vector<1x1x8x12xbf16> to vector<1x8x12xbf16>
    %8 = arith.extf %7 : vector<1x8x12xbf16> to vector<1x8x12xf32>
    %c0_i32 = arith.constant 0 : i32
    %9 = arith.cmpi eq, %arg1, %c0_i32 : i32
    %cst = arith.constant 0.000000e+00 : f32
    %10 = vector.broadcast %cst : f32 to vector<1x8x12xf32>
    %11 = arith.select %9, %10, %2 : vector<1x8x12xf32>
    %c0_i32_11 = arith.constant 0 : i32
    %12 = arith.cmpi eq, %arg1, %c0_i32_11 : i32
    %cst_12 = arith.constant 0.000000e+00 : f32
    %13 = vector.broadcast %cst_12 : f32 to vector<1x8x12xf32>
    %14 = arith.select %12, %13, %8 : vector<1x8x12xf32>
    %15 = tpu.concatenate %11, %5, %14 in 0 : vector<1x8x12xf32>, vector<8x8x12xf32>, vector<1x8x12xf32> -> vector<10x8x12xf32>
    %c0_13 = arith.constant 0 : index
    %c0_14 = arith.constant 0 : index
    %16 = vector.load %arg5[%c0_13, %c0_14] : memref<108x16xbf16, #tpu.memory_space<vmem>>, vector<108x16xbf16>
    %cst_15 = arith.constant 0.000000e+00 : f32
    %17 = vector.broadcast %cst_15 : f32 to vector<10x1x12xf32>
    %18 = tpu.concatenate %17, %15, %17 in 1 : vector<10x1x12xf32>, vector<10x8x12xf32>, vector<10x1x12xf32> -> vector<10x10x12xf32>
    %cst_16 = arith.constant 0.000000e+00 : f32
    %19 = vector.broadcast %cst_16 : f32 to vector<64x16xf32>
    %20 = vector.extract_strided_slice %18 {offsets = [0, 0, 0], sizes = [8, 8, 12], strides = [1, 1, 1]} : vector<10x10x12xf32> to vector<8x8x12xf32>
    %21 = vector.extract_strided_slice %18 {offsets = [0, 1, 0], sizes = [8, 8, 12], strides = [1, 1, 1]} : vector<10x10x12xf32> to vector<8x8x12xf32>
    %22 = vector.extract_strided_slice %18 {offsets = [0, 2, 0], sizes = [8, 8, 12], strides = [1, 1, 1]} : vector<10x10x12xf32> to vector<8x8x12xf32>
    %23 = tpu.concatenate %20, %21, %22 in 2 : vector<8x8x12xf32>, vector<8x8x12xf32>, vector<8x8x12xf32> -> vector<8x8x36xf32>
    %24 = vector.shape_cast %23 : vector<8x8x36xf32> to vector<64x36xf32>
    %25 = arith.truncf %24 : vector<64x36xf32> to vector<64x36xbf16>
    %26 = vector.extract_strided_slice %16 {offsets = [0, 0], sizes = [36, 16], strides = [1, 1]} : vector<108x16xbf16> to vector<36x16xbf16>
    %cst_17 = arith.constant dense<0.000000e+00> : vector<64x16xf32>
    %27 = tpu.matmul %25, %26, %cst_17 {dimension_numbers = #tpu.dot_dimension_numbers<[1], [0], [0], [1], [0, 0, 1, 1], [], []>} : vector<64x36xbf16>, vector<36x16xbf16>, vector<64x16xf32> -> vector<64x16xf32>
    %28 = arith.addf %19, %27 : vector<64x16xf32>
    %29 = vector.extract_strided_slice %18 {offsets = [1, 0, 0], sizes = [8, 8, 12], strides = [1, 1, 1]} : vector<10x10x12xf32> to vector<8x8x12xf32>
    %30 = vector.extract_strided_slice %18 {offsets = [1, 1, 0], sizes = [8, 8, 12], strides = [1, 1, 1]} : vector<10x10x12xf32> to vector<8x8x12xf32>
    %31 = vector.extract_strided_slice %18 {offsets = [1, 2, 0], sizes = [8, 8, 12], strides = [1, 1, 1]} : vector<10x10x12xf32> to vector<8x8x12xf32>
    %32 = tpu.concatenate %29, %30, %31 in 2 : vector<8x8x12xf32>, vector<8x8x12xf32>, vector<8x8x12xf32> -> vector<8x8x36xf32>
    %33 = vector.shape_cast %32 : vector<8x8x36xf32> to vector<64x36xf32>
    %34 = arith.truncf %33 : vector<64x36xf32> to vector<64x36xbf16>
    %35 = vector.extract_strided_slice %16 {offsets = [36, 0], sizes = [36, 16], strides = [1, 1]} : vector<108x16xbf16> to vector<36x16xbf16>
    %cst_18 = arith.constant dense<0.000000e+00> : vector<64x16xf32>
    %36 = tpu.matmul %34, %35, %cst_18 {dimension_numbers = #tpu.dot_dimension_numbers<[1], [0], [0], [1], [0, 0, 1, 1], [], []>} : vector<64x36xbf16>, vector<36x16xbf16>, vector<64x16xf32> -> vector<64x16xf32>
    %37 = arith.addf %28, %36 : vector<64x16xf32>
    %38 = vector.extract_strided_slice %18 {offsets = [2, 0, 0], sizes = [8, 8, 12], strides = [1, 1, 1]} : vector<10x10x12xf32> to vector<8x8x12xf32>
    %39 = vector.extract_strided_slice %18 {offsets = [2, 1, 0], sizes = [8, 8, 12], strides = [1, 1, 1]} : vector<10x10x12xf32> to vector<8x8x12xf32>
    %40 = vector.extract_strided_slice %18 {offsets = [2, 2, 0], sizes = [8, 8, 12], strides = [1, 1, 1]} : vector<10x10x12xf32> to vector<8x8x12xf32>
    %41 = tpu.concatenate %38, %39, %40 in 2 : vector<8x8x12xf32>, vector<8x8x12xf32>, vector<8x8x12xf32> -> vector<8x8x36xf32>
    %42 = vector.shape_cast %41 : vector<8x8x36xf32> to vector<64x36xf32>
    %43 = arith.truncf %42 : vector<64x36xf32> to vector<64x36xbf16>
    %44 = vector.extract_strided_slice %16 {offsets = [72, 0], sizes = [36, 16], strides = [1, 1]} : vector<108x16xbf16> to vector<36x16xbf16>
    %cst_19 = arith.constant dense<0.000000e+00> : vector<64x16xf32>
    %45 = tpu.matmul %43, %44, %cst_19 {dimension_numbers = #tpu.dot_dimension_numbers<[1], [0], [0], [1], [0, 0, 1, 1], [], []>} : vector<64x36xbf16>, vector<36x16xbf16>, vector<64x16xf32> -> vector<64x16xf32>
    %46 = arith.addf %37, %45 : vector<64x16xf32>
    %c0_20 = arith.constant 0 : index
    %c0_21 = arith.constant 0 : index
    %47 = vector.load %arg6[%c0_20, %c0_21] : memref<1x16xf32, #tpu.memory_space<vmem>>, vector<1x16xf32>
    %48 = vector.broadcast %47 : vector<1x16xf32> to vector<64x16xf32>
    %49 = arith.addf %46, %48 : vector<64x16xf32>
    %50 = vector.shape_cast %49 : vector<64x16xf32> to vector<8x8x16xf32>
    %51 = arith.truncf %50 : vector<8x8x16xf32> to vector<8x8x16xbf16>
    %c0_22 = arith.constant 0 : index
    %c0_23 = arith.constant 0 : index
    %c0_24 = arith.constant 0 : index
    %c0_25 = arith.constant 0 : index
    %52 = vector.load %arg7[%c0_22, %c0_23, %c0_24, %c0_25] : memref<1x8x8x16xbf16, #tpu.memory_space<vmem>>, vector<1x8x8x16xbf16>
    %53 = vector.shape_cast %52 : vector<1x8x8x16xbf16> to vector<8x8x16xbf16>
    %54 = vector.shape_cast %51 : vector<8x8x16xbf16> to vector<1x8x8x16xbf16>
    tpu.vector_store %arg7[%c0_22, %c0_23, %c0_24, %c0_25], %54 {strides = array<i32>} : memref<1x8x8x16xbf16, #tpu.memory_space<vmem>>, vector<1x8x8x16xbf16>,
    return
  }
  func.func @transform_0(%arg0: i32, %arg1: i32) -> (i32, i32, i32, i32) {
    %c8_i32 = arith.constant 8 : i32
    %0 = arith.muli %arg1, %c8_i32 : i32
    %c1_i32 = arith.constant 1 : i32
    %1 = arith.subi %0, %c1_i32 : i32
    %c0_i32 = arith.constant 0 : i32
    %2 = arith.maxsi %1, %c0_i32 : i32
    %c0_i32_0 = arith.constant 0 : i32
    %c0_i32_1 = arith.constant 0 : i32
    %c0_i32_2 = arith.constant 0 : i32
    return %arg0, %2, %c0_i32_0, %c0_i32_1 : i32, i32, i32, i32
  }
  func.func @transform_1(%arg0: i32, %arg1: i32) -> (i32, i32, i32, i32) {
    %c0_i32 = arith.constant 0 : i32
    %c0_i32_0 = arith.constant 0 : i32
    %c0_i32_1 = arith.constant 0 : i32
    return %arg0, %arg1, %c0_i32, %c0_i32_0 : i32, i32, i32, i32
  }
  func.func @transform_2(%arg0: i32, %arg1: i32) -> (i32, i32, i32, i32) {
    %c1_i32 = arith.constant 1 : i32
    %0 = arith.addi %arg1, %c1_i32 : i32
    %c8_i32 = arith.constant 8 : i32
    %1 = arith.muli %0, %c8_i32 : i32
    %c7_i32 = arith.constant 7 : i32
    %2 = arith.minsi %1, %c7_i32 : i32
    %c0_i32 = arith.constant 0 : i32
    %c0_i32_0 = arith.constant 0 : i32
    %c0_i32_1 = arith.constant 0 : i32
    return %arg0, %2, %c0_i32, %c0_i32_0 : i32, i32, i32, i32
  }
  func.func @transform_3(%arg0: i32, %arg1: i32) -> (i32, i32) {
    %c0_i32 = arith.constant 0 : i32
    %c0_i32_0 = arith.constant 0 : i32
    %c0_i32_1 = arith.constant 0 : i32
    return %c0_i32, %c0_i32_0 : i32, i32
  }
  func.func @transform_4(%arg0: i32, %arg1: i32) -> (i32, i32) {
    %c0_i32 = arith.constant 0 : i32
    %c0_i32_0 = arith.constant 0 : i32
    %c0_i32_1 = arith.constant 0 : i32
    return %c0_i32, %c0_i32_0 : i32, i32
  }
  func.func @transform_5(%arg0: i32, %arg1: i32) -> (i32, i32, i32, i32) {
    %c0_i32 = arith.constant 0 : i32
    %c0_i32_0 = arith.constant 0 : i32
    %c0_i32_1 = arith.constant 0 : i32
    return %arg0, %arg1, %c0_i32, %c0_i32_0 : i32, i32, i32, i32
  }
}

module attributes {stable_mosaic.version = 11 : i64} {
  func.func @kernel(%arg0: i32, %arg1: i32, %arg2: memref<1x1x8x16xbf16, #tpu.memory_space<vmem>>, %arg3: memref<1x8x8x16xbf16, #tpu.memory_space<vmem>>, %arg4: memref<1x1x8x16xbf16, #tpu.memory_space<vmem>>, %arg5: memref<1x16xf32, #tpu.memory_space<vmem>>, %arg6: memref<1x16xf32, #tpu.memory_space<vmem>>, %arg7: memref<144x32xbf16, #tpu.memory_space<vmem>>, %arg8: memref<1x32xf32, #tpu.memory_space<vmem>>, %arg9: memref<16x16xbf16, #tpu.memory_space<vmem>>, %arg10: memref<1x16xf32, #tpu.memory_space<vmem>>, %arg11: memref<1x8x8x16xbf16, #tpu.memory_space<vmem>>) attributes {dimension_semantics = [#tpu.dimension_semantics<parallel>, #tpu.dimension_semantics<parallel>], iteration_bounds = array<i64: 2, 1>, scalar_prefetch = 0 : i64, scratch_operands = 0 : i64, tpu.core_type = #tpu.core_type<tc>, window_params = [{transform_indices = @transform_0, window_bounds = array<i64: 1, 1, 8, 16>}, {transform_indices = @transform_1, window_bounds = array<i64: 1, 8, 8, 16>}, {transform_indices = @transform_2, window_bounds = array<i64: 1, 1, 8, 16>}, {pipeline_mode = #tpu.pipeline_mode<synchronous>, transform_indices = @transform_3, window_bounds = array<i64: 1, 16>}, {pipeline_mode = #tpu.pipeline_mode<synchronous>, transform_indices = @transform_4, window_bounds = array<i64: 1, 16>}, {pipeline_mode = #tpu.pipeline_mode<synchronous>, transform_indices = @transform_5, window_bounds = array<i64: 144, 32>}, {pipeline_mode = #tpu.pipeline_mode<synchronous>, transform_indices = @transform_6, window_bounds = array<i64: 1, 32>}, {pipeline_mode = #tpu.pipeline_mode<synchronous>, transform_indices = @transform_7, window_bounds = array<i64: 16, 16>}, {pipeline_mode = #tpu.pipeline_mode<synchronous>, transform_indices = @transform_8, window_bounds = array<i64: 1, 16>}, {transform_indices = @transform_9, window_bounds = array<i64: 1, 8, 8, 16>}]} {
    %c0 = arith.constant 0 : index
    %c0_0 = arith.constant 0 : index
    %c0_1 = arith.constant 0 : index
    %c0_2 = arith.constant 0 : index
    %0 = vector.load %arg3[%c0, %c0_0, %c0_1, %c0_2] : memref<1x8x8x16xbf16, #tpu.memory_space<vmem>>, vector<1x8x8x16xbf16>
    %1 = vector.shape_cast %0 : vector<1x8x8x16xbf16> to vector<8x8x16xbf16>
    %2 = arith.extf %1 : vector<8x8x16xbf16> to vector<8x8x16xf32>
    %c0_3 = arith.constant 0 : index
    %c0_4 = arith.constant 0 : index
    %c0_5 = arith.constant 0 : index
    %c0_6 = arith.constant 0 : index
    %3 = vector.load %arg2[%c0_3, %c0_4, %c0_5, %c0_6] : memref<1x1x8x16xbf16, #tpu.memory_space<vmem>>, vector<1x1x8x16xbf16>
    %4 = vector.shape_cast %3 : vector<1x1x8x16xbf16> to vector<1x8x16xbf16>
    %5 = arith.extf %4 : vector<1x8x16xbf16> to vector<1x8x16xf32>
    %c0_7 = arith.constant 0 : index
    %c0_8 = arith.constant 0 : index
    %6 = vector.load %arg5[%c0_7, %c0_8] : memref<1x16xf32, #tpu.memory_space<vmem>>, vector<1x16xf32>
    %c0_9 = arith.constant 0 : index
    %c0_10 = arith.constant 0 : index
    %7 = vector.load %arg6[%c0_9, %c0_10] : memref<1x16xf32, #tpu.memory_space<vmem>>, vector<1x16xf32>
    %cst = arith.constant dense<0.000000e+00> : vector<1x8xf32>
    %8 = vector.multi_reduction <add>, %5, %cst [2] : vector<1x8x16xf32> to vector<1x8xf32>
    %9 = vector.shape_cast %8 : vector<1x8xf32> to vector<1x8x1xf32>
    %cst_11 = arith.constant 1.600000e+01 : f32
    %10 = vector.broadcast %cst_11 : f32 to vector<1x8x1xf32>
    %11 = arith.divf %9, %10 : vector<1x8x1xf32>
    %12 = vector.broadcast %11 : vector<1x8x1xf32> to vector<1x8x16xf32>
    %13 = arith.subf %5, %12 : vector<1x8x16xf32>
    %14 = arith.mulf %13, %13 : vector<1x8x16xf32>
    %cst_12 = arith.constant dense<0.000000e+00> : vector<1x8xf32>
    %15 = vector.multi_reduction <add>, %14, %cst_12 [2] : vector<1x8x16xf32> to vector<1x8xf32>
    %16 = vector.shape_cast %15 : vector<1x8xf32> to vector<1x8x1xf32>
    %cst_13 = arith.constant 1.600000e+01 : f32
    %17 = vector.broadcast %cst_13 : f32 to vector<1x8x1xf32>
    %18 = arith.divf %16, %17 : vector<1x8x1xf32>
    %cst_14 = arith.constant 9.99999997E-7 : f32
    %19 = vector.broadcast %cst_14 : f32 to vector<1x8x1xf32>
    %20 = arith.addf %18, %19 : vector<1x8x1xf32>
    %21 = math.rsqrt %20 : vector<1x8x1xf32>
    %22 = vector.broadcast %21 : vector<1x8x1xf32> to vector<1x8x16xf32>
    %23 = arith.mulf %13, %22 : vector<1x8x16xf32>
    %24 = vector.shape_cast %6 : vector<1x16xf32> to vector<1x1x16xf32>
    %25 = vector.broadcast %24 : vector<1x1x16xf32> to vector<1x8x16xf32>
    %26 = arith.mulf %23, %25 : vector<1x8x16xf32>
    %27 = vector.shape_cast %7 : vector<1x16xf32> to vector<1x1x16xf32>
    %28 = vector.broadcast %27 : vector<1x1x16xf32> to vector<1x8x16xf32>
    %29 = arith.addf %26, %28 : vector<1x8x16xf32>
    %c0_15 = arith.constant 0 : index
    %c0_16 = arith.constant 0 : index
    %30 = vector.load %arg5[%c0_15, %c0_16] : memref<1x16xf32, #tpu.memory_space<vmem>>, vector<1x16xf32>
    %c0_17 = arith.constant 0 : index
    %c0_18 = arith.constant 0 : index
    %31 = vector.load %arg6[%c0_17, %c0_18] : memref<1x16xf32, #tpu.memory_space<vmem>>, vector<1x16xf32>
    %cst_19 = arith.constant dense<0.000000e+00> : vector<8x8xf32>
    %32 = vector.multi_reduction <add>, %2, %cst_19 [2] : vector<8x8x16xf32> to vector<8x8xf32>
    %33 = vector.shape_cast %32 : vector<8x8xf32> to vector<8x8x1xf32>
    %cst_20 = arith.constant 1.600000e+01 : f32
    %34 = vector.broadcast %cst_20 : f32 to vector<8x8x1xf32>
    %35 = arith.divf %33, %34 : vector<8x8x1xf32>
    %36 = vector.broadcast %35 : vector<8x8x1xf32> to vector<8x8x16xf32>
    %37 = arith.subf %2, %36 : vector<8x8x16xf32>
    %38 = arith.mulf %37, %37 : vector<8x8x16xf32>
    %cst_21 = arith.constant dense<0.000000e+00> : vector<8x8xf32>
    %39 = vector.multi_reduction <add>, %38, %cst_21 [2] : vector<8x8x16xf32> to vector<8x8xf32>
    %40 = vector.shape_cast %39 : vector<8x8xf32> to vector<8x8x1xf32>
    %cst_22 = arith.constant 1.600000e+01 : f32
    %41 = vector.broadcast %cst_22 : f32 to vector<8x8x1xf32>
    %42 = arith.divf %40, %41 : vector<8x8x1xf32>
    %cst_23 = arith.constant 9.99999997E-7 : f32
    %43 = vector.broadcast %cst_23 : f32 to vector<8x8x1xf32>
    %44 = arith.addf %42, %43 : vector<8x8x1xf32>
    %45 = math.rsqrt %44 : vector<8x8x1xf32>
    %46 = vector.broadcast %45 : vector<8x8x1xf32> to vector<8x8x16xf32>
    %47 = arith.mulf %37, %46 : vector<8x8x16xf32>
    %48 = vector.shape_cast %30 : vector<1x16xf32> to vector<1x1x16xf32>
    %49 = vector.broadcast %48 : vector<1x1x16xf32> to vector<8x8x16xf32>
    %50 = arith.mulf %47, %49 : vector<8x8x16xf32>
    %51 = vector.shape_cast %31 : vector<1x16xf32> to vector<1x1x16xf32>
    %52 = vector.broadcast %51 : vector<1x1x16xf32> to vector<8x8x16xf32>
    %53 = arith.addf %50, %52 : vector<8x8x16xf32>
    %c0_24 = arith.constant 0 : index
    %c0_25 = arith.constant 0 : index
    %c0_26 = arith.constant 0 : index
    %c0_27 = arith.constant 0 : index
    %54 = vector.load %arg4[%c0_24, %c0_25, %c0_26, %c0_27] : memref<1x1x8x16xbf16, #tpu.memory_space<vmem>>, vector<1x1x8x16xbf16>
    %55 = vector.shape_cast %54 : vector<1x1x8x16xbf16> to vector<1x8x16xbf16>
    %56 = arith.extf %55 : vector<1x8x16xbf16> to vector<1x8x16xf32>
    %c0_28 = arith.constant 0 : index
    %c0_29 = arith.constant 0 : index
    %57 = vector.load %arg5[%c0_28, %c0_29] : memref<1x16xf32, #tpu.memory_space<vmem>>, vector<1x16xf32>
    %c0_30 = arith.constant 0 : index
    %c0_31 = arith.constant 0 : index
    %58 = vector.load %arg6[%c0_30, %c0_31] : memref<1x16xf32, #tpu.memory_space<vmem>>, vector<1x16xf32>
    %cst_32 = arith.constant dense<0.000000e+00> : vector<1x8xf32>
    %59 = vector.multi_reduction <add>, %56, %cst_32 [2] : vector<1x8x16xf32> to vector<1x8xf32>
    %60 = vector.shape_cast %59 : vector<1x8xf32> to vector<1x8x1xf32>
    %cst_33 = arith.constant 1.600000e+01 : f32
    %61 = vector.broadcast %cst_33 : f32 to vector<1x8x1xf32>
    %62 = arith.divf %60, %61 : vector<1x8x1xf32>
    %63 = vector.broadcast %62 : vector<1x8x1xf32> to vector<1x8x16xf32>
    %64 = arith.subf %56, %63 : vector<1x8x16xf32>
    %65 = arith.mulf %64, %64 : vector<1x8x16xf32>
    %cst_34 = arith.constant dense<0.000000e+00> : vector<1x8xf32>
    %66 = vector.multi_reduction <add>, %65, %cst_34 [2] : vector<1x8x16xf32> to vector<1x8xf32>
    %67 = vector.shape_cast %66 : vector<1x8xf32> to vector<1x8x1xf32>
    %cst_35 = arith.constant 1.600000e+01 : f32
    %68 = vector.broadcast %cst_35 : f32 to vector<1x8x1xf32>
    %69 = arith.divf %67, %68 : vector<1x8x1xf32>
    %cst_36 = arith.constant 9.99999997E-7 : f32
    %70 = vector.broadcast %cst_36 : f32 to vector<1x8x1xf32>
    %71 = arith.addf %69, %70 : vector<1x8x1xf32>
    %72 = math.rsqrt %71 : vector<1x8x1xf32>
    %73 = vector.broadcast %72 : vector<1x8x1xf32> to vector<1x8x16xf32>
    %74 = arith.mulf %64, %73 : vector<1x8x16xf32>
    %75 = vector.shape_cast %57 : vector<1x16xf32> to vector<1x1x16xf32>
    %76 = vector.broadcast %75 : vector<1x1x16xf32> to vector<1x8x16xf32>
    %77 = arith.mulf %74, %76 : vector<1x8x16xf32>
    %78 = vector.shape_cast %58 : vector<1x16xf32> to vector<1x1x16xf32>
    %79 = vector.broadcast %78 : vector<1x1x16xf32> to vector<1x8x16xf32>
    %80 = arith.addf %77, %79 : vector<1x8x16xf32>
    %c0_i32 = arith.constant 0 : i32
    %81 = arith.cmpi eq, %arg1, %c0_i32 : i32
    %cst_37 = arith.constant 0.000000e+00 : f32
    %82 = vector.broadcast %cst_37 : f32 to vector<1x8x16xf32>
    %83 = arith.select %81, %82, %29 : vector<1x8x16xf32>
    %c0_i32_38 = arith.constant 0 : i32
    %84 = arith.cmpi eq, %arg1, %c0_i32_38 : i32
    %cst_39 = arith.constant 0.000000e+00 : f32
    %85 = vector.broadcast %cst_39 : f32 to vector<1x8x16xf32>
    %86 = arith.select %84, %85, %80 : vector<1x8x16xf32>
    %87 = tpu.concatenate %83, %53, %86 in 0 : vector<1x8x16xf32>, vector<8x8x16xf32>, vector<1x8x16xf32> -> vector<10x8x16xf32>
    %c0_40 = arith.constant 0 : index
    %c0_41 = arith.constant 0 : index
    %88 = vector.load %arg7[%c0_40, %c0_41] : memref<144x32xbf16, #tpu.memory_space<vmem>>, vector<144x32xbf16>
    %cst_42 = arith.constant 0.000000e+00 : f32
    %89 = vector.broadcast %cst_42 : f32 to vector<10x1x16xf32>
    %90 = tpu.concatenate %89, %87, %89 in 1 : vector<10x1x16xf32>, vector<10x8x16xf32>, vector<10x1x16xf32> -> vector<10x10x16xf32>
    %cst_43 = arith.constant 0.000000e+00 : f32
    %91 = vector.broadcast %cst_43 : f32 to vector<64x32xf32>
    %92 = vector.extract_strided_slice %90 {offsets = [0, 0, 0], sizes = [8, 8, 16], strides = [1, 1, 1]} : vector<10x10x16xf32> to vector<8x8x16xf32>
    %93 = vector.extract_strided_slice %90 {offsets = [0, 1, 0], sizes = [8, 8, 16], strides = [1, 1, 1]} : vector<10x10x16xf32> to vector<8x8x16xf32>
    %94 = vector.extract_strided_slice %90 {offsets = [0, 2, 0], sizes = [8, 8, 16], strides = [1, 1, 1]} : vector<10x10x16xf32> to vector<8x8x16xf32>
    %95 = tpu.concatenate %92, %93, %94 in 2 : vector<8x8x16xf32>, vector<8x8x16xf32>, vector<8x8x16xf32> -> vector<8x8x48xf32>
    %96 = vector.shape_cast %95 : vector<8x8x48xf32> to vector<64x48xf32>
    %97 = arith.truncf %96 : vector<64x48xf32> to vector<64x48xbf16>
    %98 = vector.extract_strided_slice %88 {offsets = [0, 0], sizes = [48, 32], strides = [1, 1]} : vector<144x32xbf16> to vector<48x32xbf16>
    %cst_44 = arith.constant dense<0.000000e+00> : vector<64x32xf32>
    %99 = tpu.matmul %97, %98, %cst_44 {dimension_numbers = #tpu.dot_dimension_numbers<[1], [0], [0], [1], [0, 0, 1, 1], [], []>} : vector<64x48xbf16>, vector<48x32xbf16>, vector<64x32xf32> -> vector<64x32xf32>
    %100 = arith.addf %91, %99 : vector<64x32xf32>
    %101 = vector.extract_strided_slice %90 {offsets = [1, 0, 0], sizes = [8, 8, 16], strides = [1, 1, 1]} : vector<10x10x16xf32> to vector<8x8x16xf32>
    %102 = vector.extract_strided_slice %90 {offsets = [1, 1, 0], sizes = [8, 8, 16], strides = [1, 1, 1]} : vector<10x10x16xf32> to vector<8x8x16xf32>
    %103 = vector.extract_strided_slice %90 {offsets = [1, 2, 0], sizes = [8, 8, 16], strides = [1, 1, 1]} : vector<10x10x16xf32> to vector<8x8x16xf32>
    %104 = tpu.concatenate %101, %102, %103 in 2 : vector<8x8x16xf32>, vector<8x8x16xf32>, vector<8x8x16xf32> -> vector<8x8x48xf32>
    %105 = vector.shape_cast %104 : vector<8x8x48xf32> to vector<64x48xf32>
    %106 = arith.truncf %105 : vector<64x48xf32> to vector<64x48xbf16>
    %107 = vector.extract_strided_slice %88 {offsets = [48, 0], sizes = [48, 32], strides = [1, 1]} : vector<144x32xbf16> to vector<48x32xbf16>
    %cst_45 = arith.constant dense<0.000000e+00> : vector<64x32xf32>
    %108 = tpu.matmul %106, %107, %cst_45 {dimension_numbers = #tpu.dot_dimension_numbers<[1], [0], [0], [1], [0, 0, 1, 1], [], []>} : vector<64x48xbf16>, vector<48x32xbf16>, vector<64x32xf32> -> vector<64x32xf32>
    %109 = arith.addf %100, %108 : vector<64x32xf32>
    %110 = vector.extract_strided_slice %90 {offsets = [2, 0, 0], sizes = [8, 8, 16], strides = [1, 1, 1]} : vector<10x10x16xf32> to vector<8x8x16xf32>
    %111 = vector.extract_strided_slice %90 {offsets = [2, 1, 0], sizes = [8, 8, 16], strides = [1, 1, 1]} : vector<10x10x16xf32> to vector<8x8x16xf32>
    %112 = vector.extract_strided_slice %90 {offsets = [2, 2, 0], sizes = [8, 8, 16], strides = [1, 1, 1]} : vector<10x10x16xf32> to vector<8x8x16xf32>
    %113 = tpu.concatenate %110, %111, %112 in 2 : vector<8x8x16xf32>, vector<8x8x16xf32>, vector<8x8x16xf32> -> vector<8x8x48xf32>
    %114 = vector.shape_cast %113 : vector<8x8x48xf32> to vector<64x48xf32>
    %115 = arith.truncf %114 : vector<64x48xf32> to vector<64x48xbf16>
    %116 = vector.extract_strided_slice %88 {offsets = [96, 0], sizes = [48, 32], strides = [1, 1]} : vector<144x32xbf16> to vector<48x32xbf16>
    %cst_46 = arith.constant dense<0.000000e+00> : vector<64x32xf32>
    %117 = tpu.matmul %115, %116, %cst_46 {dimension_numbers = #tpu.dot_dimension_numbers<[1], [0], [0], [1], [0, 0, 1, 1], [], []>} : vector<64x48xbf16>, vector<48x32xbf16>, vector<64x32xf32> -> vector<64x32xf32>
    %118 = arith.addf %109, %117 : vector<64x32xf32>
    %c0_47 = arith.constant 0 : index
    %c0_48 = arith.constant 0 : index
    %119 = vector.load %arg8[%c0_47, %c0_48] : memref<1x32xf32, #tpu.memory_space<vmem>>, vector<1x32xf32>
    %120 = vector.broadcast %119 : vector<1x32xf32> to vector<64x32xf32>
    %121 = arith.addf %118, %120 : vector<64x32xf32>
    %122 = vector.extract_strided_slice %121 {offsets = [0, 0], sizes = [64, 16], strides = [1, 1]} : vector<64x32xf32> to vector<64x16xf32>
    %123 = vector.extract_strided_slice %121 {offsets = [0, 16], sizes = [64, 16], strides = [1, 1]} : vector<64x32xf32> to vector<64x16xf32>
    %124 = arith.mulf %122, %123 : vector<64x16xf32>
    %125 = arith.truncf %124 : vector<64x16xf32> to vector<64x16xbf16>
    %c0_49 = arith.constant 0 : index
    %c0_50 = arith.constant 0 : index
    %126 = vector.load %arg9[%c0_49, %c0_50] : memref<16x16xbf16, #tpu.memory_space<vmem>>, vector<16x16xbf16>
    %cst_51 = arith.constant dense<0.000000e+00> : vector<64x16xf32>
    %127 = tpu.matmul %125, %126, %cst_51 {dimension_numbers = #tpu.dot_dimension_numbers<[1], [0], [0], [1], [0, 0, 1, 1], [], []>} : vector<64x16xbf16>, vector<16x16xbf16>, vector<64x16xf32> -> vector<64x16xf32>
    %c0_52 = arith.constant 0 : index
    %c0_53 = arith.constant 0 : index
    %128 = vector.load %arg10[%c0_52, %c0_53] : memref<1x16xf32, #tpu.memory_space<vmem>>, vector<1x16xf32>
    %129 = vector.broadcast %128 : vector<1x16xf32> to vector<64x16xf32>
    %130 = arith.addf %127, %129 : vector<64x16xf32>
    %131 = vector.shape_cast %2 : vector<8x8x16xf32> to vector<64x16xf32>
    %132 = arith.addf %130, %131 : vector<64x16xf32>
    %133 = vector.shape_cast %132 : vector<64x16xf32> to vector<8x8x16xf32>
    %134 = arith.truncf %133 : vector<8x8x16xf32> to vector<8x8x16xbf16>
    %c0_54 = arith.constant 0 : index
    %c0_55 = arith.constant 0 : index
    %c0_56 = arith.constant 0 : index
    %c0_57 = arith.constant 0 : index
    %135 = vector.load %arg11[%c0_54, %c0_55, %c0_56, %c0_57] : memref<1x8x8x16xbf16, #tpu.memory_space<vmem>>, vector<1x8x8x16xbf16>
    %136 = vector.shape_cast %135 : vector<1x8x8x16xbf16> to vector<8x8x16xbf16>
    %137 = vector.shape_cast %134 : vector<8x8x16xbf16> to vector<1x8x8x16xbf16>
    tpu.vector_store %arg11[%c0_54, %c0_55, %c0_56, %c0_57], %137 {strides = array<i32>} : memref<1x8x8x16xbf16, #tpu.memory_space<vmem>>, vector<1x8x8x16xbf16>,
    return
  }
  func.func @transform_0(%arg0: i32, %arg1: i32) -> (i32, i32, i32, i32) {
    %c8_i32 = arith.constant 8 : i32
    %0 = arith.muli %arg1, %c8_i32 : i32
    %c1_i32 = arith.constant 1 : i32
    %1 = arith.subi %0, %c1_i32 : i32
    %c0_i32 = arith.constant 0 : i32
    %2 = arith.maxsi %1, %c0_i32 : i32
    %c0_i32_0 = arith.constant 0 : i32
    %c0_i32_1 = arith.constant 0 : i32
    %c0_i32_2 = arith.constant 0 : i32
    return %arg0, %2, %c0_i32_0, %c0_i32_1 : i32, i32, i32, i32
  }
  func.func @transform_1(%arg0: i32, %arg1: i32) -> (i32, i32, i32, i32) {
    %c0_i32 = arith.constant 0 : i32
    %c0_i32_0 = arith.constant 0 : i32
    %c0_i32_1 = arith.constant 0 : i32
    return %arg0, %arg1, %c0_i32, %c0_i32_0 : i32, i32, i32, i32
  }
  func.func @transform_2(%arg0: i32, %arg1: i32) -> (i32, i32, i32, i32) {
    %c1_i32 = arith.constant 1 : i32
    %0 = arith.addi %arg1, %c1_i32 : i32
    %c8_i32 = arith.constant 8 : i32
    %1 = arith.muli %0, %c8_i32 : i32
    %c7_i32 = arith.constant 7 : i32
    %2 = arith.minsi %1, %c7_i32 : i32
    %c0_i32 = arith.constant 0 : i32
    %c0_i32_0 = arith.constant 0 : i32
    %c0_i32_1 = arith.constant 0 : i32
    return %arg0, %2, %c0_i32, %c0_i32_0 : i32, i32, i32, i32
  }
  func.func @transform_3(%arg0: i32, %arg1: i32) -> (i32, i32) {
    %c0_i32 = arith.constant 0 : i32
    %c0_i32_0 = arith.constant 0 : i32
    %c0_i32_1 = arith.constant 0 : i32
    return %c0_i32, %c0_i32_0 : i32, i32
  }
  func.func @transform_4(%arg0: i32, %arg1: i32) -> (i32, i32) {
    %c0_i32 = arith.constant 0 : i32
    %c0_i32_0 = arith.constant 0 : i32
    %c0_i32_1 = arith.constant 0 : i32
    return %c0_i32, %c0_i32_0 : i32, i32
  }
  func.func @transform_5(%arg0: i32, %arg1: i32) -> (i32, i32) {
    %c0_i32 = arith.constant 0 : i32
    %c0_i32_0 = arith.constant 0 : i32
    %c0_i32_1 = arith.constant 0 : i32
    return %c0_i32, %c0_i32_0 : i32, i32
  }
  func.func @transform_6(%arg0: i32, %arg1: i32) -> (i32, i32) {
    %c0_i32 = arith.constant 0 : i32
    %c0_i32_0 = arith.constant 0 : i32
    %c0_i32_1 = arith.constant 0 : i32
    return %c0_i32, %c0_i32_0 : i32, i32
  }
  func.func @transform_7(%arg0: i32, %arg1: i32) -> (i32, i32) {
    %c0_i32 = arith.constant 0 : i32
    %c0_i32_0 = arith.constant 0 : i32
    %c0_i32_1 = arith.constant 0 : i32
    return %c0_i32, %c0_i32_0 : i32, i32
  }
  func.func @transform_8(%arg0: i32, %arg1: i32) -> (i32, i32) {
    %c0_i32 = arith.constant 0 : i32
    %c0_i32_0 = arith.constant 0 : i32
    %c0_i32_1 = arith.constant 0 : i32
    return %c0_i32, %c0_i32_0 : i32, i32
  }
  func.func @transform_9(%arg0: i32, %arg1: i32) -> (i32, i32, i32, i32) {
    %c0_i32 = arith.constant 0 : i32
    %c0_i32_0 = arith.constant 0 : i32
    %c0_i32_1 = arith.constant 0 : i32
    return %arg0, %arg1, %c0_i32, %c0_i32_0 : i32, i32, i32, i32
  }
}

module attributes {stable_mosaic.version = 11 : i64} {
  func.func @kernel(%arg0: i32, %arg1: i32, %arg2: memref<1x2x8x12xbf16, #tpu.memory_space<vmem>>, %arg3: memref<1x8x8x12xbf16, #tpu.memory_space<vmem>>, %arg4: memref<1x2x8x12xbf16, #tpu.memory_space<vmem>>, %arg5: memref<1x12xf32, #tpu.memory_space<vmem>>, %arg6: memref<1x12xf32, #tpu.memory_space<vmem>>, %arg7: memref<108x16xbf16, #tpu.memory_space<vmem>>, %arg8: memref<1x16xf32, #tpu.memory_space<vmem>>, %arg9: memref<144x16xbf16, #tpu.memory_space<vmem>>, %arg10: memref<1x16xf32, #tpu.memory_space<vmem>>, %arg11: memref<1x8x8x16xbf16, #tpu.memory_space<vmem>>) attributes {dimension_semantics = [#tpu.dimension_semantics<parallel>, #tpu.dimension_semantics<parallel>], iteration_bounds = array<i64: 2, 1>, scalar_prefetch = 0 : i64, scratch_operands = 0 : i64, tpu.core_type = #tpu.core_type<tc>, window_params = [{transform_indices = @transform_0, window_bounds = array<i64: 1, 2, 8, 12>}, {transform_indices = @transform_1, window_bounds = array<i64: 1, 8, 8, 12>}, {transform_indices = @transform_2, window_bounds = array<i64: 1, 2, 8, 12>}, {pipeline_mode = #tpu.pipeline_mode<synchronous>, transform_indices = @transform_3, window_bounds = array<i64: 1, 12>}, {pipeline_mode = #tpu.pipeline_mode<synchronous>, transform_indices = @transform_4, window_bounds = array<i64: 1, 12>}, {pipeline_mode = #tpu.pipeline_mode<synchronous>, transform_indices = @transform_5, window_bounds = array<i64: 108, 16>}, {pipeline_mode = #tpu.pipeline_mode<synchronous>, transform_indices = @transform_6, window_bounds = array<i64: 1, 16>}, {pipeline_mode = #tpu.pipeline_mode<synchronous>, transform_indices = @transform_7, window_bounds = array<i64: 144, 16>}, {pipeline_mode = #tpu.pipeline_mode<synchronous>, transform_indices = @transform_8, window_bounds = array<i64: 1, 16>}, {transform_indices = @transform_9, window_bounds = array<i64: 1, 8, 8, 16>}]} {
    %c0 = arith.constant 0 : index
    %c0_0 = arith.constant 0 : index
    %c0_1 = arith.constant 0 : index
    %c0_2 = arith.constant 0 : index
    %0 = vector.load %arg2[%c0, %c0_0, %c0_1, %c0_2] : memref<1x2x8x12xbf16, #tpu.memory_space<vmem>>, vector<1x2x8x12xbf16>
    %1 = vector.shape_cast %0 : vector<1x2x8x12xbf16> to vector<2x8x12xbf16>
    %2 = arith.extf %1 : vector<2x8x12xbf16> to vector<2x8x12xf32>
    %c0_3 = arith.constant 0 : index
    %c0_4 = arith.constant 0 : index
    %c0_5 = arith.constant 0 : index
    %c0_6 = arith.constant 0 : index
    %3 = vector.load %arg3[%c0_3, %c0_4, %c0_5, %c0_6] : memref<1x8x8x12xbf16, #tpu.memory_space<vmem>>, vector<1x8x8x12xbf16>
    %4 = vector.shape_cast %3 : vector<1x8x8x12xbf16> to vector<8x8x12xbf16>
    %5 = arith.extf %4 : vector<8x8x12xbf16> to vector<8x8x12xf32>
    %c0_7 = arith.constant 0 : index
    %c0_8 = arith.constant 0 : index
    %c0_9 = arith.constant 0 : index
    %c0_10 = arith.constant 0 : index
    %6 = vector.load %arg4[%c0_7, %c0_8, %c0_9, %c0_10] : memref<1x2x8x12xbf16, #tpu.memory_space<vmem>>, vector<1x2x8x12xbf16>
    %7 = vector.shape_cast %6 : vector<1x2x8x12xbf16> to vector<2x8x12xbf16>
    %8 = arith.extf %7 : vector<2x8x12xbf16> to vector<2x8x12xf32>
    %c0_i32 = arith.constant 0 : i32
    %9 = arith.cmpi eq, %arg1, %c0_i32 : i32
    %cst = arith.constant 0.000000e+00 : f32
    %10 = vector.broadcast %cst : f32 to vector<2x8x12xf32>
    %11 = arith.select %9, %10, %2 : vector<2x8x12xf32>
    %c0_i32_11 = arith.constant 0 : i32
    %12 = arith.cmpi eq, %arg1, %c0_i32_11 : i32
    %cst_12 = arith.constant 0.000000e+00 : f32
    %13 = vector.broadcast %cst_12 : f32 to vector<2x8x12xf32>
    %14 = arith.select %12, %13, %8 : vector<2x8x12xf32>
    %15 = tpu.concatenate %11, %5, %14 in 0 : vector<2x8x12xf32>, vector<8x8x12xf32>, vector<2x8x12xf32> -> vector<12x8x12xf32>
    %c0_13 = arith.constant 0 : index
    %c0_14 = arith.constant 0 : index
    %16 = vector.load %arg7[%c0_13, %c0_14] : memref<108x16xbf16, #tpu.memory_space<vmem>>, vector<108x16xbf16>
    %cst_15 = arith.constant 0.000000e+00 : f32
    %17 = vector.broadcast %cst_15 : f32 to vector<12x1x12xf32>
    %18 = tpu.concatenate %17, %15, %17 in 1 : vector<12x1x12xf32>, vector<12x8x12xf32>, vector<12x1x12xf32> -> vector<12x10x12xf32>
    %cst_16 = arith.constant 0.000000e+00 : f32
    %19 = vector.broadcast %cst_16 : f32 to vector<80x16xf32>
    %20 = vector.extract_strided_slice %18 {offsets = [0, 0, 0], sizes = [10, 8, 12], strides = [1, 1, 1]} : vector<12x10x12xf32> to vector<10x8x12xf32>
    %21 = vector.extract_strided_slice %18 {offsets = [0, 1, 0], sizes = [10, 8, 12], strides = [1, 1, 1]} : vector<12x10x12xf32> to vector<10x8x12xf32>
    %22 = vector.extract_strided_slice %18 {offsets = [0, 2, 0], sizes = [10, 8, 12], strides = [1, 1, 1]} : vector<12x10x12xf32> to vector<10x8x12xf32>
    %23 = tpu.concatenate %20, %21, %22 in 2 : vector<10x8x12xf32>, vector<10x8x12xf32>, vector<10x8x12xf32> -> vector<10x8x36xf32>
    %24 = vector.shape_cast %23 : vector<10x8x36xf32> to vector<80x36xf32>
    %25 = arith.truncf %24 : vector<80x36xf32> to vector<80x36xbf16>
    %26 = vector.extract_strided_slice %16 {offsets = [0, 0], sizes = [36, 16], strides = [1, 1]} : vector<108x16xbf16> to vector<36x16xbf16>
    %cst_17 = arith.constant dense<0.000000e+00> : vector<80x16xf32>
    %27 = tpu.matmul %25, %26, %cst_17 {dimension_numbers = #tpu.dot_dimension_numbers<[1], [0], [0], [1], [0, 0, 1, 1], [], []>} : vector<80x36xbf16>, vector<36x16xbf16>, vector<80x16xf32> -> vector<80x16xf32>
    %28 = arith.addf %19, %27 : vector<80x16xf32>
    %29 = vector.extract_strided_slice %18 {offsets = [1, 0, 0], sizes = [10, 8, 12], strides = [1, 1, 1]} : vector<12x10x12xf32> to vector<10x8x12xf32>
    %30 = vector.extract_strided_slice %18 {offsets = [1, 1, 0], sizes = [10, 8, 12], strides = [1, 1, 1]} : vector<12x10x12xf32> to vector<10x8x12xf32>
    %31 = vector.extract_strided_slice %18 {offsets = [1, 2, 0], sizes = [10, 8, 12], strides = [1, 1, 1]} : vector<12x10x12xf32> to vector<10x8x12xf32>
    %32 = tpu.concatenate %29, %30, %31 in 2 : vector<10x8x12xf32>, vector<10x8x12xf32>, vector<10x8x12xf32> -> vector<10x8x36xf32>
    %33 = vector.shape_cast %32 : vector<10x8x36xf32> to vector<80x36xf32>
    %34 = arith.truncf %33 : vector<80x36xf32> to vector<80x36xbf16>
    %35 = vector.extract_strided_slice %16 {offsets = [36, 0], sizes = [36, 16], strides = [1, 1]} : vector<108x16xbf16> to vector<36x16xbf16>
    %cst_18 = arith.constant dense<0.000000e+00> : vector<80x16xf32>
    %36 = tpu.matmul %34, %35, %cst_18 {dimension_numbers = #tpu.dot_dimension_numbers<[1], [0], [0], [1], [0, 0, 1, 1], [], []>} : vector<80x36xbf16>, vector<36x16xbf16>, vector<80x16xf32> -> vector<80x16xf32>
    %37 = arith.addf %28, %36 : vector<80x16xf32>
    %38 = vector.extract_strided_slice %18 {offsets = [2, 0, 0], sizes = [10, 8, 12], strides = [1, 1, 1]} : vector<12x10x12xf32> to vector<10x8x12xf32>
    %39 = vector.extract_strided_slice %18 {offsets = [2, 1, 0], sizes = [10, 8, 12], strides = [1, 1, 1]} : vector<12x10x12xf32> to vector<10x8x12xf32>
    %40 = vector.extract_strided_slice %18 {offsets = [2, 2, 0], sizes = [10, 8, 12], strides = [1, 1, 1]} : vector<12x10x12xf32> to vector<10x8x12xf32>
    %41 = tpu.concatenate %38, %39, %40 in 2 : vector<10x8x12xf32>, vector<10x8x12xf32>, vector<10x8x12xf32> -> vector<10x8x36xf32>
    %42 = vector.shape_cast %41 : vector<10x8x36xf32> to vector<80x36xf32>
    %43 = arith.truncf %42 : vector<80x36xf32> to vector<80x36xbf16>
    %44 = vector.extract_strided_slice %16 {offsets = [72, 0], sizes = [36, 16], strides = [1, 1]} : vector<108x16xbf16> to vector<36x16xbf16>
    %cst_19 = arith.constant dense<0.000000e+00> : vector<80x16xf32>
    %45 = tpu.matmul %43, %44, %cst_19 {dimension_numbers = #tpu.dot_dimension_numbers<[1], [0], [0], [1], [0, 0, 1, 1], [], []>} : vector<80x36xbf16>, vector<36x16xbf16>, vector<80x16xf32> -> vector<80x16xf32>
    %46 = arith.addf %37, %45 : vector<80x16xf32>
    %c0_20 = arith.constant 0 : index
    %c0_21 = arith.constant 0 : index
    %47 = vector.load %arg8[%c0_20, %c0_21] : memref<1x16xf32, #tpu.memory_space<vmem>>, vector<1x16xf32>
    %48 = vector.broadcast %47 : vector<1x16xf32> to vector<80x16xf32>
    %49 = arith.addf %46, %48 : vector<80x16xf32>
    %50 = vector.shape_cast %49 : vector<80x16xf32> to vector<10x8x16xf32>
    %c0_i32_22 = arith.constant 0 : i32
    %51 = arith.cmpi eq, %arg1, %c0_i32_22 : i32
    %cst_23 = arith.constant 0.000000e+00 : f32
    %52 = vector.broadcast %cst_23 : f32 to vector<1x8x16xf32>
    %53 = vector.extract_strided_slice %50 {offsets = [0, 0, 0], sizes = [1, 8, 16], strides = [1, 1, 1]} : vector<10x8x16xf32> to vector<1x8x16xf32>
    %54 = arith.select %51, %52, %53 : vector<1x8x16xf32>
    %c0_i32_24 = arith.constant 0 : i32
    %55 = arith.cmpi eq, %arg1, %c0_i32_24 : i32
    %cst_25 = arith.constant 0.000000e+00 : f32
    %56 = vector.broadcast %cst_25 : f32 to vector<1x8x16xf32>
    %57 = vector.extract_strided_slice %50 {offsets = [9, 0, 0], sizes = [1, 8, 16], strides = [1, 1, 1]} : vector<10x8x16xf32> to vector<1x8x16xf32>
    %58 = arith.select %55, %56, %57 : vector<1x8x16xf32>
    %59 = vector.extract_strided_slice %50 {offsets = [1, 0, 0], sizes = [8, 8, 16], strides = [1, 1, 1]} : vector<10x8x16xf32> to vector<8x8x16xf32>
    %60 = tpu.concatenate %54, %59, %58 in 0 : vector<1x8x16xf32>, vector<8x8x16xf32>, vector<1x8x16xf32> -> vector<10x8x16xf32>
    %c0_26 = arith.constant 0 : index
    %c0_27 = arith.constant 0 : index
    %61 = vector.load %arg9[%c0_26, %c0_27] : memref<144x16xbf16, #tpu.memory_space<vmem>>, vector<144x16xbf16>
    %cst_28 = arith.constant 0.000000e+00 : f32
    %62 = vector.broadcast %cst_28 : f32 to vector<10x1x16xf32>
    %63 = tpu.concatenate %62, %60, %62 in 1 : vector<10x1x16xf32>, vector<10x8x16xf32>, vector<10x1x16xf32> -> vector<10x10x16xf32>
    %cst_29 = arith.constant 0.000000e+00 : f32
    %64 = vector.broadcast %cst_29 : f32 to vector<64x16xf32>
    %65 = vector.extract_strided_slice %63 {offsets = [0, 0, 0], sizes = [8, 8, 16], strides = [1, 1, 1]} : vector<10x10x16xf32> to vector<8x8x16xf32>
    %66 = vector.extract_strided_slice %63 {offsets = [0, 1, 0], sizes = [8, 8, 16], strides = [1, 1, 1]} : vector<10x10x16xf32> to vector<8x8x16xf32>
    %67 = vector.extract_strided_slice %63 {offsets = [0, 2, 0], sizes = [8, 8, 16], strides = [1, 1, 1]} : vector<10x10x16xf32> to vector<8x8x16xf32>
    %68 = tpu.concatenate %65, %66, %67 in 2 : vector<8x8x16xf32>, vector<8x8x16xf32>, vector<8x8x16xf32> -> vector<8x8x48xf32>
    %69 = vector.shape_cast %68 : vector<8x8x48xf32> to vector<64x48xf32>
    %70 = arith.truncf %69 : vector<64x48xf32> to vector<64x48xbf16>
    %71 = vector.extract_strided_slice %61 {offsets = [0, 0], sizes = [48, 16], strides = [1, 1]} : vector<144x16xbf16> to vector<48x16xbf16>
    %cst_30 = arith.constant dense<0.000000e+00> : vector<64x16xf32>
    %72 = tpu.matmul %70, %71, %cst_30 {dimension_numbers = #tpu.dot_dimension_numbers<[1], [0], [0], [1], [0, 0, 1, 1], [], []>} : vector<64x48xbf16>, vector<48x16xbf16>, vector<64x16xf32> -> vector<64x16xf32>
    %73 = arith.addf %64, %72 : vector<64x16xf32>
    %74 = vector.extract_strided_slice %63 {offsets = [1, 0, 0], sizes = [8, 8, 16], strides = [1, 1, 1]} : vector<10x10x16xf32> to vector<8x8x16xf32>
    %75 = vector.extract_strided_slice %63 {offsets = [1, 1, 0], sizes = [8, 8, 16], strides = [1, 1, 1]} : vector<10x10x16xf32> to vector<8x8x16xf32>
    %76 = vector.extract_strided_slice %63 {offsets = [1, 2, 0], sizes = [8, 8, 16], strides = [1, 1, 1]} : vector<10x10x16xf32> to vector<8x8x16xf32>
    %77 = tpu.concatenate %74, %75, %76 in 2 : vector<8x8x16xf32>, vector<8x8x16xf32>, vector<8x8x16xf32> -> vector<8x8x48xf32>
    %78 = vector.shape_cast %77 : vector<8x8x48xf32> to vector<64x48xf32>
    %79 = arith.truncf %78 : vector<64x48xf32> to vector<64x48xbf16>
    %80 = vector.extract_strided_slice %61 {offsets = [48, 0], sizes = [48, 16], strides = [1, 1]} : vector<144x16xbf16> to vector<48x16xbf16>
    %cst_31 = arith.constant dense<0.000000e+00> : vector<64x16xf32>
    %81 = tpu.matmul %79, %80, %cst_31 {dimension_numbers = #tpu.dot_dimension_numbers<[1], [0], [0], [1], [0, 0, 1, 1], [], []>} : vector<64x48xbf16>, vector<48x16xbf16>, vector<64x16xf32> -> vector<64x16xf32>
    %82 = arith.addf %73, %81 : vector<64x16xf32>
    %83 = vector.extract_strided_slice %63 {offsets = [2, 0, 0], sizes = [8, 8, 16], strides = [1, 1, 1]} : vector<10x10x16xf32> to vector<8x8x16xf32>
    %84 = vector.extract_strided_slice %63 {offsets = [2, 1, 0], sizes = [8, 8, 16], strides = [1, 1, 1]} : vector<10x10x16xf32> to vector<8x8x16xf32>
    %85 = vector.extract_strided_slice %63 {offsets = [2, 2, 0], sizes = [8, 8, 16], strides = [1, 1, 1]} : vector<10x10x16xf32> to vector<8x8x16xf32>
    %86 = tpu.concatenate %83, %84, %85 in 2 : vector<8x8x16xf32>, vector<8x8x16xf32>, vector<8x8x16xf32> -> vector<8x8x48xf32>
    %87 = vector.shape_cast %86 : vector<8x8x48xf32> to vector<64x48xf32>
    %88 = arith.truncf %87 : vector<64x48xf32> to vector<64x48xbf16>
    %89 = vector.extract_strided_slice %61 {offsets = [96, 0], sizes = [48, 16], strides = [1, 1]} : vector<144x16xbf16> to vector<48x16xbf16>
    %cst_32 = arith.constant dense<0.000000e+00> : vector<64x16xf32>
    %90 = tpu.matmul %88, %89, %cst_32 {dimension_numbers = #tpu.dot_dimension_numbers<[1], [0], [0], [1], [0, 0, 1, 1], [], []>} : vector<64x48xbf16>, vector<48x16xbf16>, vector<64x16xf32> -> vector<64x16xf32>
    %91 = arith.addf %82, %90 : vector<64x16xf32>
    %c0_33 = arith.constant 0 : index
    %c0_34 = arith.constant 0 : index
    %92 = vector.load %arg10[%c0_33, %c0_34] : memref<1x16xf32, #tpu.memory_space<vmem>>, vector<1x16xf32>
    %93 = vector.broadcast %92 : vector<1x16xf32> to vector<64x16xf32>
    %94 = arith.addf %91, %93 : vector<64x16xf32>
    %95 = arith.mulf %94, %94 : vector<64x16xf32>
    %96 = arith.mulf %94, %95 : vector<64x16xf32>
    %cst_35 = arith.constant 4.471500e-02 : f32
    %97 = vector.broadcast %cst_35 : f32 to vector<64x16xf32>
    %98 = arith.mulf %97, %96 : vector<64x16xf32>
    %99 = arith.addf %94, %98 : vector<64x16xf32>
    %cst_36 = arith.constant 0.797884583 : f32
    %100 = vector.broadcast %cst_36 : f32 to vector<64x16xf32>
    %101 = arith.mulf %100, %99 : vector<64x16xf32>
    %102 = math.tanh %101 : vector<64x16xf32>
    %cst_37 = arith.constant 1.000000e+00 : f32
    %103 = vector.broadcast %cst_37 : f32 to vector<64x16xf32>
    %104 = arith.addf %103, %102 : vector<64x16xf32>
    %cst_38 = arith.constant 5.000000e-01 : f32
    %105 = vector.broadcast %cst_38 : f32 to vector<64x16xf32>
    %106 = arith.mulf %105, %104 : vector<64x16xf32>
    %107 = arith.mulf %94, %106 : vector<64x16xf32>
    %108 = vector.shape_cast %107 : vector<64x16xf32> to vector<8x8x16xf32>
    %109 = arith.truncf %108 : vector<8x8x16xf32> to vector<8x8x16xbf16>
    %c0_39 = arith.constant 0 : index
    %c0_40 = arith.constant 0 : index
    %c0_41 = arith.constant 0 : index
    %c0_42 = arith.constant 0 : index
    %110 = vector.load %arg11[%c0_39, %c0_40, %c0_41, %c0_42] : memref<1x8x8x16xbf16, #tpu.memory_space<vmem>>, vector<1x8x8x16xbf16>
    %111 = vector.shape_cast %110 : vector<1x8x8x16xbf16> to vector<8x8x16xbf16>
    %112 = vector.shape_cast %109 : vector<8x8x16xbf16> to vector<1x8x8x16xbf16>
    tpu.vector_store %arg11[%c0_39, %c0_40, %c0_41, %c0_42], %112 {strides = array<i32>} : memref<1x8x8x16xbf16, #tpu.memory_space<vmem>>, vector<1x8x8x16xbf16>,
    return
  }
  func.func @transform_0(%arg0: i32, %arg1: i32) -> (i32, i32, i32, i32) {
    %c4_i32 = arith.constant 4 : i32
    %0 = arith.muli %arg1, %c4_i32 : i32
    %c1_i32 = arith.constant 1 : i32
    %1 = arith.subi %0, %c1_i32 : i32
    %c0_i32 = arith.constant 0 : i32
    %2 = arith.maxsi %1, %c0_i32 : i32
    %c0_i32_0 = arith.constant 0 : i32
    %c0_i32_1 = arith.constant 0 : i32
    %c0_i32_2 = arith.constant 0 : i32
    return %arg0, %2, %c0_i32_0, %c0_i32_1 : i32, i32, i32, i32
  }
  func.func @transform_1(%arg0: i32, %arg1: i32) -> (i32, i32, i32, i32) {
    %c0_i32 = arith.constant 0 : i32
    %c0_i32_0 = arith.constant 0 : i32
    %c0_i32_1 = arith.constant 0 : i32
    return %arg0, %arg1, %c0_i32, %c0_i32_0 : i32, i32, i32, i32
  }
  func.func @transform_2(%arg0: i32, %arg1: i32) -> (i32, i32, i32, i32) {
    %c1_i32 = arith.constant 1 : i32
    %0 = arith.addi %arg1, %c1_i32 : i32
    %c4_i32 = arith.constant 4 : i32
    %1 = arith.muli %0, %c4_i32 : i32
    %c3_i32 = arith.constant 3 : i32
    %2 = arith.minsi %1, %c3_i32 : i32
    %c0_i32 = arith.constant 0 : i32
    %c0_i32_0 = arith.constant 0 : i32
    %c0_i32_1 = arith.constant 0 : i32
    return %arg0, %2, %c0_i32, %c0_i32_0 : i32, i32, i32, i32
  }
  func.func @transform_3(%arg0: i32, %arg1: i32) -> (i32, i32) {
    %c0_i32 = arith.constant 0 : i32
    %c0_i32_0 = arith.constant 0 : i32
    %c0_i32_1 = arith.constant 0 : i32
    return %c0_i32, %c0_i32_0 : i32, i32
  }
  func.func @transform_4(%arg0: i32, %arg1: i32) -> (i32, i32) {
    %c0_i32 = arith.constant 0 : i32
    %c0_i32_0 = arith.constant 0 : i32
    %c0_i32_1 = arith.constant 0 : i32
    return %c0_i32, %c0_i32_0 : i32, i32
  }
  func.func @transform_5(%arg0: i32, %arg1: i32) -> (i32, i32) {
    %c0_i32 = arith.constant 0 : i32
    %c0_i32_0 = arith.constant 0 : i32
    %c0_i32_1 = arith.constant 0 : i32
    return %c0_i32, %c0_i32_0 : i32, i32
  }
  func.func @transform_6(%arg0: i32, %arg1: i32) -> (i32, i32) {
    %c0_i32 = arith.constant 0 : i32
    %c0_i32_0 = arith.constant 0 : i32
    %c0_i32_1 = arith.constant 0 : i32
    return %c0_i32, %c0_i32_0 : i32, i32
  }
  func.func @transform_7(%arg0: i32, %arg1: i32) -> (i32, i32) {
    %c0_i32 = arith.constant 0 : i32
    %c0_i32_0 = arith.constant 0 : i32
    %c0_i32_1 = arith.constant 0 : i32
    return %c0_i32, %c0_i32_0 : i32, i32
  }
  func.func @transform_8(%arg0: i32, %arg1: i32) -> (i32, i32) {
    %c0_i32 = arith.constant 0 : i32
    %c0_i32_0 = arith.constant 0 : i32
    %c0_i32_1 = arith.constant 0 : i32
    return %c0_i32, %c0_i32_0 : i32, i32
  }
  func.func @transform_9(%arg0: i32, %arg1: i32) -> (i32, i32, i32, i32) {
    %c0_i32 = arith.constant 0 : i32
    %c0_i32_0 = arith.constant 0 : i32
    %c0_i32_1 = arith.constant 0 : i32
    return %arg0, %arg1, %c0_i32, %c0_i32_0 : i32, i32, i32, i32
  }
}

module attributes {stable_mosaic.version = 11 : i64} {
  func.func @kernel(%arg0: i32, %arg1: i32, %arg2: memref<1x2x8x16xbf16, #tpu.memory_space<vmem>>, %arg3: memref<1x8x8x16xbf16, #tpu.memory_space<vmem>>, %arg4: memref<1x2x8x16xbf16, #tpu.memory_space<vmem>>, %arg5: memref<1x2x8x16xbf16, #tpu.memory_space<vmem>>, %arg6: memref<1x8x8x16xbf16, #tpu.memory_space<vmem>>, %arg7: memref<1x2x8x16xbf16, #tpu.memory_space<vmem>>, %arg8: memref<1x1xf32, #tpu.memory_space<vmem>>, %arg9: memref<1x16xf32, #tpu.memory_space<vmem>>, %arg10: memref<1x16xf32, #tpu.memory_space<vmem>>, %arg11: memref<144x16xbf16, #tpu.memory_space<vmem>>, %arg12: memref<1x16xf32, #tpu.memory_space<vmem>>, %arg13: memref<144x48xbf16, #tpu.memory_space<vmem>>, %arg14: memref<1x48xf32, #tpu.memory_space<vmem>>, %arg15: memref<1x8x8x48xf32, #tpu.memory_space<vmem>>) attributes {dimension_semantics = [#tpu.dimension_semantics<parallel>, #tpu.dimension_semantics<parallel>], iteration_bounds = array<i64: 2, 1>, scalar_prefetch = 0 : i64, scratch_operands = 0 : i64, tpu.core_type = #tpu.core_type<tc>, window_params = [{transform_indices = @transform_0, window_bounds = array<i64: 1, 2, 8, 16>}, {transform_indices = @transform_1, window_bounds = array<i64: 1, 8, 8, 16>}, {transform_indices = @transform_2, window_bounds = array<i64: 1, 2, 8, 16>}, {transform_indices = @transform_3, window_bounds = array<i64: 1, 2, 8, 16>}, {transform_indices = @transform_4, window_bounds = array<i64: 1, 8, 8, 16>}, {transform_indices = @transform_5, window_bounds = array<i64: 1, 2, 8, 16>}, {pipeline_mode = #tpu.pipeline_mode<synchronous>, transform_indices = @transform_6, window_bounds = array<i64: 1, 1>}, {pipeline_mode = #tpu.pipeline_mode<synchronous>, transform_indices = @transform_7, window_bounds = array<i64: 1, 16>}, {pipeline_mode = #tpu.pipeline_mode<synchronous>, transform_indices = @transform_8, window_bounds = array<i64: 1, 16>}, {pipeline_mode = #tpu.pipeline_mode<synchronous>, transform_indices = @transform_9, window_bounds = array<i64: 144, 16>}, {pipeline_mode = #tpu.pipeline_mode<synchronous>, transform_indices = @transform_10, window_bounds = array<i64: 1, 16>}, {pipeline_mode = #tpu.pipeline_mode<synchronous>, transform_indices = @transform_11, window_bounds = array<i64: 144, 48>}, {pipeline_mode = #tpu.pipeline_mode<synchronous>, transform_indices = @transform_12, window_bounds = array<i64: 1, 48>}, {transform_indices = @transform_13, window_bounds = array<i64: 1, 8, 8, 48>}]} {
    %c0 = arith.constant 0 : index
    %c0_0 = arith.constant 0 : index
    %0 = vector.load %arg8[%c0, %c0_0] : memref<1x1xf32, #tpu.memory_space<vmem>>, vector<1x1xf32>
    %1 = vector.extract %0[0, 0] : f32 from vector<1x1xf32>
    %c0_1 = arith.constant 0 : index
    %c0_2 = arith.constant 0 : index
    %c0_3 = arith.constant 0 : index
    %c0_4 = arith.constant 0 : index
    %2 = vector.load %arg2[%c0_1, %c0_2, %c0_3, %c0_4] : memref<1x2x8x16xbf16, #tpu.memory_space<vmem>>, vector<1x2x8x16xbf16>
    %3 = vector.shape_cast %2 : vector<1x2x8x16xbf16> to vector<2x8x16xbf16>
    %4 = arith.extf %3 : vector<2x8x16xbf16> to vector<2x8x16xf32>
    %5 = vector.broadcast %1 : f32 to vector<2x8x16xf32>
    %6 = arith.mulf %5, %4 : vector<2x8x16xf32>
    %c0_5 = arith.constant 0 : index
    %c0_6 = arith.constant 0 : index
    %c0_7 = arith.constant 0 : index
    %c0_8 = arith.constant 0 : index
    %7 = vector.load %arg5[%c0_5, %c0_6, %c0_7, %c0_8] : memref<1x2x8x16xbf16, #tpu.memory_space<vmem>>, vector<1x2x8x16xbf16>
    %8 = vector.shape_cast %7 : vector<1x2x8x16xbf16> to vector<2x8x16xbf16>
    %9 = arith.extf %8 : vector<2x8x16xbf16> to vector<2x8x16xf32>
    %10 = arith.addf %6, %9 : vector<2x8x16xf32>
    %c0_9 = arith.constant 0 : index
    %c0_10 = arith.constant 0 : index
    %11 = vector.load %arg9[%c0_9, %c0_10] : memref<1x16xf32, #tpu.memory_space<vmem>>, vector<1x16xf32>
    %c0_11 = arith.constant 0 : index
    %c0_12 = arith.constant 0 : index
    %12 = vector.load %arg10[%c0_11, %c0_12] : memref<1x16xf32, #tpu.memory_space<vmem>>, vector<1x16xf32>
    %cst = arith.constant dense<0.000000e+00> : vector<2x8xf32>
    %13 = vector.multi_reduction <add>, %10, %cst [2] : vector<2x8x16xf32> to vector<2x8xf32>
    %14 = vector.shape_cast %13 : vector<2x8xf32> to vector<2x8x1xf32>
    %cst_13 = arith.constant 1.600000e+01 : f32
    %15 = vector.broadcast %cst_13 : f32 to vector<2x8x1xf32>
    %16 = arith.divf %14, %15 : vector<2x8x1xf32>
    %17 = vector.broadcast %16 : vector<2x8x1xf32> to vector<2x8x16xf32>
    %18 = arith.subf %10, %17 : vector<2x8x16xf32>
    %19 = arith.mulf %18, %18 : vector<2x8x16xf32>
    %cst_14 = arith.constant dense<0.000000e+00> : vector<2x8xf32>
    %20 = vector.multi_reduction <add>, %19, %cst_14 [2] : vector<2x8x16xf32> to vector<2x8xf32>
    %21 = vector.shape_cast %20 : vector<2x8xf32> to vector<2x8x1xf32>
    %cst_15 = arith.constant 1.600000e+01 : f32
    %22 = vector.broadcast %cst_15 : f32 to vector<2x8x1xf32>
    %23 = arith.divf %21, %22 : vector<2x8x1xf32>
    %cst_16 = arith.constant 9.99999997E-7 : f32
    %24 = vector.broadcast %cst_16 : f32 to vector<2x8x1xf32>
    %25 = arith.addf %23, %24 : vector<2x8x1xf32>
    %26 = math.rsqrt %25 : vector<2x8x1xf32>
    %27 = vector.broadcast %26 : vector<2x8x1xf32> to vector<2x8x16xf32>
    %28 = arith.mulf %18, %27 : vector<2x8x16xf32>
    %29 = vector.shape_cast %11 : vector<1x16xf32> to vector<1x1x16xf32>
    %30 = vector.broadcast %29 : vector<1x1x16xf32> to vector<2x8x16xf32>
    %31 = arith.mulf %28, %30 : vector<2x8x16xf32>
    %32 = vector.shape_cast %12 : vector<1x16xf32> to vector<1x1x16xf32>
    %33 = vector.broadcast %32 : vector<1x1x16xf32> to vector<2x8x16xf32>
    %34 = arith.addf %31, %33 : vector<2x8x16xf32>
    %c0_17 = arith.constant 0 : index
    %c0_18 = arith.constant 0 : index
    %c0_19 = arith.constant 0 : index
    %c0_20 = arith.constant 0 : index
    %35 = vector.load %arg3[%c0_17, %c0_18, %c0_19, %c0_20] : memref<1x8x8x16xbf16, #tpu.memory_space<vmem>>, vector<1x8x8x16xbf16>
    %36 = vector.shape_cast %35 : vector<1x8x8x16xbf16> to vector<8x8x16xbf16>
    %37 = arith.extf %36 : vector<8x8x16xbf16> to vector<8x8x16xf32>
    %38 = vector.broadcast %1 : f32 to vector<8x8x16xf32>
    %39 = arith.mulf %38, %37 : vector<8x8x16xf32>
    %c0_21 = arith.constant 0 : index
    %c0_22 = arith.constant 0 : index
    %c0_23 = arith.constant 0 : index
    %c0_24 = arith.constant 0 : index
    %40 = vector.load %arg6[%c0_21, %c0_22, %c0_23, %c0_24] : memref<1x8x8x16xbf16, #tpu.memory_space<vmem>>, vector<1x8x8x16xbf16>
    %41 = vector.shape_cast %40 : vector<1x8x8x16xbf16> to vector<8x8x16xbf16>
    %42 = arith.extf %41 : vector<8x8x16xbf16> to vector<8x8x16xf32>
    %43 = arith.addf %39, %42 : vector<8x8x16xf32>
    %c0_25 = arith.constant 0 : index
    %c0_26 = arith.constant 0 : index
    %44 = vector.load %arg9[%c0_25, %c0_26] : memref<1x16xf32, #tpu.memory_space<vmem>>, vector<1x16xf32>
    %c0_27 = arith.constant 0 : index
    %c0_28 = arith.constant 0 : index
    %45 = vector.load %arg10[%c0_27, %c0_28] : memref<1x16xf32, #tpu.memory_space<vmem>>, vector<1x16xf32>
    %cst_29 = arith.constant dense<0.000000e+00> : vector<8x8xf32>
    %46 = vector.multi_reduction <add>, %43, %cst_29 [2] : vector<8x8x16xf32> to vector<8x8xf32>
    %47 = vector.shape_cast %46 : vector<8x8xf32> to vector<8x8x1xf32>
    %cst_30 = arith.constant 1.600000e+01 : f32
    %48 = vector.broadcast %cst_30 : f32 to vector<8x8x1xf32>
    %49 = arith.divf %47, %48 : vector<8x8x1xf32>
    %50 = vector.broadcast %49 : vector<8x8x1xf32> to vector<8x8x16xf32>
    %51 = arith.subf %43, %50 : vector<8x8x16xf32>
    %52 = arith.mulf %51, %51 : vector<8x8x16xf32>
    %cst_31 = arith.constant dense<0.000000e+00> : vector<8x8xf32>
    %53 = vector.multi_reduction <add>, %52, %cst_31 [2] : vector<8x8x16xf32> to vector<8x8xf32>
    %54 = vector.shape_cast %53 : vector<8x8xf32> to vector<8x8x1xf32>
    %cst_32 = arith.constant 1.600000e+01 : f32
    %55 = vector.broadcast %cst_32 : f32 to vector<8x8x1xf32>
    %56 = arith.divf %54, %55 : vector<8x8x1xf32>
    %cst_33 = arith.constant 9.99999997E-7 : f32
    %57 = vector.broadcast %cst_33 : f32 to vector<8x8x1xf32>
    %58 = arith.addf %56, %57 : vector<8x8x1xf32>
    %59 = math.rsqrt %58 : vector<8x8x1xf32>
    %60 = vector.broadcast %59 : vector<8x8x1xf32> to vector<8x8x16xf32>
    %61 = arith.mulf %51, %60 : vector<8x8x16xf32>
    %62 = vector.shape_cast %44 : vector<1x16xf32> to vector<1x1x16xf32>
    %63 = vector.broadcast %62 : vector<1x1x16xf32> to vector<8x8x16xf32>
    %64 = arith.mulf %61, %63 : vector<8x8x16xf32>
    %65 = vector.shape_cast %45 : vector<1x16xf32> to vector<1x1x16xf32>
    %66 = vector.broadcast %65 : vector<1x1x16xf32> to vector<8x8x16xf32>
    %67 = arith.addf %64, %66 : vector<8x8x16xf32>
    %c0_34 = arith.constant 0 : index
    %c0_35 = arith.constant 0 : index
    %c0_36 = arith.constant 0 : index
    %c0_37 = arith.constant 0 : index
    %68 = vector.load %arg4[%c0_34, %c0_35, %c0_36, %c0_37] : memref<1x2x8x16xbf16, #tpu.memory_space<vmem>>, vector<1x2x8x16xbf16>
    %69 = vector.shape_cast %68 : vector<1x2x8x16xbf16> to vector<2x8x16xbf16>
    %70 = arith.extf %69 : vector<2x8x16xbf16> to vector<2x8x16xf32>
    %71 = vector.broadcast %1 : f32 to vector<2x8x16xf32>
    %72 = arith.mulf %71, %70 : vector<2x8x16xf32>
    %c0_38 = arith.constant 0 : index
    %c0_39 = arith.constant 0 : index
    %c0_40 = arith.constant 0 : index
    %c0_41 = arith.constant 0 : index
    %73 = vector.load %arg7[%c0_38, %c0_39, %c0_40, %c0_41] : memref<1x2x8x16xbf16, #tpu.memory_space<vmem>>, vector<1x2x8x16xbf16>
    %74 = vector.shape_cast %73 : vector<1x2x8x16xbf16> to vector<2x8x16xbf16>
    %75 = arith.extf %74 : vector<2x8x16xbf16> to vector<2x8x16xf32>
    %76 = arith.addf %72, %75 : vector<2x8x16xf32>
    %c0_42 = arith.constant 0 : index
    %c0_43 = arith.constant 0 : index
    %77 = vector.load %arg9[%c0_42, %c0_43] : memref<1x16xf32, #tpu.memory_space<vmem>>, vector<1x16xf32>
    %c0_44 = arith.constant 0 : index
    %c0_45 = arith.constant 0 : index
    %78 = vector.load %arg10[%c0_44, %c0_45] : memref<1x16xf32, #tpu.memory_space<vmem>>, vector<1x16xf32>
    %cst_46 = arith.constant dense<0.000000e+00> : vector<2x8xf32>
    %79 = vector.multi_reduction <add>, %76, %cst_46 [2] : vector<2x8x16xf32> to vector<2x8xf32>
    %80 = vector.shape_cast %79 : vector<2x8xf32> to vector<2x8x1xf32>
    %cst_47 = arith.constant 1.600000e+01 : f32
    %81 = vector.broadcast %cst_47 : f32 to vector<2x8x1xf32>
    %82 = arith.divf %80, %81 : vector<2x8x1xf32>
    %83 = vector.broadcast %82 : vector<2x8x1xf32> to vector<2x8x16xf32>
    %84 = arith.subf %76, %83 : vector<2x8x16xf32>
    %85 = arith.mulf %84, %84 : vector<2x8x16xf32>
    %cst_48 = arith.constant dense<0.000000e+00> : vector<2x8xf32>
    %86 = vector.multi_reduction <add>, %85, %cst_48 [2] : vector<2x8x16xf32> to vector<2x8xf32>
    %87 = vector.shape_cast %86 : vector<2x8xf32> to vector<2x8x1xf32>
    %cst_49 = arith.constant 1.600000e+01 : f32
    %88 = vector.broadcast %cst_49 : f32 to vector<2x8x1xf32>
    %89 = arith.divf %87, %88 : vector<2x8x1xf32>
    %cst_50 = arith.constant 9.99999997E-7 : f32
    %90 = vector.broadcast %cst_50 : f32 to vector<2x8x1xf32>
    %91 = arith.addf %89, %90 : vector<2x8x1xf32>
    %92 = math.rsqrt %91 : vector<2x8x1xf32>
    %93 = vector.broadcast %92 : vector<2x8x1xf32> to vector<2x8x16xf32>
    %94 = arith.mulf %84, %93 : vector<2x8x16xf32>
    %95 = vector.shape_cast %77 : vector<1x16xf32> to vector<1x1x16xf32>
    %96 = vector.broadcast %95 : vector<1x1x16xf32> to vector<2x8x16xf32>
    %97 = arith.mulf %94, %96 : vector<2x8x16xf32>
    %98 = vector.shape_cast %78 : vector<1x16xf32> to vector<1x1x16xf32>
    %99 = vector.broadcast %98 : vector<1x1x16xf32> to vector<2x8x16xf32>
    %100 = arith.addf %97, %99 : vector<2x8x16xf32>
    %c0_i32 = arith.constant 0 : i32
    %101 = arith.cmpi eq, %arg1, %c0_i32 : i32
    %cst_51 = arith.constant 0.000000e+00 : f32
    %102 = vector.broadcast %cst_51 : f32 to vector<2x8x16xf32>
    %103 = arith.select %101, %102, %34 : vector<2x8x16xf32>
    %c0_i32_52 = arith.constant 0 : i32
    %104 = arith.cmpi eq, %arg1, %c0_i32_52 : i32
    %cst_53 = arith.constant 0.000000e+00 : f32
    %105 = vector.broadcast %cst_53 : f32 to vector<2x8x16xf32>
    %106 = arith.select %104, %105, %100 : vector<2x8x16xf32>
    %107 = tpu.concatenate %103, %67, %106 in 0 : vector<2x8x16xf32>, vector<8x8x16xf32>, vector<2x8x16xf32> -> vector<12x8x16xf32>
    %c0_54 = arith.constant 0 : index
    %c0_55 = arith.constant 0 : index
    %108 = vector.load %arg11[%c0_54, %c0_55] : memref<144x16xbf16, #tpu.memory_space<vmem>>, vector<144x16xbf16>
    %cst_56 = arith.constant 0.000000e+00 : f32
    %109 = vector.broadcast %cst_56 : f32 to vector<12x1x16xf32>
    %110 = tpu.concatenate %109, %107, %109 in 1 : vector<12x1x16xf32>, vector<12x8x16xf32>, vector<12x1x16xf32> -> vector<12x10x16xf32>
    %cst_57 = arith.constant 0.000000e+00 : f32
    %111 = vector.broadcast %cst_57 : f32 to vector<80x16xf32>
    %112 = vector.extract_strided_slice %110 {offsets = [0, 0, 0], sizes = [10, 8, 16], strides = [1, 1, 1]} : vector<12x10x16xf32> to vector<10x8x16xf32>
    %113 = vector.extract_strided_slice %110 {offsets = [0, 1, 0], sizes = [10, 8, 16], strides = [1, 1, 1]} : vector<12x10x16xf32> to vector<10x8x16xf32>
    %114 = vector.extract_strided_slice %110 {offsets = [0, 2, 0], sizes = [10, 8, 16], strides = [1, 1, 1]} : vector<12x10x16xf32> to vector<10x8x16xf32>
    %115 = tpu.concatenate %112, %113, %114 in 2 : vector<10x8x16xf32>, vector<10x8x16xf32>, vector<10x8x16xf32> -> vector<10x8x48xf32>
    %116 = vector.shape_cast %115 : vector<10x8x48xf32> to vector<80x48xf32>
    %117 = arith.truncf %116 : vector<80x48xf32> to vector<80x48xbf16>
    %118 = vector.extract_strided_slice %108 {offsets = [0, 0], sizes = [48, 16], strides = [1, 1]} : vector<144x16xbf16> to vector<48x16xbf16>
    %cst_58 = arith.constant dense<0.000000e+00> : vector<80x16xf32>
    %119 = tpu.matmul %117, %118, %cst_58 {dimension_numbers = #tpu.dot_dimension_numbers<[1], [0], [0], [1], [0, 0, 1, 1], [], []>} : vector<80x48xbf16>, vector<48x16xbf16>, vector<80x16xf32> -> vector<80x16xf32>
    %120 = arith.addf %111, %119 : vector<80x16xf32>
    %121 = vector.extract_strided_slice %110 {offsets = [1, 0, 0], sizes = [10, 8, 16], strides = [1, 1, 1]} : vector<12x10x16xf32> to vector<10x8x16xf32>
    %122 = vector.extract_strided_slice %110 {offsets = [1, 1, 0], sizes = [10, 8, 16], strides = [1, 1, 1]} : vector<12x10x16xf32> to vector<10x8x16xf32>
    %123 = vector.extract_strided_slice %110 {offsets = [1, 2, 0], sizes = [10, 8, 16], strides = [1, 1, 1]} : vector<12x10x16xf32> to vector<10x8x16xf32>
    %124 = tpu.concatenate %121, %122, %123 in 2 : vector<10x8x16xf32>, vector<10x8x16xf32>, vector<10x8x16xf32> -> vector<10x8x48xf32>
    %125 = vector.shape_cast %124 : vector<10x8x48xf32> to vector<80x48xf32>
    %126 = arith.truncf %125 : vector<80x48xf32> to vector<80x48xbf16>
    %127 = vector.extract_strided_slice %108 {offsets = [48, 0], sizes = [48, 16], strides = [1, 1]} : vector<144x16xbf16> to vector<48x16xbf16>
    %cst_59 = arith.constant dense<0.000000e+00> : vector<80x16xf32>
    %128 = tpu.matmul %126, %127, %cst_59 {dimension_numbers = #tpu.dot_dimension_numbers<[1], [0], [0], [1], [0, 0, 1, 1], [], []>} : vector<80x48xbf16>, vector<48x16xbf16>, vector<80x16xf32> -> vector<80x16xf32>
    %129 = arith.addf %120, %128 : vector<80x16xf32>
    %130 = vector.extract_strided_slice %110 {offsets = [2, 0, 0], sizes = [10, 8, 16], strides = [1, 1, 1]} : vector<12x10x16xf32> to vector<10x8x16xf32>
    %131 = vector.extract_strided_slice %110 {offsets = [2, 1, 0], sizes = [10, 8, 16], strides = [1, 1, 1]} : vector<12x10x16xf32> to vector<10x8x16xf32>
    %132 = vector.extract_strided_slice %110 {offsets = [2, 2, 0], sizes = [10, 8, 16], strides = [1, 1, 1]} : vector<12x10x16xf32> to vector<10x8x16xf32>
    %133 = tpu.concatenate %130, %131, %132 in 2 : vector<10x8x16xf32>, vector<10x8x16xf32>, vector<10x8x16xf32> -> vector<10x8x48xf32>
    %134 = vector.shape_cast %133 : vector<10x8x48xf32> to vector<80x48xf32>
    %135 = arith.truncf %134 : vector<80x48xf32> to vector<80x48xbf16>
    %136 = vector.extract_strided_slice %108 {offsets = [96, 0], sizes = [48, 16], strides = [1, 1]} : vector<144x16xbf16> to vector<48x16xbf16>
    %cst_60 = arith.constant dense<0.000000e+00> : vector<80x16xf32>
    %137 = tpu.matmul %135, %136, %cst_60 {dimension_numbers = #tpu.dot_dimension_numbers<[1], [0], [0], [1], [0, 0, 1, 1], [], []>} : vector<80x48xbf16>, vector<48x16xbf16>, vector<80x16xf32> -> vector<80x16xf32>
    %138 = arith.addf %129, %137 : vector<80x16xf32>
    %c0_61 = arith.constant 0 : index
    %c0_62 = arith.constant 0 : index
    %139 = vector.load %arg12[%c0_61, %c0_62] : memref<1x16xf32, #tpu.memory_space<vmem>>, vector<1x16xf32>
    %140 = vector.broadcast %139 : vector<1x16xf32> to vector<80x16xf32>
    %141 = arith.addf %138, %140 : vector<80x16xf32>
    %142 = vector.shape_cast %141 : vector<80x16xf32> to vector<10x8x16xf32>
    %c0_i32_63 = arith.constant 0 : i32
    %143 = arith.cmpi eq, %arg1, %c0_i32_63 : i32
    %cst_64 = arith.constant 0.000000e+00 : f32
    %144 = vector.broadcast %cst_64 : f32 to vector<1x8x16xf32>
    %145 = vector.extract_strided_slice %142 {offsets = [0, 0, 0], sizes = [1, 8, 16], strides = [1, 1, 1]} : vector<10x8x16xf32> to vector<1x8x16xf32>
    %146 = arith.select %143, %144, %145 : vector<1x8x16xf32>
    %c0_i32_65 = arith.constant 0 : i32
    %147 = arith.cmpi eq, %arg1, %c0_i32_65 : i32
    %cst_66 = arith.constant 0.000000e+00 : f32
    %148 = vector.broadcast %cst_66 : f32 to vector<1x8x16xf32>
    %149 = vector.extract_strided_slice %142 {offsets = [9, 0, 0], sizes = [1, 8, 16], strides = [1, 1, 1]} : vector<10x8x16xf32> to vector<1x8x16xf32>
    %150 = arith.select %147, %148, %149 : vector<1x8x16xf32>
    %151 = vector.extract_strided_slice %142 {offsets = [1, 0, 0], sizes = [8, 8, 16], strides = [1, 1, 1]} : vector<10x8x16xf32> to vector<8x8x16xf32>
    %152 = tpu.concatenate %146, %151, %150 in 0 : vector<1x8x16xf32>, vector<8x8x16xf32>, vector<1x8x16xf32> -> vector<10x8x16xf32>
    %c0_67 = arith.constant 0 : index
    %c0_68 = arith.constant 0 : index
    %153 = vector.load %arg13[%c0_67, %c0_68] : memref<144x48xbf16, #tpu.memory_space<vmem>>, vector<144x48xbf16>
    %cst_69 = arith.constant 0.000000e+00 : f32
    %154 = vector.broadcast %cst_69 : f32 to vector<10x1x16xf32>
    %155 = tpu.concatenate %154, %152, %154 in 1 : vector<10x1x16xf32>, vector<10x8x16xf32>, vector<10x1x16xf32> -> vector<10x10x16xf32>
    %cst_70 = arith.constant 0.000000e+00 : f32
    %156 = vector.broadcast %cst_70 : f32 to vector<64x48xf32>
    %157 = vector.extract_strided_slice %155 {offsets = [0, 0, 0], sizes = [8, 8, 16], strides = [1, 1, 1]} : vector<10x10x16xf32> to vector<8x8x16xf32>
    %158 = vector.extract_strided_slice %155 {offsets = [0, 1, 0], sizes = [8, 8, 16], strides = [1, 1, 1]} : vector<10x10x16xf32> to vector<8x8x16xf32>
    %159 = vector.extract_strided_slice %155 {offsets = [0, 2, 0], sizes = [8, 8, 16], strides = [1, 1, 1]} : vector<10x10x16xf32> to vector<8x8x16xf32>
    %160 = tpu.concatenate %157, %158, %159 in 2 : vector<8x8x16xf32>, vector<8x8x16xf32>, vector<8x8x16xf32> -> vector<8x8x48xf32>
    %161 = vector.shape_cast %160 : vector<8x8x48xf32> to vector<64x48xf32>
    %162 = arith.truncf %161 : vector<64x48xf32> to vector<64x48xbf16>
    %163 = vector.extract_strided_slice %153 {offsets = [0, 0], sizes = [48, 48], strides = [1, 1]} : vector<144x48xbf16> to vector<48x48xbf16>
    %cst_71 = arith.constant dense<0.000000e+00> : vector<64x48xf32>
    %164 = tpu.matmul %162, %163, %cst_71 {dimension_numbers = #tpu.dot_dimension_numbers<[1], [0], [0], [1], [0, 0, 1, 1], [], []>} : vector<64x48xbf16>, vector<48x48xbf16>, vector<64x48xf32> -> vector<64x48xf32>
    %165 = arith.addf %156, %164 : vector<64x48xf32>
    %166 = vector.extract_strided_slice %155 {offsets = [1, 0, 0], sizes = [8, 8, 16], strides = [1, 1, 1]} : vector<10x10x16xf32> to vector<8x8x16xf32>
    %167 = vector.extract_strided_slice %155 {offsets = [1, 1, 0], sizes = [8, 8, 16], strides = [1, 1, 1]} : vector<10x10x16xf32> to vector<8x8x16xf32>
    %168 = vector.extract_strided_slice %155 {offsets = [1, 2, 0], sizes = [8, 8, 16], strides = [1, 1, 1]} : vector<10x10x16xf32> to vector<8x8x16xf32>
    %169 = tpu.concatenate %166, %167, %168 in 2 : vector<8x8x16xf32>, vector<8x8x16xf32>, vector<8x8x16xf32> -> vector<8x8x48xf32>
    %170 = vector.shape_cast %169 : vector<8x8x48xf32> to vector<64x48xf32>
    %171 = arith.truncf %170 : vector<64x48xf32> to vector<64x48xbf16>
    %172 = vector.extract_strided_slice %153 {offsets = [48, 0], sizes = [48, 48], strides = [1, 1]} : vector<144x48xbf16> to vector<48x48xbf16>
    %cst_72 = arith.constant dense<0.000000e+00> : vector<64x48xf32>
    %173 = tpu.matmul %171, %172, %cst_72 {dimension_numbers = #tpu.dot_dimension_numbers<[1], [0], [0], [1], [0, 0, 1, 1], [], []>} : vector<64x48xbf16>, vector<48x48xbf16>, vector<64x48xf32> -> vector<64x48xf32>
    %174 = arith.addf %165, %173 : vector<64x48xf32>
    %175 = vector.extract_strided_slice %155 {offsets = [2, 0, 0], sizes = [8, 8, 16], strides = [1, 1, 1]} : vector<10x10x16xf32> to vector<8x8x16xf32>
    %176 = vector.extract_strided_slice %155 {offsets = [2, 1, 0], sizes = [8, 8, 16], strides = [1, 1, 1]} : vector<10x10x16xf32> to vector<8x8x16xf32>
    %177 = vector.extract_strided_slice %155 {offsets = [2, 2, 0], sizes = [8, 8, 16], strides = [1, 1, 1]} : vector<10x10x16xf32> to vector<8x8x16xf32>
    %178 = tpu.concatenate %175, %176, %177 in 2 : vector<8x8x16xf32>, vector<8x8x16xf32>, vector<8x8x16xf32> -> vector<8x8x48xf32>
    %179 = vector.shape_cast %178 : vector<8x8x48xf32> to vector<64x48xf32>
    %180 = arith.truncf %179 : vector<64x48xf32> to vector<64x48xbf16>
    %181 = vector.extract_strided_slice %153 {offsets = [96, 0], sizes = [48, 48], strides = [1, 1]} : vector<144x48xbf16> to vector<48x48xbf16>
    %cst_73 = arith.constant dense<0.000000e+00> : vector<64x48xf32>
    %182 = tpu.matmul %180, %181, %cst_73 {dimension_numbers = #tpu.dot_dimension_numbers<[1], [0], [0], [1], [0, 0, 1, 1], [], []>} : vector<64x48xbf16>, vector<48x48xbf16>, vector<64x48xf32> -> vector<64x48xf32>
    %183 = arith.addf %174, %182 : vector<64x48xf32>
    %c0_74 = arith.constant 0 : index
    %c0_75 = arith.constant 0 : index
    %184 = vector.load %arg14[%c0_74, %c0_75] : memref<1x48xf32, #tpu.memory_space<vmem>>, vector<1x48xf32>
    %185 = vector.broadcast %184 : vector<1x48xf32> to vector<64x48xf32>
    %186 = arith.addf %183, %185 : vector<64x48xf32>
    %187 = vector.shape_cast %186 : vector<64x48xf32> to vector<8x8x48xf32>
    %c0_76 = arith.constant 0 : index
    %c0_77 = arith.constant 0 : index
    %c0_78 = arith.constant 0 : index
    %c0_79 = arith.constant 0 : index
    %188 = vector.load %arg15[%c0_76, %c0_77, %c0_78, %c0_79] : memref<1x8x8x48xf32, #tpu.memory_space<vmem>>, vector<1x8x8x48xf32>
    %189 = vector.shape_cast %188 : vector<1x8x8x48xf32> to vector<8x8x48xf32>
    %190 = vector.shape_cast %187 : vector<8x8x48xf32> to vector<1x8x8x48xf32>
    tpu.vector_store %arg15[%c0_76, %c0_77, %c0_78, %c0_79], %190 {strides = array<i32>} : memref<1x8x8x48xf32, #tpu.memory_space<vmem>>, vector<1x8x8x48xf32>,
    return
  }
  func.func @transform_0(%arg0: i32, %arg1: i32) -> (i32, i32, i32, i32) {
    %c4_i32 = arith.constant 4 : i32
    %0 = arith.muli %arg1, %c4_i32 : i32
    %c1_i32 = arith.constant 1 : i32
    %1 = arith.subi %0, %c1_i32 : i32
    %c0_i32 = arith.constant 0 : i32
    %2 = arith.maxsi %1, %c0_i32 : i32
    %c0_i32_0 = arith.constant 0 : i32
    %c0_i32_1 = arith.constant 0 : i32
    %c0_i32_2 = arith.constant 0 : i32
    return %arg0, %2, %c0_i32_0, %c0_i32_1 : i32, i32, i32, i32
  }
  func.func @transform_1(%arg0: i32, %arg1: i32) -> (i32, i32, i32, i32) {
    %c0_i32 = arith.constant 0 : i32
    %c0_i32_0 = arith.constant 0 : i32
    %c0_i32_1 = arith.constant 0 : i32
    return %arg0, %arg1, %c0_i32, %c0_i32_0 : i32, i32, i32, i32
  }
  func.func @transform_2(%arg0: i32, %arg1: i32) -> (i32, i32, i32, i32) {
    %c1_i32 = arith.constant 1 : i32
    %0 = arith.addi %arg1, %c1_i32 : i32
    %c4_i32 = arith.constant 4 : i32
    %1 = arith.muli %0, %c4_i32 : i32
    %c3_i32 = arith.constant 3 : i32
    %2 = arith.minsi %1, %c3_i32 : i32
    %c0_i32 = arith.constant 0 : i32
    %c0_i32_0 = arith.constant 0 : i32
    %c0_i32_1 = arith.constant 0 : i32
    return %arg0, %2, %c0_i32, %c0_i32_0 : i32, i32, i32, i32
  }
  func.func @transform_3(%arg0: i32, %arg1: i32) -> (i32, i32, i32, i32) {
    %c4_i32 = arith.constant 4 : i32
    %0 = arith.muli %arg1, %c4_i32 : i32
    %c1_i32 = arith.constant 1 : i32
    %1 = arith.subi %0, %c1_i32 : i32
    %c0_i32 = arith.constant 0 : i32
    %2 = arith.maxsi %1, %c0_i32 : i32
    %c0_i32_0 = arith.constant 0 : i32
    %c0_i32_1 = arith.constant 0 : i32
    %c0_i32_2 = arith.constant 0 : i32
    return %arg0, %2, %c0_i32_0, %c0_i32_1 : i32, i32, i32, i32
  }
  func.func @transform_4(%arg0: i32, %arg1: i32) -> (i32, i32, i32, i32) {
    %c0_i32 = arith.constant 0 : i32
    %c0_i32_0 = arith.constant 0 : i32
    %c0_i32_1 = arith.constant 0 : i32
    return %arg0, %arg1, %c0_i32, %c0_i32_0 : i32, i32, i32, i32
  }
  func.func @transform_5(%arg0: i32, %arg1: i32) -> (i32, i32, i32, i32) {
    %c1_i32 = arith.constant 1 : i32
    %0 = arith.addi %arg1, %c1_i32 : i32
    %c4_i32 = arith.constant 4 : i32
    %1 = arith.muli %0, %c4_i32 : i32
    %c3_i32 = arith.constant 3 : i32
    %2 = arith.minsi %1, %c3_i32 : i32
    %c0_i32 = arith.constant 0 : i32
    %c0_i32_0 = arith.constant 0 : i32
    %c0_i32_1 = arith.constant 0 : i32
    return %arg0, %2, %c0_i32, %c0_i32_0 : i32, i32, i32, i32
  }
  func.func @transform_6(%arg0: i32, %arg1: i32) -> (i32, i32) {
    %c0_i32 = arith.constant 0 : i32
    %c0_i32_0 = arith.constant 0 : i32
    %c0_i32_1 = arith.constant 0 : i32
    return %c0_i32, %c0_i32_0 : i32, i32
  }
  func.func @transform_7(%arg0: i32, %arg1: i32) -> (i32, i32) {
    %c0_i32 = arith.constant 0 : i32
    %c0_i32_0 = arith.constant 0 : i32
    %c0_i32_1 = arith.constant 0 : i32
    return %c0_i32, %c0_i32_0 : i32, i32
  }
  func.func @transform_8(%arg0: i32, %arg1: i32) -> (i32, i32) {
    %c0_i32 = arith.constant 0 : i32
    %c0_i32_0 = arith.constant 0 : i32
    %c0_i32_1 = arith.constant 0 : i32
    return %c0_i32, %c0_i32_0 : i32, i32
  }
  func.func @transform_9(%arg0: i32, %arg1: i32) -> (i32, i32) {
    %c0_i32 = arith.constant 0 : i32
    %c0_i32_0 = arith.constant 0 : i32
    %c0_i32_1 = arith.constant 0 : i32
    return %c0_i32, %c0_i32_0 : i32, i32
  }
  func.func @transform_10(%arg0: i32, %arg1: i32) -> (i32, i32) {
    %c0_i32 = arith.constant 0 : i32
    %c0_i32_0 = arith.constant 0 : i32
    %c0_i32_1 = arith.constant 0 : i32
    return %c0_i32, %c0_i32_0 : i32, i32
  }
  func.func @transform_11(%arg0: i32, %arg1: i32) -> (i32, i32) {
    %c0_i32 = arith.constant 0 : i32
    %c0_i32_0 = arith.constant 0 : i32
    %c0_i32_1 = arith.constant 0 : i32
    return %c0_i32, %c0_i32_0 : i32, i32
  }
  func.func @transform_12(%arg0: i32, %arg1: i32) -> (i32, i32) {
    %c0_i32 = arith.constant 0 : i32
    %c0_i32_0 = arith.constant 0 : i32
    %c0_i32_1 = arith.constant 0 : i32
    return %c0_i32, %c0_i32_0 : i32, i32
  }
  func.func @transform_13(%arg0: i32, %arg1: i32) -> (i32, i32, i32, i32) {
    %c0_i32 = arith.constant 0 : i32
    %c0_i32_0 = arith.constant 0 : i32
    %c0_i32_1 = arith.constant 0 : i32
    return %arg0, %arg1, %c0_i32, %c0_i32_0 : i32, i32, i32, i32
  }
}

</mosaic_0001>

<bundles_post_ra>
// kernel: rt4ksr_rep_forward.6
= control target key start
LH: loop header
LB: loop body
LE: loop exit
PB: predicated region body
PF: predicated region fallthrough
CT: control target
= control target key end

     0   :  { %s905_s15 = smov 0   ;;  %s907_s16 = smov 0   ;;  %s991_s0 = inlined_call_operand.vmem [shape: f32[2,16,48], index: 0, kind: input, shape index: {}, may-alias: {0,1,2}]   ;;  %s992_s1 = inlined_call_operand.vmem [shape: f32[2,16,48], index: 1, kind: input, shape index: {}, may-alias: {0,1,2}]   ;;  %s993_s2 = inlined_call_operand.vmem [shape: f32[2,16,48], index: 2, kind: input, shape index: {}, may-alias: {0,1,2}]   ;;  %s994_s3 = inlined_call_operand.vmem [shape: bf16[2,16,48], index: 3, kind: output, shape index: {0}]   ;;  %s995_s4 = inlined_call_operand.vmem [shape: bf16[2,16,48], index: 4, kind: output, shape index: {1}]  }
   0x1   :  { %s909_s17 = smov 0  }
   0x2 LB: > { %s27_s0 = sadd.s32 1, %s867_s16  ;;  %p791_p0 = scmp.ge.s32.totalorder %s871_s17, 1  ;;  %s871_s17 = sphi %s909_s17, %s15_s17   ;;  %s867_s16 = sphi %s907_s16, %s997_s16   ;;  %s863_s15 = sphi %s905_s15, %s996_s15  }
   0x3   : > { %p29_p1 = scmp.ge.s32.totalorder %s27_s0, 2  ;;  %p250_p2 = scmp.lt.s32.totalorder %s871_s17, 3 }
   0x5   : > { %s999_s0 = smov (%p29_p1, %s27_s0), 0  ;;  %p251_p3 = pnand %p791_p0, %p250_p2 }
   0x6   : > { %p334_p4 = scmp.lt.s32.totalorder (!%p251_p3), %s863_s15, 1  ;;  %vm403_vm0 = vcmask (!%p251_p3), 1041408   ;;  %vm601_vm1 = vcmask (!%p251_p3), 388096   ;;  %vm387_vm2 = vcmask (!%p251_p3), 1040384   ;;  %s873_s25 = smov (!%p251_p3), 122   ;;  %vm451_vm3 = vcmask (!%p251_p3), 23552  }
   0x7   : > { %254 = sbr.rel (%p251_p3) target bundleno = 314 (0x13a), region = 32  ;;  %s874_s26 = smov (!%p251_p3), 6   ;;  %vm455_vm4 = vcmask (!%p251_p3), 48128   ;;  %vm459_vm5 = vcmask (!%p251_p3), 441344   ;;  %vm463_vm6 = vcmask (!%p251_p3), 465920   ;;  %vm541_vm7 = vcmask (!%p251_p3), 1046528  }
   0x8   : > { %s875_s27 = smov (!%p251_p3), 12   ;;  %s876_s28 = smov (!%p251_p3), 18   ;;  %vm557_vm8 = vcmask (!%p251_p3), 1045504   ;;  %vm567_vm9 = vcmask (!%p251_p3), 1044480   ;;  %vm581_vm10 = vcmask (!%p251_p3), 1043456  }
   0x9   : > { %s877_s29 = smov (!%p251_p3), 125   ;;  %s878_s30 = smov (!%p251_p3), 119  }
   0xa   : > { %s879_s5 = smov (!%p251_p3), 116  }
   0xe   : > { %s1001_s15 = smov (!%p334_p4, %s863_s15), 1 }
   0xf   : > { %s809_s2 = sshll.u32 %s1001_s15, 4  ;;  %s812_s18 = sshll.u32 %s1001_s15, 3 }
  0x10   : > { %s341_s21 = scalar_lea.vmem %s992_s1, %s809_s2  ;;  %s377_s24 = scalar_lea.vmem %s995_s4, %s812_s18 }
  0x11   : > { %v935_v0 = vld [vmem:[%s341_s21] sm:$0xff]  ;;  %v937_v1 = vld [vmem:[%s341_s21 + $0x8] sm:$0xff]  ;;  %s367_s8 = scalar_lea.vmem %s994_s3, %s812_s18 }
  0x12   : > { %v397_v2 = vrot.slane %v937_v1, 6  ;;  %v404_v3 = vrot.slane %v935_v0, 6  ;;  %v816_v4 = vpack.c.bf16 %v935_v0, %v935_v0  ;;  %v817_v5 = vpack.c.bf16 %v937_v1, %v937_v1 }
  0x13   : > { %v385_v6 = vrot.slane %v935_v0, 2  ;;  %v399_v7 = vrot.slane %v937_v1, 4 }
  0x14   : > { %v405_v8 = vsel %vm403_vm0, %v404_v3, %v397_v2  ;;  %612 = vst.msk [vmem:[%s377_s24] sm:$0xf] %vm601_vm1, %v816_v4  ;;  %613 = vst.msk [vmem:[%s377_s24 + $0x4] sm:$0xf] %vm601_vm1, %v817_v5 }
  0x15   : > { %417 = vrot.lane.b32.xlu0 %v405_v8, %s873_s25  ;;  %v388_v9 = vsel %vm387_vm2, %v385_v6, %v935_v0  ;;  %v401_v10 = vsel %vm387_vm2, %v397_v2, %v399_v7 }
  0x16   : > { %v411_v11 = vsel %vm403_vm0, %v388_v9, %v404_v3  ;;  %v409_v12 = vrot.slane %v401_v10, 6 }
  0x17   : > { %424 = vrot.lane.b32.xlu1 %v411_v11, %s874_s26 }
  0x18   : > { %v412_v13 = vsel %vm403_vm0, %v397_v2, %v409_v12 }
  0x19   : > { %426 = vrot.lane.b32.xlu0 %v405_v8, %s874_s26 }
  0x1b   : > { %435 = vrot.lane.b32.xlu1 %v405_v8, %s875_s27 }
  0x1d   : > { %415 = vrot.lane.b32.xlu0 %v411_v11, %s873_s25 }
  0x1f   : > { %419 = vrot.lane.b32.xlu1 %v412_v13, %s873_s25 }
  0x21   : > { %433 = vrot.lane.b32.xlu0 %v411_v11, %s875_s27 }
  0x23   : > { %428 = vrot.lane.b32.xlu1 %v412_v13, %s874_s26 }
  0x25   : > { %437 = vrot.lane.b32.xlu0 %v412_v13, %s875_s27 }
  0x27   : > { %442 = vrot.lane.b32.xlu1 %v411_v11, %s876_s28 }
  0x29   : > { %444 = vrot.lane.b32.xlu0 %v405_v8, %s876_s28 }
  0x2b   : > { %446 = vrot.lane.b32.xlu1 %v412_v13, %s876_s28 }
  0x87   : > { %v418_v14 = vpop.permute.xlu0 %417 }
  0x88   : > { %v453_v22 = vsel %vm451_vm3, %v418_v14, %v405_v8 }
  0x89   : > { %v425_v15 = vpop.permute.xlu1 %424 }
  0x8b   : > { %v427_v16 = vpop.permute.xlu0 %426 }
  0x8c   : > { %v457_v24 = vsel %vm455_vm4, %v453_v22, %v427_v16 }
  0x8d   : > { %v436_v17 = vpop.permute.xlu1 %435 }
  0x8e   : > { %v461_v26 = vsel %vm459_vm5, %v457_v24, %v436_v17 }
  0x8f   : > { %v416_v18 = vpop.permute.xlu0 %415 }
  0x90   : > { %v452_v25 = vsel %vm451_vm3, %v416_v18, %v411_v11 }
  0x91   : > { %v420_v19 = vpop.permute.xlu1 %419  ;;  %v456_v29 = vsel %vm455_vm4, %v452_v25, %v425_v15 }
  0x92   : > { %v454_v35 = vsel %vm451_vm3, %v420_v19, %v412_v13 }
  0x93   : > { %v434_v20 = vpop.permute.xlu0 %433 }
  0x94   : > { %v460_v31 = vsel %vm459_vm5, %v456_v29, %v434_v20 }
  0x95   : > { %v429_v21 = vpop.permute.xlu1 %428 }
  0x96   : > { %v458_v37 = vsel %vm455_vm4, %v454_v35, %v429_v21 }
  0x97   : > { %v438_v23 = vpop.permute.xlu0 %437 }
  0x98   : > { %v462_v39 = vsel %vm459_vm5, %v458_v37, %v438_v23 }
  0x99   : > { %v443_v27 = vpop.permute.xlu1 %442 }
  0x9a   : > { %v464_v34 = vsel %vm463_vm6, %v460_v31, %v443_v27 }
  0x9b   : > { %v445_v28 = vpop.permute.xlu0 %444  ;;  %v470_v36 = vmul.f32 0.24420135, %v464_v34  ;;  %v488_v40 = vmul.f32 0.40261996, %v464_v34  ;;  %v467_v43 = vmul.f32 0.054488685, %v464_v34 }
  0x9c   : > { %v465_v30 = vsel %vm463_vm6, %v461_v26, %v445_v28 }
  0x9d   : > { %v489_v32 = vmul.f32 0.40261996, %v465_v30  ;;  %v471_v33 = vmul.f32 0.24420135, %v465_v30  ;;  %v447_v38 = vpop.permute.xlu1 %446  ;;  %v468_v46 = vmul.f32 0.054488685, %v465_v30 }
  0x9e   : > { %v466_v41 = vsel %vm463_vm6, %v462_v39, %v447_v38 }
  0x9f   : > { %496 = vrot.lane.b32.xlu0 %v489_v32, %s873_s25  ;;  %478 = vrot.lane.b32.xlu1 %v471_v33, %s877_s29  ;;  %v472_v42 = vmul.f32 0.24420135, %v466_v41  ;;  %v490_v44 = vmul.f32 0.40261996, %v466_v41  ;;  %v469_v45 = vmul.f32 0.054488685, %v466_v41 }
  0xa3   : > { %476 = vrot.lane.b32.xlu0 %v470_v36, %s877_s29  ;;  %508 = vrot.lane.b32.xlu1 %v471_v33, %s878_s30 }
  0xa7   : > { %506 = vrot.lane.b32.xlu0 %v470_v36, %s878_s30  ;;  %494 = vrot.lane.b32.xlu1 %v488_v40, %s873_s25 }
  0xab   : > { %480 = vrot.lane.b32.xlu0 %v472_v42, %s877_s29  ;;  %521 = vrot.lane.b32.xlu1 %v467_v43, %s879_s5 }
  0xaf   : > { %510 = vrot.lane.b32.xlu0 %v472_v42, %s878_s30  ;;  %498 = vrot.lane.b32.xlu1 %v490_v44, %s873_s25 }
  0xb3   : > { %525 = vrot.lane.b32.xlu1 %v469_v45, %s879_s5  ;;  %523 = vrot.lane.b32.xlu0 %v468_v46, %s879_s5 }
 0x111   : > { %v497_v47 = vpop.permute.xlu0 %496  ;;  %v479_v48 = vpop.permute.xlu1 %478 }
 0x112   : > { %v486_v55 = vadd.f32 %v479_v48, %v468_v46 }
 0x114   : > { %v504_v59 = vadd.f32 %v497_v47, %v486_v55 }
 0x115   : > { %v477_v49 = vpop.permute.xlu0 %476  ;;  %v509_v50 = vpop.permute.xlu1 %508 }
 0x116   : > { %v485_v51 = vadd.f32 %v477_v49, %v467_v43  ;;  %v516_v3 = vadd.f32 %v509_v50, %v504_v59 }
 0x119   : > { %v507_v52 = vpop.permute.xlu0 %506  ;;  %v495_v53 = vpop.permute.xlu1 %494 }
 0x11a   : > { %v503_v54 = vadd.f32 %v495_v53, %v485_v51 }
 0x11c   : > { %v515_v58 = vadd.f32 %v507_v52, %v503_v54 }
 0x11d   : > { %v481_v56 = vpop.permute.xlu0 %480  ;;  %v522_v57 = vpop.permute.xlu1 %521 }
 0x11e   : > { %v487_v60 = vadd.f32 %v481_v56, %v469_v45  ;;  %v530_v63 = vadd.f32 %v522_v57, %v515_v58 }
 0x120   : > { %v535_v7 = vmul.f32 0.24420135, %v530_v63  ;;  %v551_v10 = vmul.f32 0.40261996, %v530_v63  ;;  %v533_v19 = vmul.f32 0.054488685, %v530_v63 }
 0x121   : > { %v511_v61 = vpop.permute.xlu0 %510  ;;  %v499_v62 = vpop.permute.xlu1 %498 }
 0x122   : > { %v505_v2 = vadd.f32 %v499_v62, %v487_v60  ;;  %v542_v15 = vrot.slane %v535_v7, 1  ;;  %v558_v23 = vrot.slane %v551_v10, 2  ;;  %v568_v29 = vrot.slane %v535_v7, 3 }
 0x123   : > { %v582_v36 = vrot.slane %v533_v19, 4 }
 0x124   : > { %v517_v4 = vadd.f32 %v511_v61, %v505_v2 }
 0x125   : > { %v526_v5 = vpop.permute.xlu1 %525  ;;  %v524_v6 = vpop.permute.xlu0 %523 }
 0x126   : > { %v531_v8 = vadd.f32 %v524_v6, %v516_v3  ;;  %v532_v9 = vadd.f32 %v526_v5, %v517_v4 }
 0x128   : > { %v536_v11 = vmul.f32 0.24420135, %v531_v8  ;;  %v552_v12 = vmul.f32 0.40261996, %v531_v8  ;;  %v537_v13 = vmul.f32 0.24420135, %v532_v9 }
 0x129   : > { %v553_v14 = vmul.f32 0.40261996, %v532_v9  ;;  %v534_v16 = vmul.f32 0.054488685, %v531_v8  ;;  %v577_v22 = vmul.f32 0.054488685, %v532_v9 }
 0x12a   : > { %v543_v17 = vrot.slane %v536_v11, 1  ;;  %v559_v18 = vrot.slane %v552_v12, 2  ;;  %v545_v20 = vrot.slane %v537_v13, 1  ;;  %v569_v25 = vrot.slane %v536_v11, 3 }
 0x12b   : > { %v561_v21 = vrot.slane %v553_v14, 2  ;;  %v571_v26 = vrot.slane %v537_v13, 3  ;;  %v583_v32 = vrot.slane %v534_v16, 4  ;;  %v585_v33 = vrot.slane %v577_v22, 4 }
 0x12c   : > { %v544_v24 = vsel %vm541_vm7, %v542_v15, %v543_v17  ;;  %v546_v27 = vsel %vm541_vm7, %v543_v17, %v545_v20  ;;  %v560_v31 = vsel %vm557_vm8, %v558_v23, %v559_v18  ;;  %v570_v38 = vsel %vm567_vm9, %v568_v29, %v569_v25 }
 0x12d   : > { %v549_v28 = vadd.f32 %v544_v24, %v533_v19  ;;  %v550_v30 = vadd.f32 %v546_v27, %v534_v16  ;;  %v562_v34 = vsel %vm557_vm8, %v559_v18, %v561_v21  ;;  %v572_v39 = vsel %vm567_vm9, %v569_v25, %v571_v26 }
 0x12e   : > { %v584_v42 = vsel %vm581_vm10, %v582_v36, %v583_v32  ;;  %v586_v43 = vsel %vm581_vm10, %v583_v32, %v585_v33 }
 0x12f   : > { %v565_v35 = vadd.f32 %v560_v31, %v549_v28  ;;  %v566_v37 = vadd.f32 %v562_v34, %v550_v30 }
 0x131   : > { %v575_v40 = vadd.f32 %v570_v38, %v565_v35  ;;  %v576_v41 = vadd.f32 %v572_v39, %v566_v37 }
 0x133   : > { %v589_v44 = vadd.f32 %v584_v42, %v575_v40  ;;  %v590_v45 = vadd.f32 %v586_v43, %v576_v41 }
 0x135   : > { %v591_v46 = vsub.f32 %v935_v0, %v589_v44  ;;  %v592_v47 = vsub.f32 %v937_v1, %v590_v45 }
 0x137   : > { %v814_v48 = vpack.c.bf16 %v591_v46, %v591_v46  ;;  %v815_v49 = vpack.c.bf16 %v592_v47, %v592_v47 }
 0x139   : > { %602 = vst.msk [vmem:[%s367_s8] sm:$0xf] %vm601_vm1, %v814_v48  ;;  %603 = vst.msk [vmem:[%s367_s8 + $0x4] sm:$0xf] %vm601_vm1, %v815_v49 }
 0x13a PF: > { %s15_s17 = sadd.s32 1, %s871_s17   ;;  %s996_s15 = smov %s867_s16 }
 0x13b   : > { %p12_p5 = scmp.ge.s32.totalorder %s15_s17, 4   ;;  %s997_s16 = smov %s999_s0 }
 0x13d   :  { %14 = sbr.rel (!%p12_p5) target bundleno = 2 (0x2), region = 80 }

// kernel: rt4ksr_rep_forward.7
= control target key start
LH: loop header
LB: loop body
LE: loop exit
PB: predicated region body
PF: predicated region fallthrough
CT: control target
= control target key end

     0   :  { %s1375_s18 = smov 0   ;;  %s1377_s19 = smov 0   ;;  %s1621_s0 = inlined_call_operand.vmem [shape: bf16[2,8,8,12], index: 0, kind: input, shape index: {}, may-alias: {0,1,2}]   ;;  %s1622_s1 = inlined_call_operand.vmem [shape: bf16[2,8,8,12], index: 1, kind: input, shape index: {}, may-alias: {0,1,2}]   ;;  %s1623_s2 = inlined_call_operand.vmem [shape: bf16[2,8,8,12], index: 2, kind: input, shape index: {}, may-alias: {0,1,2}]   ;;  %s1624_s3 = inlined_call_operand.vmem [shape: bf16[108,16], index: 3, kind: input, shape index: {}]   ;;  %s1625_s4 = inlined_call_operand.vmem [shape: f32[1,16], index: 4, kind: input, shape index: {}]   ;;  %s1626_s5 = inlined_call_operand.vmem [shape: bf16[2,8,8,16], index: 5, kind: output, shape index: {}]  }
   0x1   :  { %s1379_s0 = smov 0  }
   0x2 LB: > { %s27_s2 = sadd.s32 1, %s1336_s19  ;;  %p1096_p0 = scmp.ge.s32.totalorder %s1340_s0, 1  ;;  %s1340_s0 = sphi %s1379_s0, %s15_s0   ;;  %s1336_s19 = sphi %s1377_s19, %s1628_s19   ;;  %s1332_s18 = sphi %s1375_s18, %s1627_s18  }
   0x3   : > { %p29_p1 = scmp.ge.s32.totalorder %s27_s2, 2  ;;  %p270_p2 = scmp.lt.s32.totalorder %s1340_s0, 3 }
   0x5   : > { %s1630_s2 = smov (%p29_p1, %s27_s2), 0  ;;  %p271_p3 = pnand %p1096_p0, %p270_p2 }
   0x6   : > { %p347_p4 = scmp.lt.s32.totalorder (!%p271_p3), %s1332_s18, 1  ;;  %vm453_vm0 = vcmask (!%p271_p3), 1040384   ;;  %v1342_v0 = vmov (!%p271_p3), 0.0   ;;  %vm490_vm1 = vcmask (!%p271_p3), 1046528   ;;  %v1398_v2 = vld [vmem:[%s1624_s3 + $0x10] sm:$0xf] (!%p271_p3) }
   0x7   : > { %274 = sbr.rel (%p271_p3) target bundleno = 397 (0x18d), region = 40  ;;  %v433_v1 = vrot.slane (!%p271_p3), %v1342_v0, 7  ;;  %v414_v3 = vld [vmem:[%s1624_s3 + $0x14] sm:$0xf] (!%p271_p3)  ;;  %vm539_vm2 = vcmask (!%p271_p3), 1045504   ;;  %v1411_v7 = vld [vmem:[%s1624_s3 + $0x18] sm:$0xff] (!%p271_p3)  }
   0x8   : > { %v1105_v6 = vcombine.low (!%p271_p3), %v1398_v2, %v414_v3  ;;  %v645_v18 = vrot.slane (!%p271_p3), %v1411_v7, 2  ;;  %v1311_v24 = vld [vmem:[%s1624_s3] sm:$0xff] (!%p271_p3)   ;;  %v1313_v33 = vld [vmem:[%s1624_s3 + $0x8] sm:$0xff] (!%p271_p3)   ;;  %s1343_s9 = smov (!%p271_p3), 12   ;;  %s1344_s10 = smov (!%p271_p3), 24   ;;  %vm664_vm3 = vcmask (!%p271_p3), 1041408  }
   0x9   : > { %v1404_v4 = vsel (!%p271_p3), %vm453_vm0, 0.0, %v433_v1  ;;  %v464_v5 = vsel (!%p271_p3), %vm453_vm0, %v433_v1, 0.0  ;;  %1188 = vmatprep.subr.bf16.mxu0 (!%p271_p3), %v1311_v24  ;;  %vm588_vm4 = vcmask (!%p271_p3), 97280   ;;  %vm597_vm5 = vcmask (!%p271_p3), 195584  }
   0xa   : > { %v491_v8 = vrot.slane (!%p271_p3), %v1404_v4, 1  ;;  %v492_v9 = vrot.slane (!%p271_p3), %v464_v5, 1  ;;  %v541_v10 = vrot.slane (!%p271_p3), %v464_v5, 2  ;;  %v540_v11 = vrot.slane (!%p271_p3), %v1404_v4, 2  ;;  %1189 = vmatpush3.bf16.msra.mxu0 (!%p271_p3), %v1311_v24 }
   0xb   : > { %v1427_v17 = vrot.slane (!%p271_p3), %v1105_v6, 2  ;;  %1190 = vmatprep.subr.bf16.mxu0 (!%p271_p3), %v1313_v33  ;;  %vm651_vm6 = vcmask (!%p271_p3), 293888   ;;  %vm960_vm7 = vcmask (!%p271_p3), 125952  }
   0xc   : > { %v1422_v15 = vsel (!%p271_p3), %vm490_vm1, %v491_v8, %v492_v9  ;;  %v1425_v16 = vsel (!%p271_p3), %vm539_vm2, %v540_v11, %v541_v10 }
   0xe   : > { %s1632_s18 = smov (!%p347_p4, %s1332_s18), 1  ;;  %1191 = vmatpush3.bf16.msra.mxu0 %v1313_v33 }
   0xf   : > { %s1130_s26 = sshll.u32 %s1632_s18, 5 }
  0x10   : > { %s354_s29 = scalar_lea.vmem %s1622_s1, %s1130_s26  ;;  %s380_s25 = scalar_lea.vmem %s1626_s5, %s1130_s26 }
  0x11   : > { %v1150_v12 = vld [vmem:[%s354_s29 + $0x8] sm:$0xff]   ;;  %v1151_v13 = vld [vmem:[%s354_s29 + $0x10] sm:$0xff]   ;;  %v1135_v14 = vld [vmem:[%s354_s29] sm:$0xff]  }
  0x12   : > { %v1141_v19 = vunpack.c.h.bf16 %v1150_v12  ;;  %v1144_v20 = vunpack.c.l.bf16 %v1151_v13  ;;  %v1145_v21 = vunpack.c.h.bf16 %v1151_v13  ;;  %v1140_v22 = vunpack.c.l.bf16 %v1150_v12  ;;  %v1152_v23 = vld [vmem:[%s354_s29 + $0x18] sm:$0xff]  }
  0x13   : > { %v1136_v25 = vunpack.c.l.bf16 %v1135_v14  ;;  %v1137_v26 = vunpack.c.h.bf16 %v1135_v14  ;;  %v1148_v27 = vunpack.c.l.bf16 %v1152_v23  ;;  %v1149_v28 = vunpack.c.h.bf16 %v1152_v23 }
  0x14   : > { %v437_v29 = vrot.slane %v1141_v19, 7  ;;  %v438_v30 = vrot.slane %v1144_v20, 7  ;;  %v436_v31 = vrot.slane %v1140_v22, 7  ;;  %v439_v32 = vrot.slane %v1145_v21, 7 }
  0x15   : > { %v434_v34 = vrot.slane %v1136_v25, 7  ;;  %v435_v35 = vrot.slane %v1137_v26, 7  ;;  %v440_v36 = vrot.slane %v1148_v27, 7  ;;  %v1436_v37 = vrot.slane %v1149_v28, 7 }
  0x16   : > { %v1439_v38 = vsel %vm453_vm0, 0.0, %v437_v29  ;;  %v1442_v39 = vsel %vm453_vm0, 0.0, %v438_v30  ;;  %v468_v40 = vsel %vm453_vm0, %v437_v29, 0.0  ;;  %v469_v41 = vsel %vm453_vm0, %v438_v30, 0.0 }
  0x17   : > { %v503_v42 = vrot.slane %v1439_v38, 1  ;;  %v504_v43 = vrot.slane %v468_v40, 1  ;;  %v506_v44 = vrot.slane %v1442_v39, 1  ;;  %v507_v45 = vrot.slane %v469_v41, 1 }
  0x18   : > { %v553_v46 = vrot.slane %v468_v40, 2  ;;  %v556_v47 = vrot.slane %v469_v41, 2  ;;  %v1449_v48 = vsel %vm453_vm0, 0.0, %v434_v34  ;;  %v465_v49 = vsel %vm453_vm0, %v434_v34, 0.0 }
  0x19   : > { %v505_v50 = vsel %vm490_vm1, %v503_v42, %v504_v43  ;;  %v508_v51 = vsel %vm490_vm1, %v506_v44, %v507_v45  ;;  %v494_v52 = vrot.slane %v1449_v48, 1  ;;  %v495_v53 = vrot.slane %v465_v49, 1  ;;  %v1312_v42 = vld [vmem:[%s1624_s3 + $0x20] ss:$0 sps:$4 sm:$0xff]  }
  0x1a   : > { %v1279_v54 = vpack.i.bf16 %v508_v51, %v505_v50  ;;  %v544_v55 = vrot.slane %v465_v49, 2  ;;  %v543_v56 = vrot.slane %v1449_v48, 2  ;;  %v1457_v57 = vsel %vm453_vm0, 0.0, %v435_v35 }
  0x1b   : > { %v496_v58 = vsel %vm490_vm1, %v494_v52, %v495_v53  ;;  %v1461_v59 = vsel %vm453_vm0, 0.0, %v436_v31  ;;  %v466_v60 = vsel %vm453_vm0, %v435_v35, 0.0  ;;  %v467_v61 = vsel %vm453_vm0, %v436_v31, 0.0 }
  0x1c   : > { %1280 = vrot.lane.b32.xlu1 %v1279_v54, %s1343_s9  ;;  %v1269_v62 = vpack.i.bf16 %v496_v58, %v1422_v15  ;;  %v545_v63 = vsel %vm539_vm2, %v543_v56, %v544_v55  ;;  %v497_v0 = vrot.slane %v1457_v57, 1  ;;  %v498_v1 = vrot.slane %v466_v60, 1 }
  0x1d   : > { %v1284_v3 = vpack.i.bf16 %v545_v63, %v1425_v16  ;;  %v500_v5 = vrot.slane %v1461_v59, 1  ;;  %v501_v6 = vrot.slane %v467_v61, 1  ;;  %v552_v8 = vrot.slane %v1439_v38, 2 }
  0x1e   : > { %1270 = vrot.lane.b32.xlu0 %v1269_v62, %s1343_s9  ;;  %v499_v9 = vsel %vm490_vm1, %v497_v0, %v498_v1  ;;  %v555_v10 = vrot.slane %v1442_v39, 2  ;;  %v546_v11 = vrot.slane %v1457_v57, 2  ;;  %v547_v12 = vrot.slane %v466_v60, 2 }
  0x1f   : > { %v502_v13 = vsel %vm490_vm1, %v500_v5, %v501_v6  ;;  %v554_v14 = vsel %vm539_vm2, %v552_v8, %v553_v46  ;;  %v549_v19 = vrot.slane %v1461_v59, 2  ;;  %v550_v20 = vrot.slane %v467_v61, 2 }
  0x20   : > { %1285 = vrot.lane.b32.xlu1 %v1284_v3, %s1344_s10  ;;  %v1274_v21 = vpack.i.bf16 %v502_v13, %v499_v9  ;;  %v557_v22 = vsel %vm539_vm2, %v555_v10, %v556_v47  ;;  %v548_v23 = vsel %vm539_vm2, %v546_v11, %v547_v12  ;;  %v1483_v24 = vsel %vm453_vm0, 0.0, %v439_v32 }
  0x21   : > { %v1294_v25 = vpack.i.bf16 %v557_v22, %v554_v14  ;;  %v551_v26 = vsel %vm539_vm2, %v549_v19, %v550_v20  ;;  %v1487_v27 = vsel %vm453_vm0, 0.0, %v440_v36  ;;  %v470_v28 = vsel %vm453_vm0, %v439_v32, 0.0 }
  0x22   : > { %1275 = vrot.lane.b32.xlu0 %v1274_v21, %s1343_s9  ;;  %v1289_v29 = vpack.i.bf16 %v551_v26, %v548_v23  ;;  %v471_v30 = vsel %vm453_vm0, %v440_v36, 0.0  ;;  %v509_v31 = vrot.slane %v1483_v24, 1  ;;  %v510_v33 = vrot.slane %v470_v28, 1 }
  0x23   : > { %v512_v34 = vrot.slane %v1487_v27, 1  ;;  %v513_v35 = vrot.slane %v471_v30, 1  ;;  %v558_v40 = vrot.slane %v1483_v24, 2  ;;  %v559_v41 = vrot.slane %v470_v28, 2 }
  0x24   : > { %1295 = vrot.lane.b32.xlu1 %v1294_v25, %s1344_s10  ;;  %v511_v32 = vsel %vm490_vm1, %v509_v31, %v510_v33  ;;  %v561_v43 = vrot.slane %v1487_v27, 2  ;;  %v562_v36 = vrot.slane %v471_v30, 2  ;;  %v1503_v44 = vsel %vm453_vm0, 0.0, %v1436_v37 }
  0x25   : > { %v514_v45 = vsel %vm490_vm1, %v512_v34, %v513_v35  ;;  %v560_v46 = vsel %vm539_vm2, %v558_v40, %v559_v41  ;;  %v472_v47 = vsel %vm453_vm0, %v1436_v37, 0.0  ;;  %v612_v49 = vrot.slane %v1503_v44, 1 }
  0x26   : > { %1290 = vrot.lane.b32.xlu0 %v1289_v29, %s1344_s10  ;;  %v1299_v50 = vpack.i.bf16 %v514_v45, %v511_v32  ;;  %v563_v51 = vsel %vm539_vm2, %v561_v43, %v562_v36  ;;  %v613_v52 = vrot.slane %v472_v47, 1  ;;  %v618_v53 = vrot.slane %v1503_v44, 2 }
  0x27   : > { %v1304_v54 = vpack.i.bf16 %v563_v51, %v560_v46  ;;  %v619_v55 = vrot.slane %v472_v47, 2  ;;  %v646_v56 = vsel %vm539_vm2, %v1427_v17, %v645_v18  ;;  %v647_v58 = vrot.slane %v1312_v42, 2 }
  0x28   : > { %1174 = vmatprep.subr.bf16.mxu1 %v646_v56  ;;  %v1114_v37 = vcombine.low %v1398_v2, %v1398_v2  ;;  %v614_v62 = vsel %vm490_vm1, %v612_v49, %v613_v52  ;;  %v1531_v2 = vld [vmem:[%s1624_s3 + $0x24] sm:$0xff]  }
  0x29   : > { %1305 = vrot.lane.b32.xlu1 %v1304_v54, %s1344_s10  ;;  %1175 = vmatpush3.bf16.msra.mxu1 %v646_v56  ;;  %v648_v60 = vsel %vm539_vm2, %v645_v18, %v647_v58  ;;  %v620_v61 = vsel %vm539_vm2, %v618_v53, %v619_v55  ;;  %v666_v7 = vsel %vm664_vm3, %v647_v58, 0  ;;  %v1317_v54 = vld [vmem:[%s1624_s3 + $0x34] ss:$0 sps:$4 sm:$0x33]  }
  0x2a   : > { %1300 = vrot.lane.b32.xlu0 %v1299_v50, %s1343_s9  ;;  %1176 = vmatprep.subr.bf16.mxu1 %v648_v60  ;;  %v759_v17 = vsel %vm664_vm3, %v1114_v37, 0 }
  0x2b   : > { %1239 = vmatprep.subr.msk.bf16.mxu0 %vm664_vm3, %v1114_v37 }
  0x2c   : > { %1193 = vmatpush3.bf16.msra.mxu0 %v759_v17 }
  0x2d   : > { %621 = vrot.lane.b32.xlu1 %v620_v61, %s1344_s10  ;;  %1177 = vmatpush3.bf16.msra.mxu1 %v648_v60 }
  0x2e   : > { %615 = vrot.lane.b32.xlu0 %v614_v62, %s1343_s9  ;;  %1238 = vmatprep.subr.msk.bf16.mxu1 %vm664_vm3, %v647_v58 }
  0x2f   : > { %1202 = vmatprep.subr.bf16.mxu0 %v1531_v2 }
  0x31   : > { %837 = vrot.lane.b32.xlu1 %v1425_v16, %s1344_s10  ;;  %1179 = vmatpush3.bf16.msra.mxu1 %v666_v7 }
  0x32   : > { %831 = vrot.lane.b32.xlu0 %v1422_v15, %s1343_s9  ;;  %1216 = vmatprep.subr.bf16.mxu1 %v1531_v2 }
  0x8e   : > { %v1281_v18 = vpop.permute.xlu1 %1280 }
  0x8f   : > { %v1283_v8 = vunpack.i.h.bf16 %v1281_v18  ;;  %v1282_v9 = vunpack.i.l.bf16 %v1281_v18 }
  0x90   : > { %v1271_v63 = vpop.permute.xlu0 %1270 }
  0x91   : > { %v1273_v0 = vunpack.i.h.bf16 %v1271_v63  ;;  %v1272_v1 = vunpack.i.l.bf16 %v1271_v63  ;;  %v594_v23 = vsel %vm588_vm4, %v1442_v39, %v1283_v8  ;;  %v593_v25 = vsel %vm588_vm4, %v1439_v38, %v1282_v9 }
  0x92   : > { %v1286_v3 = vpop.permute.xlu1 %1285 }
  0x93   : > { %v1288_v5 = vunpack.i.h.bf16 %v1286_v3  ;;  %v1287_v6 = vunpack.i.l.bf16 %v1286_v3  ;;  %v589_v16 = vsel %vm588_vm4, %v1404_v4, %v1272_v1  ;;  %v590_v15 = vsel %vm588_vm4, %v1449_v48, %v1273_v0 }
  0x94   : > { %v1276_v10 = vpop.permute.xlu0 %1275 }
  0x95   : > { %v598_v11 = vsel %vm597_vm5, %v589_v16, %v1287_v6  ;;  %v599_v12 = vsel %vm597_vm5, %v590_v15, %v1288_v5  ;;  %v1278_v13 = vunpack.i.h.bf16 %v1276_v10  ;;  %v1277_v14 = vunpack.i.l.bf16 %v1276_v10 }
  0x96   : > { %v1296_v19 = vpop.permute.xlu1 %1295  ;;  %v606_v20 = vpack.c.bf16 %v599_v12, %v598_v11 }
  0x97   : > { %v1298_v21 = vunpack.i.h.bf16 %v1296_v19  ;;  %v1297_v22 = vunpack.i.l.bf16 %v1296_v19  ;;  %v592_v31 = vsel %vm588_vm4, %v1461_v59, %v1278_v13  ;;  %v591_v33 = vsel %vm588_vm4, %v1457_v57, %v1277_v14  ;;  %v1316_v59 = vld [vmem:[%s1624_s3 + $0x2c] sm:$0xff]  }
  0x98   : > { %v1291_v26 = vpop.permute.xlu0 %1290  ;;  %1194 = vmatprep.mubr.msk.bf16.mxu0 %vm651_vm6, %v606_v20 }
  0x99   : > { %v603_v48 = vsel %vm597_vm5, %v594_v23, %v1298_v21  ;;  %v602_v28 = vsel %vm597_vm5, %v593_v25, %v1297_v22  ;;  %v1293_v29 = vunpack.i.h.bf16 %v1291_v26  ;;  %v1292_v30 = vunpack.i.l.bf16 %v1291_v26 }
  0x9a   : > { %v608_v34 = vpack.c.bf16 %v603_v48, %v602_v28 }
  0x9b   : > { %v1306_v39 = vpop.permute.xlu1 %1305  ;;  %v600_v35 = vsel %vm597_vm5, %v591_v33, %v1292_v30  ;;  %v601_v38 = vsel %vm597_vm5, %v592_v31, %v1293_v29 }
  0x9c   : > { %v1301_v40 = vpop.permute.xlu0 %1300  ;;  %v1308_v41 = vunpack.i.h.bf16 %v1306_v39  ;;  %v1307_v42 = vunpack.i.l.bf16 %v1306_v39  ;;  %v607_v32 = vpack.c.bf16 %v601_v38, %v600_v35  ;;  %v626_v43 = vpack.c.bf16 %v600_v35, %v599_v12  ;;  %v1126_v12 = vld [vmem:[%s1625_s4] ss:$0 sm:$0xff] }
  0x9d   : > { %v1303_v36 = vunpack.i.h.bf16 %v1301_v40  ;;  %v1302_v45 = vunpack.i.l.bf16 %v1301_v40  ;;  %v627_v46 = vpack.c.bf16 %v602_v28, %v601_v38 }
  0x9e   : > { %1180 = vmatprep.mubr.msk.bf16.mxu1 %vm651_vm6, %v626_v43  ;;  %1195 = vmatmul.mubr.msk.bf16.vlgmr.msra.gmra.mrb[0].mxu0 %vm651_vm6, %v607_v32 }
  0x9f   : > { %v595_v57 = vsel %vm588_vm4, %v1483_v24, %v1302_v45  ;;  %1181 = vmatmul.mubr.msk.bf16.vlgmr.msra.gmra.mrb[0].mxu1 %vm651_vm6, %v627_v46  ;;  %1198 = vmatprep.mubr.msk.bf16.mxu0 %vm651_vm6, %v608_v34  ;;  %v622_v47 = vpop.permute.xlu1 %621  ;;  %v596_v49 = vsel %vm588_vm4, %v1487_v27, %v1303_v36 }
  0xa0   : > { %1203 = vmatpush3.bf16.msra.mxu0 %v1531_v2  ;;  %1219 = vmatpush3.bf16.msra.mxu1 %v1531_v2  ;;  %v616_v50 = vpop.permute.xlu0 %615  ;;  %v604_v51 = vsel %vm597_vm5, %v595_v57, %v1307_v42  ;;  %v605_v52 = vsel %vm597_vm5, %v596_v49, %v1308_v41 }
  0xa1   : > { %v624_v24 = vsel %vm588_vm4, %v1503_v44, %v616_v50  ;;  %v628_v53 = vpack.c.bf16 %v604_v51, %v603_v48  ;;  %1204 = vmatprep.subr.bf16.mxu0 %v1316_v59  ;;  %1217 = vmatprep.subr.bf16.mxu1 %v1316_v59  ;;  %v609_v27 = vpack.c.bf16 %v605_v52, %v604_v51  ;;  %v862_v44 = vsel %vm664_vm3, %v1317_v54, 0 }
  0xa2   : > { %v625_v55 = vsel %vm597_vm5, %v624_v24, %v622_v47 }
  0xa3   : > { %1184 = vmatprep.mubr.msk.bf16.mxu1 %vm651_vm6, %v628_v53  ;;  %v629_v58 = vpack.c.bf16 %v625_v55, %v605_v52  ;;  %v838_v60 = vpop.permute.xlu1 %837 }
  0xa4   : > { %v832_v56 = vpop.permute.xlu0 %831  ;;  %1205 = vmatpush3.bf16.msra.mxu0 %v1316_v59  ;;  %1220 = vmatpush3.bf16.msra.mxu1 %v1316_v59 }
  0xa5   : > { %1240 = vmatprep.subr.msk.bf16.mxu0 %vm664_vm3, %v1317_v54  ;;  %1241 = vmatprep.subr.msk.bf16.mxu1 %vm664_vm3, %v1317_v54  ;;  %v840_v37 = vsel %vm588_vm4, %v1404_v4, %v832_v56 }
  0xa6   : > { %1199 = vmatmul.mubr.msk.bf16.gmra.mrb[4].mxu0 %vm651_vm6, %v609_v27  ;;  %v841_v61 = vsel %vm597_vm5, %v840_v37, %v838_v60 }
  0xa7   : > { %1185 = vmatmul.mubr.msk.bf16.gmra.mrb[4].mxu1 %vm651_vm6, %v629_v58  ;;  %1208 = vmatprep.mubr.msk.bf16.mxu0 %vm651_vm6, %v607_v32  ;;  %v842_v17 = vpack.c.bf16 %v841_v61, %v625_v55 }
  0xa8   : > { %1212 = vmatprep.mubr.msk.bf16.mxu1 %vm651_vm6, %v609_v27  ;;  %1207 = vmatpush3.bf16.msra.mxu0 %v862_v44 }
  0xa9   : > { %1221 = vmatpush3.bf16.msra.mxu1 %v862_v44 }
  0xae   : > { %1209 = vmatmul.mubr.msk.bf16.vlgmr.msra.gmra.mrb[0].mxu0 %vm651_vm6, %v608_v34 }
  0xaf   : > { %1213 = vmatmul.mubr.msk.bf16.vlgmr.msra.gmra.mrb[8].mxu1 %vm651_vm6, %v842_v17 }
 0x172   : > { %v1182_v62 = vpop.f32.mrb[0].mxu1 }
 0x173   : > { %v702_v2 = vpop.f32.mrb[1].mxu1 }
 0x174   : > { %v1183_v7 = vpop.f32.mrb[2].mxu1 }
 0x175   : > { %v705_v4 = vpop.f32.mrb[3].mxu1 }
 0x179   : > { %v1200_v18 = vpop.f32.mrb[4].mxu0 }
 0x17a   : > { %v1186_v63 = vpop.f32.mrb[4].mxu1  ;;  %v811_v0 = vpop.f32.mrb[5].mxu0 }
 0x17b   : > { %v820_v1 = vadd.f32 %v1200_v18, %v1186_v63  ;;  %v718_v3 = vpop.f32.mrb[5].mxu1  ;;  %v1201_v5 = vpop.f32.mrb[6].mxu0 }
 0x17c   : > { %v812_v6 = vadd.f32 %v811_v0, %v718_v3  ;;  %v1187_v8 = vpop.f32.mrb[6].mxu1  ;;  %v814_v9 = vpop.f32.mrb[7].mxu0 }
 0x17d   : > { %v823_v10 = vadd.f32 %v1201_v5, %v1187_v8  ;;  %v721_v16 = vpop.f32.mrb[7].mxu1 }
 0x17e   : > { %v815_v15 = vadd.f32 %v814_v9, %v721_v16 }
 0x181   : > { %v1210_v11 = vpop.f32.mrb[0].mxu0 }
 0x182   : > { %v1222_v13 = vadd.f32 %v1210_v11, %v1182_v62  ;;  %v898_v14 = vpop.f32.mrb[1].mxu0  ;;  %v1214_v19 = vpop.f32.mrb[8].mxu1 }
 0x183   : > { %v1223_v20 = vadd.f32 %v898_v14, %v702_v2  ;;  %v935_v21 = vadd.f32 %v1214_v19, %v820_v1  ;;  %v1211_v22 = vpop.f32.mrb[2].mxu0  ;;  %v914_v23 = vpop.f32.mrb[9].mxu1 }
 0x184   : > { %v946_v25 = vadd.f32 %v1222_v13, %v1126_v12  ;;  %v1224_v26 = vadd.f32 %v1211_v22, %v1183_v7  ;;  %v933_v48 = vadd.f32 %v914_v23, %v812_v6  ;;  %v901_v28 = vpop.f32.mrb[3].mxu0  ;;  %v1215_v29 = vpop.f32.mrb[10].mxu1 }
 0x185   : > { %v944_v30 = vadd.f32 %v1223_v20, %v1126_v12  ;;  %v950_v31 = vadd.f32 %v1126_v12, %v935_v21  ;;  %v1225_v33 = vadd.f32 %v901_v28, %v705_v4  ;;  %v936_v34 = vadd.f32 %v1215_v29, %v823_v10  ;;  %v917_v39 = vpop.f32.mrb[11].mxu1 }
 0x186   : > { %v954_v35 = vpack.c.bf16 %v946_v25, %v946_v25  ;;  %v947_v38 = vadd.f32 %v1224_v26, %v1126_v12  ;;  %v948_v40 = vadd.f32 %v1126_v12, %v933_v48  ;;  %v934_v41 = vadd.f32 %v917_v39, %v815_v15 }
 0x187   : > { %v952_v42 = vpack.c.bf16 %v944_v30, %v944_v30  ;;  %v958_v32 = vpack.c.bf16 %v950_v31, %v950_v31  ;;  %v945_v43 = vadd.f32 %v1225_v33, %v1126_v12  ;;  %v951_v36 = vadd.f32 %v1126_v12, %v936_v34 }
 0x188   : > { %963 = vst.msk [vmem:[%s380_s25 + $0x8] sm:$0xf] %vm960_vm7, %v954_v35  ;;  %v955_v45 = vpack.c.bf16 %v947_v38, %v947_v38  ;;  %v956_v46 = vpack.c.bf16 %v948_v40, %v948_v40  ;;  %v949_v59 = vadd.f32 %v1126_v12, %v934_v41 }
 0x189   : > { %961 = vst.msk [vmem:[%s380_s25] sm:$0xf] %vm960_vm7, %v952_v42  ;;  %967 = vst.msk [vmem:[%s380_s25 + $0x18] sm:$0xf] %vm960_vm7, %v958_v32  ;;  %v953_v57 = vpack.c.bf16 %v945_v43, %v945_v43  ;;  %v959_v47 = vpack.c.bf16 %v951_v36, %v951_v36 }
 0x18a   : > { %964 = vst.msk [vmem:[%s380_s25 + $0xc] sm:$0xf] %vm960_vm7, %v955_v45  ;;  %965 = vst.msk [vmem:[%s380_s25 + $0x10] sm:$0xf] %vm960_vm7, %v956_v46  ;;  %v957_v49 = vpack.c.bf16 %v949_v59, %v949_v59 }
 0x18b   : > { %962 = vst.msk [vmem:[%s380_s25 + $0x4] sm:$0xf] %vm960_vm7, %v953_v57  ;;  %968 = vst.msk [vmem:[%s380_s25 + $0x1c] sm:$0xf] %vm960_vm7, %v959_v47 }
 0x18c   : > { %966 = vst.msk [vmem:[%s380_s25 + $0x14] sm:$0xf] %vm960_vm7, %v957_v49 }
 0x18d PF: > { %s15_s0 = sadd.s32 1, %s1340_s0   ;;  %s1627_s18 = smov %s1336_s19 }
 0x18e   : > { %p12_p5 = scmp.ge.s32.totalorder %s15_s0, 4   ;;  %s1628_s19 = smov %s1630_s2 }
 0x190   :  { %14 = sbr.rel (!%p12_p5) target bundleno = 2 (0x2), region = 76 }

// kernel: rt4ksr_rep_forward.9
= control target key start
LH: loop header
LB: loop body
LE: loop exit
PB: predicated region body
PF: predicated region fallthrough
CT: control target
= control target key end

     0   :  { %s1854_s28 = smov 0   ;;  %s1856_s29 = smov 0   ;;  %s2214_s0 = inlined_call_operand.vmem [shape: bf16[2,8,8,16], index: 0, kind: input, shape index: {}, may-alias: {0,1,2}]   ;;  %s2215_s1 = inlined_call_operand.vmem [shape: bf16[2,8,8,16], index: 1, kind: input, shape index: {}, may-alias: {0,1,2}]   ;;  %s2216_s2 = inlined_call_operand.vmem [shape: bf16[2,8,8,16], index: 2, kind: input, shape index: {}, may-alias: {0,1,2}]   ;;  %s2217_s3 = inlined_call_operand.vmem [shape: f32[1,16], index: 3, kind: input, shape index: {}]   ;;  %s2218_s4 = inlined_call_operand.vmem [shape: f32[1,16], index: 4, kind: input, shape index: {}]   ;;  %s2219_s5 = inlined_call_operand.vmem [shape: bf16[144,32], index: 5, kind: input, shape index: {}]   ;;  %s2220_s6 = inlined_call_operand.vmem [shape: f32[1,32], index: 6, kind: input, shape index: {}]   ;;  %s2221_s7 = inlined_call_operand.vmem [shape: bf16[16,16], index: 7, kind: input, shape index: {}]   ;;  %s2222_s8 = inlined_call_operand.vmem [shape: f32[1,16], index: 8, kind: input, shape index: {}]   ;;  %s2223_s9 = inlined_call_operand.vmem [shape: bf16[2,8,8,16], index: 9, kind: output, shape index: {}]  }
   0x1   :  { %s1858_s30 = smov 0  }
   0x2 LB: > { %s31_s10 = sadd.s32 1, %s1794_s29  ;;  %p1512_p0 = scmp.ge.s32.totalorder %s1798_s30, 1  ;;  %s1798_s30 = sphi %s1858_s30, %s19_s30   ;;  %s1794_s29 = sphi %s1856_s29, %s2225_s29   ;;  %s1790_s28 = sphi %s1854_s28, %s2224_s28  }
   0x3   : > { %p33_p1 = scmp.ge.s32.totalorder %s31_s10, 2  ;;  %p370_p2 = scmp.lt.s32.totalorder %s1798_s30, 3 }
   0x5   : > { %s2227_s10 = smov (%p33_p1, %s31_s10), 0  ;;  %p371_p3 = pnand %p1512_p0, %p370_p2 }
   0x6   : > { %p442_p4 = scmp.lt.s32.totalorder (!%p371_p3), %s1790_s28, 1  ;;  %vm511_vm0 = vcmask (!%p371_p3), 130048   ;;  %vm731_vm1 = vcmask (!%p371_p3), 1040384   ;;  %vm768_vm2 = vcmask (!%p371_p3), 1046528   ;;  %vm817_vm3 = vcmask (!%p371_p3), 1045504   ;;  %s1801_s23 = smov (!%p371_p3), 16  }
   0x7   : > { %374 = sbr.rel (%p371_p3) target bundleno = 1065 (0x429), region = 56  ;;  %vm874_vm4 = vcmask (!%p371_p3), 261120   ;;  %vm925_vm5 = vcmask (!%p371_p3), 392192   ;;  %s1803_s0 = smov (!%p371_p3), 112   ;;  %vm1376_vm6 = vcmask (!%p371_p3), 125952  }
   0xe   : > { %s2229_s28 = smov (!%p442_p4, %s1790_s28), 1 }
   0xf   : > { %s1553_s11 = sshll.u32 %s2229_s28, 5 }
  0x10   : > { %s462_s14 = scalar_lea.vmem %s2215_s1, %s1553_s11  ;;  %s2180_s12 = scalar_lea.vmem %s2223_s9, %s1553_s11 }
  0x11   : > { %v1559_v0 = vld [vmem:[%s462_s14] sm:$0xff]   ;;  %v1575_v1 = vld [vmem:[%s462_s14 + $0x8] sm:$0xff]   ;;  %v1576_v6 = vld [vmem:[%s462_s14 + $0x10] sm:$0xff]  }
  0x12   : > { %v1880_v2 = vunpack.c.l.bf16 %v1559_v0  ;;  %v1882_v3 = vunpack.c.l.bf16 %v1575_v1  ;;  %v1884_v4 = vunpack.c.h.bf16 %v1559_v0  ;;  %v1886_v5 = vunpack.c.h.bf16 %v1575_v1  ;;  %v1577_v13 = vld [vmem:[%s462_s14 + $0x18] sm:$0xff]   ;;  %s1802_s14 = smov 32  }
  0x13   : > { %v1896_v11 = vunpack.c.l.bf16 %v1576_v6  ;;  %v1898_v12 = vunpack.c.h.bf16 %v1576_v6  ;;  %v1904_v16 = vunpack.c.l.bf16 %v1577_v13  ;;  %v1906_v17 = vunpack.c.h.bf16 %v1577_v13 }
  0x14   : > { %v540_v7 = vsel %vm511_vm0, %v1880_v2, 0.0  ;;  %v546_v8 = vsel %vm511_vm0, %v1882_v3, 0.0  ;;  %v543_v9 = vsel %vm511_vm0, %v1884_v4, 0.0  ;;  %v549_v10 = vsel %vm511_vm0, %v1886_v5, 0.0 }
  0x15   : > { %541 = vadd.xlane.f32.xlu0 %v540_v7  ;;  %547 = vadd.xlane.f32.xlu1 %v546_v8  ;;  %v552_v14 = vsel %vm511_vm0, %v1896_v11, 0.0  ;;  %v555_v15 = vsel %vm511_vm0, %v1898_v12, 0.0  ;;  %v558_v18 = vsel %vm511_vm0, %v1904_v16, 0.0  ;;  %v561_v19 = vsel %vm511_vm0, %v1906_v17, 0.0 }
  0x19   : > { %544 = vadd.xlane.f32.xlu0 %v543_v9  ;;  %550 = vadd.xlane.f32.xlu1 %v549_v10 }
  0x1d   : > { %553 = vadd.xlane.f32.xlu0 %v552_v14  ;;  %556 = vadd.xlane.f32.xlu1 %v555_v15 }
  0x21   : > { %559 = vadd.xlane.f32.xlu0 %v558_v18  ;;  %562 = vadd.xlane.f32.xlu1 %v561_v19 }
  0xa2   : > { %v542_v20 = vpop.xlane.xlu0 %541  ;;  %v548_v21 = vpop.xlane.xlu1 %547 }
  0xa3   : > { %v564_v22 = vmul.f32 0.0625, %v542_v20  ;;  %v566_v23 = vmul.f32 0.0625, %v548_v21  ;;  %v1800_v21 = vmov 0.0  }
  0xa5   : > { %v1913_v24 = vsub.f32 %v1880_v2, %v564_v22  ;;  %v1916_v25 = vsub.f32 %v1882_v3, %v566_v23  ;;  %v711_v22 = vrot.slane %v1800_v21, 7 }
  0xa6   : > { %v545_v26 = vpop.xlane.xlu0 %544  ;;  %v551_v27 = vpop.xlane.xlu1 %550 }
  0xa7   : > { %v565_v28 = vmul.f32 0.0625, %v545_v26  ;;  %v567_v29 = vmul.f32 0.0625, %v551_v27  ;;  %v580_v30 = vmul.f32 %v1913_v24, %v1913_v24  ;;  %v582_v31 = vmul.f32 %v1916_v25, %v1916_v25 }
  0xa9   : > { %v1923_v32 = vsub.f32 %v1884_v4, %v565_v28  ;;  %v1926_v33 = vsub.f32 %v1886_v5, %v567_v29  ;;  %v588_v34 = vsel %vm511_vm0, %v580_v30, 0.0  ;;  %v594_v37 = vsel %vm511_vm0, %v582_v31, 0.0  ;;  %v1963_v28 = vld [vmem:[%s2217_s3] ss:$0 sm:$0xff] }
  0xaa   : > { %589 = vadd.xlane.f32.xlu0 %v588_v34  ;;  %v554_v35 = vpop.xlane.xlu0 %553  ;;  %v557_v36 = vpop.xlane.xlu1 %556 }
  0xab   : > { %v568_v38 = vmul.f32 0.0625, %v554_v35  ;;  %v569_v39 = vmul.f32 0.0625, %v557_v36  ;;  %v581_v40 = vmul.f32 %v1923_v32, %v1923_v32  ;;  %v583_v41 = vmul.f32 %v1926_v33, %v1926_v33 }
  0xac   : > { %v1967_v35 = vsel %vm731_vm1, 0.0, %v711_v22  ;;  %v1970_v36 = vsel %vm731_vm1, %v711_v22, 0.0 }
  0xad   : > { %v1935_v42 = vsub.f32 %v1896_v11, %v568_v38  ;;  %v1938_v43 = vsub.f32 %v1898_v12, %v569_v39  ;;  %v591_v44 = vsel %vm511_vm0, %v581_v40, 0.0  ;;  %v597_v47 = vsel %vm511_vm0, %v583_v41, 0.0  ;;  %v1975_v38 = vld [vmem:[%s2218_s4] ss:$0 sm:$0xff] }
  0xae   : > { %595 = vadd.xlane.f32.xlu0 %v594_v37  ;;  %592 = vadd.xlane.f32.xlu1 %v591_v44  ;;  %v560_v45 = vpop.xlane.xlu0 %559  ;;  %v563_v46 = vpop.xlane.xlu1 %562  ;;  %v770_v44 = vrot.slane %v1970_v36, 1 }
  0xaf   : > { %v570_v48 = vmul.f32 0.0625, %v560_v45  ;;  %v571_v49 = vmul.f32 0.0625, %v563_v46  ;;  %v584_v50 = vmul.f32 %v1935_v42, %v1935_v42  ;;  %v585_v51 = vmul.f32 %v1938_v43, %v1938_v43 }
  0xb1   : > { %v1947_v52 = vsub.f32 %v1904_v16, %v570_v48  ;;  %v1950_v53 = vsub.f32 %v1906_v17, %v571_v49  ;;  %v600_v54 = vsel %vm511_vm0, %v584_v50, 0.0  ;;  %v603_v55 = vsel %vm511_vm0, %v585_v51, 0.0 }
  0xb2   : > { %598 = vadd.xlane.f32.xlu1 %v597_v47  ;;  %601 = vadd.xlane.f32.xlu0 %v600_v54 }
  0xb3   : > { %v586_v56 = vmul.f32 %v1947_v52, %v1947_v52  ;;  %v587_v57 = vmul.f32 %v1950_v53, %v1950_v53 }
  0xb5   : > { %v606_v58 = vsel %vm511_vm0, %v586_v56, 0.0  ;;  %v609_v59 = vsel %vm511_vm0, %v587_v57, 0.0  ;;  %v818_v56 = vrot.slane %v1967_v35, 2  ;;  %v819_v57 = vrot.slane %v1970_v36, 2 }
  0xb6   : > { %604 = vadd.xlane.f32.xlu1 %v603_v55  ;;  %607 = vadd.xlane.f32.xlu0 %v606_v58 }
  0xba   : > { %610 = vadd.xlane.f32.xlu1 %v609_v59 }
 0x137   : > { %v590_v60 = vpop.xlane.xlu0 %589 }
 0x138   : > { %v612_v61 = vmul.f32 0.0625, %v590_v60 }
 0x13a   : > { %v620_v62 = vadd.f32 1e-06, %v612_v61  ;;  %v1750_v61 = vld [vmem:[%s2219_s5] sm:$0xff]  }
 0x13b   : > { %v593_v63 = vpop.xlane.xlu1 %592  ;;  %v596_v0 = vpop.xlane.xlu0 %595  ;;  %1618 = vmatprep.subr.bf16.mxu0 %v1750_v61 }
 0x13c   : > { %1760 = vrsqrt.f32 %v620_v62  ;;  %v613_v1 = vmul.f32 0.0625, %v593_v63  ;;  %v614_v6 = vmul.f32 0.0625, %v596_v0  ;;  %v1751_v62 = vld [vmem:[%s2219_s5 + $0x18] sm:$0xff]   ;;  %1619 = vmatpush3.bf16.msra.mxu0 %v1750_v61 }
 0x13d   : > { %1604 = vmatprep.subr.bf16.mxu1 %v1751_v62 }
 0x13e   : > { %v621_v7 = vadd.f32 1e-06, %v613_v1  ;;  %v622_v8 = vadd.f32 1e-06, %v614_v6  ;;  %1605 = vmatpush3.bf16.msra.mxu1 %v1751_v62 }
 0x13f   : > { %v599_v9 = vpop.xlane.xlu1 %598  ;;  %v602_v10 = vpop.xlane.xlu0 %601 }
 0x140   : > { %1762 = vrsqrt.f32 %v621_v7  ;;  %v615_v13 = vmul.f32 0.0625, %v599_v9  ;;  %v616_v14 = vmul.f32 0.0625, %v602_v10 }
 0x141   : > { %1764 = vrsqrt.f32 %v622_v8 }
 0x142   : > { %v623_v15 = vadd.f32 1e-06, %v615_v13  ;;  %v624_v18 = vadd.f32 1e-06, %v616_v14 }
 0x143   : > { %v605_v19 = vpop.xlane.xlu1 %604  ;;  %v608_v20 = vpop.xlane.xlu0 %607 }
 0x144   : > { %1766 = vrsqrt.f32 %v623_v15  ;;  %v617_v23 = vmul.f32 0.0625, %v605_v19  ;;  %v618_v26 = vmul.f32 0.0625, %v608_v20 }
 0x145   : > { %1768 = vrsqrt.f32 %v624_v18 }
 0x146   : > { %v1761_v27 = vpop.eup %1760  ;;  %v625_v29 = vadd.f32 1e-06, %v617_v23  ;;  %v626_v30 = vadd.f32 1e-06, %v618_v26 }
 0x147   : > { %v636_v31 = vmul.f32 %v1761_v27, %v1913_v24  ;;  %v611_v34 = vpop.xlane.xlu1 %610  ;;  %v769_v24 = vrot.slane %v1967_v35, 1 }
 0x148   : > { %1770 = vrsqrt.f32 %v625_v29  ;;  %v619_v37 = vmul.f32 0.0625, %v611_v34  ;;  %v1753_v34 = vld [vmem:[%s2219_s5 + $0x20] sm:$0xff]  }
 0x149   : > { %v644_v39 = vmul.f32 %v1963_v28, %v636_v31  ;;  %1772 = vrsqrt.f32 %v626_v30  ;;  %v1986_v55 = vsel %vm768_vm2, %v769_v24, %v770_v44  ;;  %v2024_v31 = vsel %vm817_vm3, %v818_v56, %v819_v57  ;;  %1606 = vmatprep.subr.bf16.mxu1 %v1753_v34 }
 0x14a   : > { %v1763_v40 = vpop.eup %1762  ;;  %v627_v41 = vadd.f32 1e-06, %v619_v37  ;;  %1607 = vmatpush3.bf16.msra.mxu1 %v1753_v34 }
 0x14b   : > { %v1765_v45 = vpop.eup %1764  ;;  %v637_v46 = vmul.f32 %v1763_v40, %v1923_v32  ;;  %v652_v47 = vadd.f32 %v1975_v38, %v644_v39 }
 0x14c   : > { %v638_v48 = vmul.f32 %v1765_v45, %v1916_v25  ;;  %1774 = vrsqrt.f32 %v627_v41 }
 0x14d   : > { %v645_v49 = vmul.f32 %v1963_v28, %v637_v46  ;;  %v712_v50 = vrot.slane %v652_v47, 7 }
 0x14e   : > { %v1767_v51 = vpop.eup %1766  ;;  %v646_v54 = vmul.f32 %v1963_v28, %v638_v48 }
 0x14f   : > { %v1769_v32 = vpop.eup %1768  ;;  %v639_v58 = vmul.f32 %v1767_v51, %v1926_v33  ;;  %v1992_v59 = vsel %vm731_vm1, 0.0, %v712_v50  ;;  %v743_v25 = vsel %vm731_vm1, %v712_v50, 0.0  ;;  %v653_v60 = vadd.f32 %v1975_v38, %v645_v49 }
 0x150   : > { %v640_v63 = vmul.f32 %v1769_v32, %v1935_v42  ;;  %v772_v0 = vrot.slane %v1992_v59, 1  ;;  %v773_v33 = vrot.slane %v743_v25, 1  ;;  %v654_v1 = vadd.f32 %v1975_v38, %v646_v54 }
 0x151   : > { %v647_v6 = vmul.f32 %v1963_v28, %v639_v58  ;;  %v713_v7 = vrot.slane %v653_v60, 7  ;;  %v821_v8 = vrot.slane %v1992_v59, 2  ;;  %v822_v42 = vrot.slane %v743_v25, 2  ;;  %v1755_v60 = vld [vmem:[%s2219_s5 + $0x28] sm:$0xff]  }
 0x152   : > { %v1771_v9 = vpop.eup %1770  ;;  %v648_v10 = vmul.f32 %v1963_v28, %v640_v63  ;;  %v774_v13 = vsel %vm768_vm2, %v772_v0, %v773_v33  ;;  %v714_v14 = vrot.slane %v654_v1, 7  ;;  %1608 = vmatprep.subr.bf16.mxu1 %v1755_v60 }
 0x153   : > { %v1773_v15 = vpop.eup %1772  ;;  %v641_v18 = vmul.f32 %v1771_v9, %v1938_v43  ;;  %v1700_v19 = vpack.i.bf16 %v774_v13, %v1986_v55  ;;  %v2012_v20 = vsel %vm731_vm1, 0.0, %v713_v7  ;;  %v744_v21 = vsel %vm731_vm1, %v713_v7, 0.0  ;;  %1609 = vmatpush3.bf16.msra.mxu1 %v1755_v60 }
 0x154   : > { %v642_v22 = vmul.f32 %v1773_v15, %v1947_v52  ;;  %v2017_v23 = vsel %vm731_vm1, 0.0, %v714_v14  ;;  %v745_v26 = vsel %vm731_vm1, %v714_v14, 0.0  ;;  %v775_v27 = vrot.slane %v2012_v20, 1  ;;  %v1752_v52 = vld [vmem:[%s2219_s5 + $0x8] sm:$0xff]  }
 0x155   : > { %1701 = vrot.lane.b32.xlu0 %v1700_v19, %s1801_s23  ;;  %v776_v43 = vrot.slane %v744_v21, 1  ;;  %v778_v29 = vrot.slane %v2017_v23, 1  ;;  %v779_v30 = vrot.slane %v745_v26, 1  ;;  %v649_v37 = vmul.f32 %v1963_v28, %v641_v18  ;;  %1620 = vmatprep.subr.bf16.mxu0 %v1752_v52 }
 0x156   : > { %v1775_v36 = vpop.eup %1774  ;;  %v650_v39 = vmul.f32 %v1963_v28, %v642_v22  ;;  %v655_v40 = vadd.f32 %v1975_v38, %v647_v6  ;;  %v656_v41 = vadd.f32 %v1975_v38, %v648_v10  ;;  %v823_v46 = vsel %vm817_vm3, %v821_v8, %v822_v42  ;;  %1621 = vmatpush3.bf16.msra.mxu0 %v1752_v52  ;;  %v2075_v22 = vld [vmem:[%s2219_s5 + $0x30] sm:$0xff]  }
 0x157   : > { %v643_v24 = vmul.f32 %v1775_v36, %v1950_v53  ;;  %v777_v44 = vsel %vm768_vm2, %v775_v27, %v776_v43  ;;  %v780_v45 = vsel %vm768_vm2, %v778_v29, %v779_v30  ;;  %v824_v50 = vrot.slane %v2012_v20, 2 }
 0x158   : > { %v1705_v47 = vpack.i.bf16 %v780_v45, %v777_v44  ;;  %v715_v48 = vrot.slane %v655_v40, 7  ;;  %v716_v49 = vrot.slane %v656_v41, 7  ;;  %v825_v54 = vrot.slane %v744_v21, 2 }
 0x159   : > { %v651_v51 = vmul.f32 %v1963_v28, %v643_v24  ;;  %v827_v56 = vrot.slane %v2017_v23, 2  ;;  %v828_v53 = vrot.slane %v745_v26, 2  ;;  %v1754_v28 = vld [vmem:[%s2219_s5 + $0x10] sm:$0xff]   ;;  %v1710_v33 = vpack.i.bf16 %v823_v46, %v2024_v31 }
 0x15a   : > { %1706 = vrot.lane.b32.xlu1 %v1705_v47, %s1801_s23  ;;  %v2045_v57 = vsel %vm731_vm1, 0.0, %v715_v48  ;;  %v2048_v32 = vsel %vm731_vm1, 0.0, %v716_v49  ;;  %v746_v58 = vsel %vm731_vm1, %v715_v48, 0.0  ;;  %v747_v25 = vsel %vm731_vm1, %v716_v49, 0.0  ;;  %1622 = vmatprep.subr.bf16.mxu0 %v1754_v28 }
 0x15b   : > { %v781_v61 = vrot.slane %v2045_v57, 1  ;;  %v782_v62 = vrot.slane %v746_v58, 1  ;;  %v784_v63 = vrot.slane %v2048_v32, 1  ;;  %v785_v0 = vrot.slane %v747_v25, 1  ;;  %1623 = vmatpush3.bf16.msra.mxu0 %v1754_v28 }
 0x15c   : > { %v826_v1 = vsel %vm817_vm3, %v824_v50, %v825_v54  ;;  %v830_v6 = vrot.slane %v2045_v57, 2  ;;  %v831_v7 = vrot.slane %v746_v58, 2  ;;  %v829_v10 = vsel %vm817_vm3, %v827_v56, %v828_v53  ;;  %1632 = vmatprep.subr.bf16.mxu0 %v2075_v22 }
 0x15d   : > { %v783_v8 = vsel %vm768_vm2, %v781_v61, %v782_v62  ;;  %v786_v9 = vsel %vm768_vm2, %v784_v63, %v785_v0  ;;  %v833_v13 = vrot.slane %v2048_v32, 2  ;;  %v834_v42 = vrot.slane %v747_v25, 2 }
 0x15e   : > { %1711 = vrot.lane.b32.xlu1 %v1710_v33, %s1802_s14  ;;  %v1720_v14 = vpack.i.bf16 %v786_v9, %v783_v8  ;;  %v659_v15 = vadd.f32 %v1975_v38, %v651_v51  ;;  %v832_v18 = vsel %vm817_vm3, %v830_v6, %v831_v7  ;;  %v657_v19 = vadd.f32 %v1975_v38, %v649_v37 }
 0x15f   : > { %v658_v21 = vadd.f32 %v1975_v38, %v650_v39  ;;  %v1715_v26 = vpack.i.bf16 %v829_v10, %v826_v1  ;;  %v835_v27 = vsel %vm817_vm3, %v833_v13, %v834_v42 }
 0x160   : > { %1721 = vrot.lane.b32.xlu0 %v1720_v14, %s1801_s23  ;;  %v719_v43 = vrot.slane %v659_v15, 7  ;;  %v717_v29 = vrot.slane %v657_v19, 7  ;;  %v1730_v52 = vpack.i.bf16 %v835_v27, %v832_v18 }
 0x161   : > { %v718_v30 = vrot.slane %v658_v21, 7 }
 0x162   : > { %1716 = vrot.lane.b32.xlu1 %v1715_v26, %s1802_s14  ;;  %v2082_v38 = vsel %vm731_vm1, 0.0, %v719_v43  ;;  %v750_v34 = vsel %vm731_vm1, %v719_v43, 0.0  ;;  %v2087_v39 = vsel %vm731_vm1, 0.0, %v717_v29  ;;  %v748_v41 = vsel %vm731_vm1, %v717_v29, 0.0 }
 0x163   : > { %v889_v36 = vrot.slane %v2082_v38, 1  ;;  %v890_v37 = vrot.slane %v750_v34, 1  ;;  %v2090_v40 = vsel %vm731_vm1, 0.0, %v718_v30  ;;  %v749_v24 = vsel %vm731_vm1, %v718_v30, 0.0 }
 0x164   : > { %1731 = vrot.lane.b32.xlu0 %v1730_v52, %s1802_s14  ;;  %v787_v44 = vrot.slane %v2087_v39, 1  ;;  %v790_v45 = vrot.slane %v2090_v40, 1  ;;  %v788_v47 = vrot.slane %v748_v41, 1  ;;  %v791_v48 = vrot.slane %v749_v24, 1 }
 0x165   : > { %v891_v46 = vsel %vm768_vm2, %v889_v36, %v890_v37  ;;  %v836_v49 = vrot.slane %v2087_v39, 2  ;;  %v837_v51 = vrot.slane %v748_v41, 2  ;;  %v839_v54 = vrot.slane %v2090_v40, 2 }
 0x166   : > { %v1740_v50 = vpack.i.bf16 %v1986_v55, %v891_v46  ;;  %v840_v56 = vrot.slane %v749_v24, 2  ;;  %v789_v53 = vsel %vm768_vm2, %v787_v44, %v788_v47  ;;  %v792_v58 = vsel %vm768_vm2, %v790_v45, %v791_v48 }
 0x167   : > { %v1725_v25 = vpack.i.bf16 %v792_v58, %v789_v53  ;;  %v838_v28 = vsel %vm817_vm3, %v836_v49, %v837_v51  ;;  %v895_v61 = vrot.slane %v2082_v38, 2  ;;  %v896_v62 = vrot.slane %v750_v34, 2 }
 0x168   : > { %1741 = vrot.lane.b32.xlu0 %v1740_v50, %s1801_s23  ;;  %v841_v60 = vsel %vm817_vm3, %v839_v54, %v840_v56 }
 0x169   : > { %1726 = vrot.lane.b32.xlu1 %v1725_v25, %s1801_s23  ;;  %v1735_v55 = vpack.i.bf16 %v841_v60, %v838_v28  ;;  %v897_v63 = vsel %vm817_vm3, %v895_v61, %v896_v62 }
 0x16a   : > { %v1745_v0 = vpack.i.bf16 %v2024_v31, %v897_v63 }
 0x16d   : > { %1736 = vrot.lane.b32.xlu1 %v1735_v55, %s1802_s14 }
 0x171   : > { %1746 = vrot.lane.b32.xlu1 %v1745_v0, %s1802_s14 }
 0x1c7   : > { %v1702_v33 = vpop.permute.xlu0 %1701 }
 0x1c8   : > { %v1704_v6 = vunpack.i.h.bf16 %v1702_v33  ;;  %v1703_v7 = vunpack.i.l.bf16 %v1702_v33 }
 0x1ca   : > { %v866_v15 = vsel %vm511_vm0, %v1967_v35, %v1703_v7  ;;  %v867_v18 = vsel %vm511_vm0, %v1992_v59, %v1704_v6 }
 0x1cc   : > { %v1707_v1 = vpop.permute.xlu1 %1706 }
 0x1cd   : > { %v1709_v13 = vunpack.i.h.bf16 %v1707_v1  ;;  %v1708_v14 = vunpack.i.l.bf16 %v1707_v1 }
 0x1cf   : > { %v869_v52 = vsel %vm511_vm0, %v2017_v23, %v1709_v13  ;;  %v868_v59 = vsel %vm511_vm0, %v2012_v20, %v1708_v14  ;;  %v1757_v20 = vld [vmem:[%s2219_s5 + $0x38] sm:$0xff]  }
 0x1d0   : > { %v1712_v8 = vpop.permute.xlu1 %1711 }
 0x1d1   : > { %v1714_v9 = vunpack.i.h.bf16 %v1712_v8  ;;  %v1713_v10 = vunpack.i.l.bf16 %v1712_v8 }
 0x1d2   : > { %v1722_v42 = vpop.permute.xlu0 %1721 }
 0x1d3   : > { %v875_v31 = vsel %vm874_vm4, %v866_v15, %v1713_v10  ;;  %v876_v19 = vsel %vm874_vm4, %v867_v18, %v1714_v9  ;;  %v1724_v21 = vunpack.i.h.bf16 %v1722_v42  ;;  %v1723_v26 = vunpack.i.l.bf16 %v1722_v42  ;;  %v1759_v10 = vld [vmem:[%s2221_s7] sm:$0xff]  }
 0x1d4   : > { %v1717_v27 = vpop.permute.xlu1 %1716  ;;  %v883_v43 = vpack.c.bf16 %v876_v19, %v875_v31  ;;  %1646 = vmatprep.subr.bf16.mxu1 %v1759_v10 }
 0x1d5   : > { %v1719_v29 = vunpack.i.h.bf16 %v1717_v27  ;;  %v1718_v30 = vunpack.i.l.bf16 %v1717_v27  ;;  %v871_v44 = vsel %vm511_vm0, %v2048_v32, %v1724_v21  ;;  %v870_v45 = vsel %vm511_vm0, %v2045_v57, %v1723_v26  ;;  %v1758_v57 = vld [vmem:[%s2219_s5 + $0x40] sm:$0xff]  }
 0x1d6   : > { %v1732_v34 = vpop.permute.xlu0 %1731  ;;  %1624 = vmatprep.mubr.msk.bf16.mxu0 %vm925_vm5, %v883_v43  ;;  %v1544_v27 = vld [vmem:[%s2220_s6] ss:$0 sm:$0xff] }
 0x1d7   : > { %v1734_v36 = vunpack.i.h.bf16 %v1732_v34  ;;  %v1733_v37 = vunpack.i.l.bf16 %v1732_v34  ;;  %v877_v41 = vsel %vm874_vm4, %v868_v59, %v1718_v30  ;;  %v878_v24 = vsel %vm874_vm4, %v869_v52, %v1719_v29 }
 0x1d8   : > { %v884_v46 = vpack.c.bf16 %v878_v24, %v877_v41  ;;  %v903_v23 = vpack.c.bf16 %v877_v41, %v876_v19 }
 0x1d9   : > { %v879_v47 = vsel %vm874_vm4, %v870_v45, %v1733_v37  ;;  %v880_v48 = vsel %vm874_vm4, %v871_v44, %v1734_v36 }
 0x1da   : > { %v885_v49 = vpack.c.bf16 %v880_v48, %v879_v47  ;;  %v904_v50 = vpack.c.bf16 %v879_v47, %v878_v24  ;;  %1610 = vmatprep.mubr.msk.bf16.mxu1 %vm925_vm5, %v903_v23  ;;  %1625 = vmatmul.mubr.msk.bf16.vlgmr.msra.gmra.mrb[0].mxu0 %vm925_vm5, %v884_v46  ;;  %v1742_v56 = vpop.permute.xlu0 %1741 }
 0x1db   : > { %1633 = vmatpush3.bf16.msra.mxu0 %v2075_v22  ;;  %v1727_v32 = vpop.permute.xlu1 %1726  ;;  %v1743_v60 = vunpack.i.l.bf16 %v1742_v56  ;;  %v1744_v6 = vunpack.i.h.bf16 %v1742_v56 }
 0x1dc   : > { %1611 = vmatmul.mubr.msk.bf16.vlgmr.msra.gmra.mrb[0].mxu1 %vm925_vm5, %v904_v50  ;;  %1628 = vmatprep.mubr.msk.bf16.mxu0 %vm925_vm5, %v885_v49  ;;  %v1729_v51 = vunpack.i.h.bf16 %v1727_v32  ;;  %v1728_v54 = vunpack.i.l.bf16 %v1727_v32 }
 0x1dd   : > { %1634 = vmatprep.subr.bf16.mxu0 %v1757_v20  ;;  %v901_v1 = vsel %vm511_vm0, %v2082_v38, %v1743_v60  ;;  %v1112_v38 = vsel %vm511_vm0, %v1967_v35, %v1744_v6  ;;  %1647 = vmatpush3.bf16.msra.mxu1 %v1759_v10 }
 0x1de   : > { %v873_v22 = vsel %vm511_vm0, %v2090_v40, %v1729_v51  ;;  %v872_v28 = vsel %vm511_vm0, %v2087_v39, %v1728_v54 }
 0x1df   : > { %1635 = vmatpush3.bf16.msra.mxu0 %v1757_v20  ;;  %v1737_v53 = vpop.permute.xlu1 %1736 }
 0x1e0   : > { %1636 = vmatprep.subr.bf16.mxu0 %v1758_v57  ;;  %v1739_v58 = vunpack.i.h.bf16 %v1737_v53  ;;  %v1738_v25 = vunpack.i.l.bf16 %v1737_v53 }
 0x1e2   : > { %v881_v61 = vsel %vm874_vm4, %v872_v28, %v1738_v25  ;;  %v882_v62 = vsel %vm874_vm4, %v873_v22, %v1739_v58 }
 0x1e3   : > { %1637 = vmatpush3.bf16.msra.mxu0 %v1758_v57  ;;  %v886_v55 = vpack.c.bf16 %v882_v62, %v881_v61  ;;  %v905_v63 = vpack.c.bf16 %v881_v61, %v880_v48  ;;  %v1747_v0 = vpop.permute.xlu1 %1746 }
 0x1e4   : > { %v1748_v33 = vunpack.i.l.bf16 %v1747_v0  ;;  %v1749_v7 = vunpack.i.h.bf16 %v1747_v0 }
 0x1e5   : > { %1614 = vmatprep.mubr.msk.bf16.mxu1 %vm925_vm5, %v905_v63  ;;  %1629 = vmatmul.mubr.msk.bf16.gmra.mrb[4].mxu0 %vm925_vm5, %v886_v55 }
 0x1e6   : > { %v902_v40 = vsel %vm874_vm4, %v901_v1, %v1748_v33  ;;  %1638 = vmatprep.mubr.msk.bf16.mxu0 %vm925_vm5, %v884_v46  ;;  %v1113_v8 = vsel %vm874_vm4, %v1112_v38, %v1749_v7 }
 0x1e7   : > { %v906_v39 = vpack.c.bf16 %v902_v40, %v882_v62  ;;  %v1114_v9 = vpack.c.bf16 %v1113_v8, %v902_v40  ;;  %v1545_v8 = vld [vmem:[%s2222_s8] ss:$0 sm:$0xff] }
 0x1e9   : > { %1615 = vmatmul.mubr.msk.bf16.gmra.mrb[4].mxu1 %vm925_vm5, %v906_v39 }
 0x1ed   : > { %1639 = vmatmul.mubr.msk.bf16.vlgmr.msra.gmra.mrb[0].mxu0 %vm925_vm5, %v885_v49 }
 0x1ee   : > { %1642 = vmatprep.mubr.msk.bf16.mxu0 %vm925_vm5, %v886_v55 }
 0x1f5   : > { %1643 = vmatmul.mubr.msk.bf16.gmra.mrb[4].mxu0 %vm925_vm5, %v1114_v9 }
 0x2af   : > { %v1612_v13 = vpop.f32.mrb[0].mxu1 }
 0x2b0   : > { %v972_v14 = vpop.f32.mrb[1].mxu1 }
 0x2b1   : > { %v1613_v42 = vpop.f32.mrb[2].mxu1 }
 0x2b2   : > { %v975_v15 = vpop.f32.mrb[3].mxu1 }
 0x2bc   : > { %v1616_v18 = vpop.f32.mrb[4].mxu1 }
 0x2bd   : > { %v988_v31 = vpop.f32.mrb[5].mxu1 }
 0x2be   : > { %v1617_v19 = vpop.f32.mrb[6].mxu1 }
 0x2bf   : > { %v991_v21 = vpop.f32.mrb[7].mxu1 }
 0x2c0   : > { %v1640_v35 = vpop.f32.mrb[0].mxu0 }
 0x2c1   : > { %v1656_v26 = vadd.f32 %v1640_v35, %v1612_v13  ;;  %v1170_v43 = vpop.f32.mrb[1].mxu0 }
 0x2c2   : > { %v1657_v29 = vadd.f32 %v1170_v43, %v972_v14  ;;  %v1641_v30 = vpop.f32.mrb[2].mxu0 }
 0x2c3   : > { %v1658_v52 = vadd.f32 %v1641_v30, %v1613_v42  ;;  %v1173_v34 = vpop.f32.mrb[3].mxu0  ;;  %v1218_v41 = vadd.f32 %v1656_v26, %v1544_v27 }
 0x2c4   : > { %v1216_v59 = vadd.f32 %v1657_v29, %v1544_v27  ;;  %v1659_v36 = vadd.f32 %v1173_v34, %v975_v15 }
 0x2c5   : > { %v1219_v46 = vadd.f32 %v1658_v52, %v1544_v27 }
 0x2c6   : > { %v1217_v37 = vadd.f32 %v1659_v36, %v1544_v27  ;;  %1232 = vrot.lane.b32.xlu0 %v1216_v59, %s1803_s0 }
 0x2c8   : > { %1234 = vrot.lane.b32.xlu1 %v1217_v37, %s1803_s0  ;;  %v1644_v24 = vpop.f32.mrb[4].mxu0 }
 0x2c9   : > { %v1660_v44 = vadd.f32 %v1644_v24, %v1616_v18  ;;  %v1186_v45 = vpop.f32.mrb[5].mxu0 }
 0x2ca   : > { %v1661_v23 = vadd.f32 %v1186_v45, %v988_v31  ;;  %1236 = vrot.lane.b32.xlu0 %v1218_v41, %s1803_s0  ;;  %v1645_v47 = vpop.f32.mrb[6].mxu0 }
 0x2cb   : > { %v1662_v48 = vadd.f32 %v1645_v47, %v1617_v19  ;;  %v1189_v20 = vpop.f32.mrb[7].mxu0  ;;  %v1222_v57 = vadd.f32 %v1660_v44, %v1544_v27 }
 0x2cc   : > { %v1220_v49 = vadd.f32 %v1661_v23, %v1544_v27  ;;  %v1663_v50 = vadd.f32 %v1189_v20, %v991_v21  ;;  %1238 = vrot.lane.b32.xlu1 %v1219_v46, %s1803_s0 }
 0x2cd   : > { %v1223_v51 = vadd.f32 %v1662_v48, %v1544_v27 }
 0x2ce   : > { %v1221_v32 = vadd.f32 %v1663_v50, %v1544_v27  ;;  %1240 = vrot.lane.b32.xlu0 %v1220_v49, %s1803_s0 }
 0x2d0   : > { %1242 = vrot.lane.b32.xlu1 %v1221_v32, %s1803_s0 }
 0x2d2   : > { %1244 = vrot.lane.b32.xlu0 %v1222_v57, %s1803_s0 }
 0x2d4   : > { %1246 = vrot.lane.b32.xlu1 %v1223_v51, %s1803_s0 }
 0x338   : > { %v1233_v54 = vpop.permute.xlu0 %1232 }
 0x339   : > { %v1256_v53 = vmul.f32 %v1233_v54, %v1216_v59 }
 0x33a   : > { %v1235_v56 = vpop.permute.xlu1 %1234 }
 0x33b   : > { %v1257_v58 = vmul.f32 %v1235_v56, %v1217_v37 }
 0x33c   : > { %v1237_v25 = vpop.permute.xlu0 %1236 }
 0x33d   : > { %v1264_v22 = vpack.c.bf16 %v1257_v58, %v1256_v53  ;;  %v1258_v60 = vmul.f32 %v1237_v25, %v1218_v41 }
 0x33e   : > { %v1239_v28 = vpop.permute.xlu1 %1238 }
 0x33f   : > { %v1259_v61 = vmul.f32 %v1239_v28, %v1219_v46  ;;  %1648 = vmatprep.mubr.msk.bf16.mxu1 %vm511_vm0, %v1264_v22 }
 0x340   : > { %v1241_v62 = vpop.permute.xlu0 %1240 }
 0x341   : > { %v1265_v55 = vpack.c.bf16 %v1259_v61, %v1258_v60  ;;  %v1260_v0 = vmul.f32 %v1241_v62, %v1220_v49 }
 0x342   : > { %v1243_v63 = vpop.permute.xlu1 %1242 }
 0x343   : > { %v1261_v33 = vmul.f32 %v1243_v63, %v1221_v32  ;;  %1649 = vmatmul.mubr.msk.bf16.vlgmr.msra.gmra.mrb[8].mxu1 %vm511_vm0, %v1265_v55 }
 0x344   : > { %v1245_v1 = vpop.permute.xlu0 %1244 }
 0x345   : > { %v1266_v40 = vpack.c.bf16 %v1261_v33, %v1260_v0  ;;  %v1262_v6 = vmul.f32 %v1245_v1, %v1222_v57 }
 0x346   : > { %v1247_v39 = vpop.permute.xlu1 %1246 }
 0x347   : > { %v1263_v7 = vmul.f32 %v1247_v39, %v1223_v51  ;;  %1652 = vmatprep.mubr.msk.bf16.mxu1 %vm511_vm0, %v1266_v40 }
 0x349   : > { %v1267_v38 = vpack.c.bf16 %v1263_v7, %v1262_v6 }
 0x34b   : > { %1653 = vmatmul.mubr.msk.bf16.gmra.mrb[12].mxu1 %vm511_vm0, %v1267_v38 }
 0x416   : > { %v1650_v9 = vpop.f32.mrb[8].mxu1 }
 0x417   : > { %v1338_v10 = vadd.f32 %v1650_v9, %v1545_v8  ;;  %v1329_v13 = vpop.f32.mrb[9].mxu1 }
 0x418   : > { %v1330_v14 = vadd.f32 %v1545_v8, %v1329_v13  ;;  %v1651_v42 = vpop.f32.mrb[10].mxu1 }
 0x419   : > { %v1362_v15 = vadd.f32 %v1882_v3, %v1338_v10  ;;  %v1341_v18 = vadd.f32 %v1651_v42, %v1545_v8  ;;  %v1332_v31 = vpop.f32.mrb[11].mxu1 }
 0x41a   : > { %v1360_v19 = vadd.f32 %v1880_v2, %v1330_v14  ;;  %v1333_v21 = vadd.f32 %v1545_v8, %v1332_v31 }
 0x41b   : > { %v1370_v35 = vpack.c.bf16 %v1362_v15, %v1362_v15  ;;  %v1363_v26 = vadd.f32 %v1886_v5, %v1341_v18 }
 0x41c   : > { %v1368_v3 = vpack.c.bf16 %v1360_v19, %v1360_v19  ;;  %v1361_v27 = vadd.f32 %v1884_v4, %v1333_v21 }
 0x41d   : > { %1379 = vst.msk [vmem:[%s2180_s12 + $0x8] sm:$0xf] %vm1376_vm6, %v1370_v35  ;;  %v1371_v43 = vpack.c.bf16 %v1363_v26, %v1363_v26 }
 0x41e   : > { %1377 = vst.msk [vmem:[%s2180_s12] sm:$0xf] %vm1376_vm6, %v1368_v3  ;;  %v1369_v29 = vpack.c.bf16 %v1361_v27, %v1361_v27  ;;  %v1654_v30 = vpop.f32.mrb[12].mxu1 }
 0x41f   : > { %1380 = vst.msk [vmem:[%s2180_s12 + $0xc] sm:$0xf] %vm1376_vm6, %v1371_v43  ;;  %v1354_v52 = vadd.f32 %v1654_v30, %v1545_v8  ;;  %v1345_v2 = vpop.f32.mrb[13].mxu1 }
 0x420   : > { %1378 = vst.msk [vmem:[%s2180_s12 + $0x4] sm:$0xf] %vm1376_vm6, %v1369_v29  ;;  %v1346_v5 = vadd.f32 %v1545_v8, %v1345_v2  ;;  %v1655_v34 = vpop.f32.mrb[14].mxu1 }
 0x421   : > { %v1366_v4 = vadd.f32 %v1904_v16, %v1354_v52  ;;  %v1357_v59 = vadd.f32 %v1655_v34, %v1545_v8  ;;  %v1348_v36 = vpop.f32.mrb[15].mxu1 }
 0x422   : > { %v1364_v37 = vadd.f32 %v1896_v11, %v1346_v5  ;;  %v1349_v41 = vadd.f32 %v1545_v8, %v1348_v36 }
 0x423   : > { %v1374_v24 = vpack.c.bf16 %v1366_v4, %v1366_v4  ;;  %v1367_v44 = vadd.f32 %v1906_v17, %v1357_v59 }
 0x424   : > { %v1372_v45 = vpack.c.bf16 %v1364_v37, %v1364_v37  ;;  %v1365_v46 = vadd.f32 %v1898_v12, %v1349_v41 }
 0x425   : > { %1383 = vst.msk [vmem:[%s2180_s12 + $0x18] sm:$0xf] %vm1376_vm6, %v1374_v24  ;;  %v1375_v23 = vpack.c.bf16 %v1367_v44, %v1367_v44 }
 0x426   : > { %1381 = vst.msk [vmem:[%s2180_s12 + $0x10] sm:$0xf] %vm1376_vm6, %v1372_v45  ;;  %v1373_v47 = vpack.c.bf16 %v1365_v46, %v1365_v46 }
 0x427   : > { %1384 = vst.msk [vmem:[%s2180_s12 + $0x1c] sm:$0xf] %vm1376_vm6, %v1375_v23 }
 0x428   : > { %1382 = vst.msk [vmem:[%s2180_s12 + $0x14] sm:$0xf] %vm1376_vm6, %v1373_v47 }
 0x429 PF: > { %s19_s30 = sadd.s32 1, %s1798_s30   ;;  %s2224_s28 = smov %s1794_s29 }
 0x42a   : > { %p16_p5 = scmp.ge.s32.totalorder %s19_s30, 4   ;;  %s2225_s29 = smov %s2227_s10 }
 0x42c   :  { %18 = sbr.rel (!%p16_p5) target bundleno = 2 (0x2), region = 92 }

// kernel: rt4ksr_rep_forward.8
= control target key start
LH: loop header
LB: loop body
LE: loop exit
PB: predicated region body
PF: predicated region fallthrough
CT: control target
= control target key end

     0   :  { %s2408_s28 = smov 0   ;;  %s2410_s3 = smov 0   ;;  %s2940_s0 = inlined_call_operand.vmem [shape: bf16[2,8,8,12], index: 0, kind: input, shape index: {}, may-alias: {0,1,2}]   ;;  %s2941_s1 = inlined_call_operand.vmem [shape: bf16[2,8,8,12], index: 1, kind: input, shape index: {}, may-alias: {0,1,2}]   ;;  %s2942_s2 = inlined_call_operand.vmem [shape: bf16[2,8,8,12], index: 2, kind: input, shape index: {}, may-alias: {0,1,2}]   ;;  %s2943_s3 = inlined_call_operand.vmem [shape: f32[1,12], index: 3, kind: input, shape index: {}]   ;;  %s2944_s4 = inlined_call_operand.vmem [shape: f32[1,12], index: 4, kind: input, shape index: {}]   ;;  %s2945_s5 = inlined_call_operand.vmem [shape: bf16[108,16], index: 5, kind: input, shape index: {}]   ;;  %s2946_s6 = inlined_call_operand.vmem [shape: f32[1,16], index: 6, kind: input, shape index: {}]   ;;  %s2947_s7 = inlined_call_operand.vmem [shape: bf16[144,16], index: 7, kind: input, shape index: {}]   ;;  %s2948_s8 = inlined_call_operand.vmem [shape: f32[1,16], index: 8, kind: input, shape index: {}]   ;;  %s2949_s9 = inlined_call_operand.vmem [shape: bf16[2,8,8,16], index: 9, kind: output, shape index: {}]  }
   0x1   :  { %s2412_s4 = smov 0  }
   0x2 LB: > { %s31_s29 = sadd.s32 1, %s2346_s3  ;;  %p1911_p0 = scmp.ge.s32.totalorder %s2350_s4, 1  ;;  %s2350_s4 = sphi %s2412_s4, %s19_s4   ;;  %s2346_s3 = sphi %s2410_s3, %s2951_s3   ;;  %s2342_s28 = sphi %s2408_s28, %s2950_s28  }
   0x3   : > { %p33_p1 = scmp.ge.s32.totalorder %s31_s29, 2  ;;  %p374_p2 = scmp.lt.s32.totalorder %s2350_s4, 3 }
   0x5   : > { %s2953_s29 = smov (%p33_p1, %s31_s29), 0  ;;  %p375_p3 = pnand %p1911_p0, %p374_p2 }
   0x6   : > { %p463_p4 = scmp.lt.s32.totalorder (!%p375_p3), %s2342_s28, 1  ;;  %vm583_vm0 = vcmask (!%p375_p3), 1040384   ;;  %v2352_v0 = vmov (!%p375_p3), 0.0   ;;  %v2431_v2 = vld [vmem:[%s2945_s5 + $0x10] sm:$0xf] (!%p375_p3)  ;;  %v2443_v5 = vld [vmem:[%s2945_s5 + $0x18] sm:$0xff] (!%p375_p3)  }
   0x7   : > { %378 = sbr.rel (%p375_p3) target bundleno = 853 (0x355), region = 56  ;;  %v559_v1 = vrot.slane (!%p375_p3), %v2352_v0, 7  ;;  %2038 = vmatprep.subr.bf16.mxu0 (!%p375_p3), %v2352_v0  ;;  %v538_v3 = vld [vmem:[%s2945_s5 + $0x14] sm:$0xf] (!%p375_p3)  ;;  %2064 = vmatprep.subr.bf16.mxu1 (!%p375_p3), %v2352_v0  ;;  %vm628_vm1 = vcmask (!%p375_p3), 1046528   ;;  %vm689_vm2 = vcmask (!%p375_p3), 1045504  }
   0x8   : > { %v1920_v4 = vcombine.low (!%p375_p3), %v2431_v2, %v538_v3  ;;  %v813_v18 = vrot.slane (!%p375_p3), %v2443_v5, 2  ;;  %s2353_s19 = smov (!%p375_p3), 12   ;;  %s2354_s22 = smov (!%p375_p3), 24   ;;  %vm835_vm3 = vcmask (!%p375_p3), 1041408   ;;  %vm2355_vm4 = vmmov (!%p375_p3), 0  }
   0x9   : > { %v2446_v6 = vsel (!%p375_p3), %vm583_vm0, 0.0, %v559_v1  ;;  %v596_v7 = vsel (!%p375_p3), %vm583_vm0, %v559_v1, 0.0  ;;  %v2298_v1 = vld [vmem:[%s2945_s5] sm:$0xff] (!%p375_p3)   ;;  %2044 = vmatprep.mubr.msk.bf16.mxu0 (!%p375_p3), %vm2355_vm4, %v2352_v0  ;;  %2070 = vmatprep.mubr.msk.bf16.mxu1 (!%p375_p3), %vm2355_vm4, %v2352_v0  ;;  %vm750_vm5 = vcmask (!%p375_p3), 97280   ;;  %vm761_vm6 = vcmask (!%p375_p3), 195584   ;;  %s2356_s21 = smov (!%p375_p3), 16  }
   0xa   : > { %v629_v8 = vrot.slane (!%p375_p3), %v2446_v6, 1  ;;  %v630_v9 = vrot.slane (!%p375_p3), %v596_v7, 1  ;;  %v691_v10 = vrot.slane (!%p375_p3), %v596_v7, 2  ;;  %v690_v11 = vrot.slane (!%p375_p3), %v2446_v6, 2  ;;  %2065 = vmatpush3.bf16.msra.mxu1 (!%p375_p3), %v2298_v1 }
   0xb   : > { %v2463_v17 = vrot.slane (!%p375_p3), %v1920_v4, 2  ;;  %2066 = vmatprep.subr.bf16.mxu1 (!%p375_p3), %v2352_v0  ;;  %v1930_v1 = vcombine.low (!%p375_p3), %v2431_v2, %v2431_v2  ;;  %vm819_vm7 = vcmask (!%p375_p3), 293888   ;;  %vm1336_vm8 = vcmask (!%p375_p3), 130048  }
   0xc   : > { %v2458_v14 = vsel (!%p375_p3), %vm628_vm1, %v629_v8, %v630_v9  ;;  %v2461_v15 = vsel (!%p375_p3), %vm689_vm2, %v690_v11, %v691_v10  ;;  %vm1345_vm9 = vcmask (!%p375_p3), 261120   ;;  %vm1396_vm10 = vcmask (!%p375_p3), 392192  }
   0xd   : > { %v941_v5 = vsel (!%p375_p3), %vm835_vm3, %v1930_v1, 0  ;;  %vm1775_vm11 = vcmask (!%p375_p3), 125952  }
   0xe   : > { %s2955_s28 = smov (!%p463_p4, %s2342_s28), 1 }
   0xf   : > { %s1970_s15 = sshll.u32 %s2955_s28, 5 }
  0x10   : > { %s470_s18 = scalar_lea.vmem %s2941_s1, %s1970_s15 }
  0x11   : > { %v1975_v12 = vld [vmem:[%s470_s18] sm:$0xff]   ;;  %v1990_v13 = vld [vmem:[%s470_s18 + $0x8] sm:$0xff]   ;;  %v1991_v16 = vld [vmem:[%s470_s18 + $0x10] sm:$0xff]  }
  0x12   : > { %v1977_v19 = vunpack.c.h.bf16 %v1975_v12  ;;  %v1980_v20 = vunpack.c.l.bf16 %v1990_v13  ;;  %v1981_v21 = vunpack.c.h.bf16 %v1990_v13  ;;  %v1976_v22 = vunpack.c.l.bf16 %v1975_v12  ;;  %v1992_v23 = vld [vmem:[%s470_s18 + $0x18] sm:$0xff]  }
  0x13   : > { %v1984_v24 = vunpack.c.l.bf16 %v1991_v16  ;;  %v1985_v25 = vunpack.c.h.bf16 %v1991_v16  ;;  %v1988_v26 = vunpack.c.l.bf16 %v1992_v23  ;;  %v1989_v27 = vunpack.c.h.bf16 %v1992_v23 }
  0x14   : > { %v562_v28 = vrot.slane %v1977_v19, 7  ;;  %v563_v29 = vrot.slane %v1980_v20, 7  ;;  %v561_v30 = vrot.slane %v1976_v22, 7  ;;  %v564_v31 = vrot.slane %v1981_v21, 7 }
  0x15   : > { %v565_v32 = vrot.slane %v1984_v24, 7  ;;  %v566_v33 = vrot.slane %v1985_v25, 7  ;;  %v567_v34 = vrot.slane %v1988_v26, 7  ;;  %v2466_v35 = vrot.slane %v1989_v27, 7  ;;  %v2299_v25 = vld [vmem:[%s2945_s5 + $0x8] sm:$0xff]  }
  0x16   : > { %v2469_v36 = vsel %vm583_vm0, 0.0, %v562_v28  ;;  %v2472_v37 = vsel %vm583_vm0, 0.0, %v563_v29  ;;  %v599_v38 = vsel %vm583_vm0, %v562_v28, 0.0  ;;  %v600_v39 = vsel %vm583_vm0, %v563_v29, 0.0  ;;  %2067 = vmatpush3.bf16.msra.mxu1 %v2299_v25 }
  0x17   : > { %v638_v40 = vrot.slane %v2469_v36, 1  ;;  %v639_v41 = vrot.slane %v599_v38, 1  ;;  %v641_v42 = vrot.slane %v2472_v37, 1  ;;  %v642_v43 = vrot.slane %v600_v39, 1  ;;  %2068 = vmatprep.subr.bf16.mxu1 %v2352_v0 }
  0x18   : > { %v700_v44 = vrot.slane %v599_v38, 2  ;;  %v703_v45 = vrot.slane %v600_v39, 2  ;;  %v2479_v46 = vsel %vm583_vm0, 0.0, %v561_v30  ;;  %v598_v47 = vsel %vm583_vm0, %v561_v30, 0.0  ;;  %v2296_v30 = vld [vmem:[%s2945_s5 + $0x20] ss:$0 sps:$4 sm:$0xff]  }
  0x19   : > { %v640_v48 = vsel %vm628_vm1, %v638_v40, %v639_v41  ;;  %v643_v49 = vsel %vm628_vm1, %v641_v42, %v642_v43  ;;  %v635_v50 = vrot.slane %v2479_v46, 1  ;;  %v636_v51 = vrot.slane %v598_v47, 1 }
  0x1a   : > { %v2214_v52 = vpack.i.bf16 %v643_v49, %v640_v48  ;;  %v697_v53 = vrot.slane %v598_v47, 2  ;;  %v699_v54 = vrot.slane %v2469_v36, 2  ;;  %v702_v55 = vrot.slane %v2472_v37, 2  ;;  %2069 = vmatpush3.bf16.msra.mxu1 %v941_v5 }
  0x1b   : > { %v637_v56 = vsel %vm628_vm1, %v635_v50, %v636_v51  ;;  %v696_v57 = vrot.slane %v2479_v46, 2  ;;  %v2490_v58 = vsel %vm583_vm0, 0.0, %v564_v31  ;;  %v2493_v59 = vsel %vm583_vm0, 0.0, %v565_v32 }
  0x1c   : > { %2215 = vrot.lane.b32.xlu1 %v2214_v52, %s2353_s19  ;;  %v2204_v60 = vpack.i.bf16 %v637_v56, %v2458_v14  ;;  %v701_v61 = vsel %vm689_vm2, %v699_v54, %v700_v44  ;;  %v704_v62 = vsel %vm689_vm2, %v702_v55, %v703_v45  ;;  %v601_v63 = vsel %vm583_vm0, %v564_v31, 0.0 }
  0x1d   : > { %v2219_v3 = vpack.i.bf16 %v704_v62, %v701_v61  ;;  %v698_v4 = vsel %vm689_vm2, %v696_v57, %v697_v53  ;;  %v602_v7 = vsel %vm583_vm0, %v565_v32, 0.0  ;;  %v644_v8 = vrot.slane %v2490_v58, 1 }
  0x1e   : > { %2205 = vrot.lane.b32.xlu0 %v2204_v60, %s2353_s19  ;;  %v2209_v9 = vpack.i.bf16 %v698_v4, %v2461_v15  ;;  %v645_v10 = vrot.slane %v601_v63, 1  ;;  %v647_v11 = vrot.slane %v2493_v59, 1  ;;  %v648_v12 = vrot.slane %v602_v7, 1 }
  0x1f   : > { %v705_v13 = vrot.slane %v2490_v58, 2  ;;  %v706_v16 = vrot.slane %v601_v63, 2  ;;  %v708_v19 = vrot.slane %v2493_v59, 2  ;;  %v709_v20 = vrot.slane %v602_v7, 2 }
  0x20   : > { %2220 = vrot.lane.b32.xlu1 %v2219_v3, %s2354_s22  ;;  %v646_v21 = vsel %vm628_vm1, %v644_v8, %v645_v10  ;;  %v649_v22 = vsel %vm628_vm1, %v647_v11, %v648_v12  ;;  %v2516_v23 = vsel %vm583_vm0, 0.0, %v566_v33  ;;  %v2519_v24 = vsel %vm583_vm0, 0.0, %v567_v34 }
  0x21   : > { %v2224_v26 = vpack.i.bf16 %v649_v22, %v646_v21  ;;  %v707_v27 = vsel %vm689_vm2, %v705_v13, %v706_v16  ;;  %v710_v28 = vsel %vm689_vm2, %v708_v19, %v709_v20  ;;  %v603_v29 = vsel %vm583_vm0, %v566_v33, 0.0  ;;  %v2297_v22 = vld [vmem:[%s2945_s5 + $0x24] sm:$0xff]  }
  0x22   : > { %2210 = vrot.lane.b32.xlu0 %v2209_v9, %s2354_s22  ;;  %v2229_v31 = vpack.i.bf16 %v710_v28, %v707_v27  ;;  %v604_v32 = vsel %vm583_vm0, %v567_v34, 0.0  ;;  %v650_v38 = vrot.slane %v2516_v23, 1  ;;  %v651_v39 = vrot.slane %v603_v29, 1 }
  0x23   : > { %v653_v40 = vrot.slane %v2519_v24, 1  ;;  %v654_v41 = vrot.slane %v604_v32, 1  ;;  %v711_v42 = vrot.slane %v2516_v23, 2  ;;  %v712_v43 = vrot.slane %v603_v29, 2 }
  0x24   : > { %2230 = vrot.lane.b32.xlu1 %v2229_v31, %s2354_s22  ;;  %v652_v33 = vsel %vm628_vm1, %v650_v38, %v651_v39  ;;  %v714_v44 = vrot.slane %v2519_v24, 2  ;;  %v715_v45 = vrot.slane %v604_v32, 2  ;;  %v2541_v34 = vsel %vm583_vm0, 0.0, %v2466_v35  ;;  %v2301_v31 = vld [vmem:[%s2945_s5 + $0x2c] sm:$0xff]  }
  0x25   : > { %v655_v47 = vsel %vm628_vm1, %v653_v40, %v654_v41  ;;  %v713_v48 = vsel %vm689_vm2, %v711_v42, %v712_v43  ;;  %v605_v49 = vsel %vm583_vm0, %v2466_v35, 0.0  ;;  %v656_v50 = vrot.slane %v2541_v34, 1 }
  0x26   : > { %2225 = vrot.lane.b32.xlu0 %v2224_v26, %s2353_s19  ;;  %v2234_v51 = vpack.i.bf16 %v655_v47, %v652_v33  ;;  %v716_v52 = vsel %vm689_vm2, %v714_v44, %v715_v45  ;;  %v657_v53 = vrot.slane %v605_v49, 1  ;;  %v717_v54 = vrot.slane %v2541_v34, 2 }
  0x27   : > { %v2239_v55 = vpack.i.bf16 %v716_v52, %v713_v48  ;;  %v718_v56 = vrot.slane %v605_v49, 2  ;;  %v814_v57 = vsel %vm689_vm2, %v2463_v17, %v813_v18  ;;  %v815_v60 = vrot.slane %v2296_v30, 2 }
  0x28   : > { %v658_v35 = vsel %vm628_vm1, %v656_v50, %v657_v53  ;;  %2039 = vmatpush3.bf16.msra.mxu0 %v814_v57 }
  0x29   : > { %2240 = vrot.lane.b32.xlu1 %v2239_v55, %s2354_s22  ;;  %v719_v61 = vsel %vm689_vm2, %v717_v54, %v718_v56  ;;  %2040 = vmatprep.subr.bf16.mxu0 %v2352_v0  ;;  %v816_v62 = vsel %vm689_vm2, %v813_v18, %v815_v60  ;;  %v2244_v63 = vpack.i.bf16 %v2458_v14, %v658_v35  ;;  %v837_v18 = vsel %vm835_vm3, %v815_v60, 0 }
  0x2a   : > { %2235 = vrot.lane.b32.xlu0 %v2234_v51, %s2353_s19  ;;  %v2249_v17 = vpack.i.bf16 %v2461_v15, %v719_v61 }
  0x2c   : > { %2041 = vmatpush3.bf16.msra.mxu0 %v816_v62 }
  0x2d   : > { %2250 = vrot.lane.b32.xlu1 %v2249_v17, %s2354_s22  ;;  %2042 = vmatprep.subr.bf16.mxu0 %v2352_v0 }
  0x2e   : > { %2245 = vrot.lane.b32.xlu0 %v2244_v63, %s2353_s19 }
  0x30   : > { %2043 = vmatpush3.bf16.msra.mxu0 %v837_v18 }
  0x31   : > { %720 = vrot.lane.b32.xlu1 %v2461_v15, %s2354_s22  ;;  %2090 = vmatprep.subr.bf16.mxu0 %v2352_v0 }
  0x32   : > { %659 = vrot.lane.b32.xlu0 %v2458_v14, %s2353_s19 }
  0x35   : > { %1027 = vrot.lane.b32.xlu1 %v2461_v15, %s2354_s22  ;;  %s2357_s22 = smov 32  }
  0x36   : > { %1021 = vrot.lane.b32.xlu0 %v2458_v14, %s2353_s19  ;;  %s2906_s19 = scalar_lea.vmem %s2949_s9, %s1970_s15 }
  0x8e   : > { %v2216_v2 = vpop.permute.xlu1 %2215 }
  0x8f   : > { %v2218_v12 = vunpack.i.h.bf16 %v2216_v2  ;;  %v2217_v25 = vunpack.i.l.bf16 %v2216_v2 }
  0x90   : > { %v2206_v3 = vpop.permute.xlu0 %2205 }
  0x91   : > { %v2208_v4 = vunpack.i.h.bf16 %v2206_v3  ;;  %v2207_v7 = vunpack.i.l.bf16 %v2206_v3  ;;  %v754_v32 = vsel %vm750_vm5, %v2469_v36, %v2217_v25 }
  0x92   : > { %v2221_v8 = vpop.permute.xlu1 %2220 }
  0x93   : > { %v753_v13 = vsel %vm750_vm5, %v2479_v46, %v2208_v4  ;;  %v752_v16 = vsel %vm750_vm5, %v2446_v6, %v2207_v7  ;;  %v2223_v28 = vunpack.i.h.bf16 %v2221_v8  ;;  %v755_v46 = vsel %vm750_vm5, %v2472_v37, %v2218_v12  ;;  %v2302_v37 = vld [vmem:[%s2945_s5 + $0x34] ss:$0 sps:$4 sm:$0x33]  }
  0x94   : > { %v2211_v9 = vpop.permute.xlu0 %2210  ;;  %v2222_v29 = vunpack.i.l.bf16 %v2221_v8  ;;  %v1052_v47 = vsel %vm835_vm3, %v2302_v37, 0 }
  0x95   : > { %v2213_v10 = vunpack.i.h.bf16 %v2211_v9  ;;  %v2212_v11 = vunpack.i.l.bf16 %v2211_v9  ;;  %v766_v40 = vsel %vm761_vm6, %v755_v46, %v2223_v28 }
  0x96   : > { %v2231_v19 = vpop.permute.xlu1 %2230  ;;  %v765_v42 = vsel %vm761_vm6, %v754_v32, %v2222_v29 }
  0x97   : > { %v763_v20 = vsel %vm761_vm6, %v752_v16, %v2212_v11  ;;  %v764_v21 = vsel %vm761_vm6, %v753_v13, %v2213_v10  ;;  %v2233_v43 = vunpack.i.h.bf16 %v2231_v19  ;;  %v794_v44 = vpack.c.bf16 %v766_v40, %v765_v42 }
  0x98   : > { %v793_v26 = vpack.c.bf16 %v764_v21, %v763_v20  ;;  %v2226_v27 = vpop.permute.xlu0 %2225  ;;  %v2232_v48 = vunpack.i.l.bf16 %v2231_v19  ;;  %v773_v7 = vpack.c.bf16 %v765_v42, %v764_v21  ;;  %v2303_v21 = vld [vmem:[%s2947_s7 + $0x18] sm:$0xff]  }
  0x99   : > { %v2228_v38 = vunpack.i.h.bf16 %v2226_v27  ;;  %v2227_v41 = vunpack.i.l.bf16 %v2226_v27  ;;  %2116 = vmatprep.subr.bf16.mxu1 %v2303_v21 }
  0x9a   : > { %2045 = vmatmul.mubr.msk.bf16.vlgmr.msra.gmra.mrb[0].mxu0 %vm819_vm7, %v793_v26 }
  0x9b   : > { %2091 = vmatpush3.bf16.msra.mxu0 %v2297_v22  ;;  %v2241_v30 = vpop.permute.xlu1 %2240  ;;  %2048 = vmatprep.mubr.msk.bf16.mxu0 %vm2355_vm4, %v2352_v0  ;;  %v757_v36 = vsel %vm750_vm5, %v2493_v59, %v2228_v38  ;;  %v756_v49 = vsel %vm750_vm5, %v2490_v58, %v2227_v41  ;;  %v2304_v22 = vld [vmem:[%s2947_s7 + $0x20] sm:$0xff]  }
  0x9c   : > { %v2236_v39 = vpop.permute.xlu0 %2235  ;;  %2092 = vmatprep.subr.bf16.mxu0 %v2352_v0  ;;  %v768_v50 = vsel %vm761_vm6, %v757_v36, %v2233_v43  ;;  %v767_v53 = vsel %vm761_vm6, %v756_v49, %v2232_v48  ;;  %v2243_v57 = vunpack.i.h.bf16 %v2241_v30  ;;  %v2242_v63 = vunpack.i.l.bf16 %v2241_v30 }
  0x9d   : > { %v2238_v52 = vunpack.i.h.bf16 %v2236_v39  ;;  %v795_v55 = vpack.c.bf16 %v768_v50, %v767_v53  ;;  %v2237_v56 = vunpack.i.l.bf16 %v2236_v39  ;;  %v774_v16 = vpack.c.bf16 %v767_v53, %v766_v40 }
  0x9f   : > { %v2251_v33 = vpop.permute.xlu1 %2250  ;;  %2093 = vmatpush3.bf16.msra.mxu0 %v2301_v31  ;;  %v759_v61 = vsel %vm750_vm5, %v2519_v24, %v2238_v52  ;;  %v758_v1 = vsel %vm750_vm5, %v2516_v23, %v2237_v56 }
  0xa0   : > { %v2246_v45 = vpop.permute.xlu0 %2245  ;;  %2094 = vmatprep.subr.bf16.mxu0 %v2352_v0  ;;  %v770_v18 = vsel %vm761_vm6, %v759_v61, %v2243_v57  ;;  %v769_v2 = vsel %vm761_vm6, %v758_v1, %v2242_v63  ;;  %v2253_v8 = vunpack.i.h.bf16 %v2251_v33  ;;  %v2252_v9 = vunpack.i.l.bf16 %v2251_v33 }
  0xa1   : > { %v2248_v24 = vunpack.i.h.bf16 %v2246_v45  ;;  %v796_v3 = vpack.c.bf16 %v770_v18, %v769_v2  ;;  %v2247_v4 = vunpack.i.l.bf16 %v2246_v45 }
  0xa2   : > { %2049 = vmatmul.mubr.msk.bf16.gmra.mrb[4].mxu0 %vm819_vm7, %v794_v44 }
  0xa3   : > { %v721_v51 = vpop.permute.xlu1 %720  ;;  %2052 = vmatprep.mubr.msk.bf16.mxu0 %vm2355_vm4, %v2352_v0  ;;  %2095 = vmatpush3.bf16.msra.mxu0 %v1052_v47  ;;  %v791_v23 = vsel %vm750_vm5, %v2446_v6, %v2248_v24  ;;  %v760_v10 = vsel %vm750_vm5, %v2541_v34, %v2247_v4  ;;  %v775_v34 = vpack.c.bf16 %v769_v2, %v768_v50  ;;  %v2687_v4 = vld [vmem:[%s2946_s6] ss:$0 sm:$0xff] }
  0xa4   : > { %v660_v59 = vpop.permute.xlu0 %659  ;;  %v792_v11 = vsel %vm761_vm6, %v791_v23, %v2253_v8  ;;  %v771_v12 = vsel %vm761_vm6, %v760_v10, %v2252_v9 }
  0xa5   : > { %v751_v54 = vsel %vm750_vm5, %v2446_v6, %v660_v59  ;;  %v797_v13 = vpack.c.bf16 %v792_v11, %v771_v12  ;;  %v776_v19 = vpack.c.bf16 %v771_v12, %v770_v18 }
  0xa6   : > { %v762_v58 = vsel %vm761_vm6, %v751_v54, %v721_v51 }
  0xa7   : > { %v772_v60 = vpack.c.bf16 %v763_v20, %v762_v58  ;;  %v1028_v35 = vpop.permute.xlu1 %1027 }
  0xa8   : > { %v1022_v62 = vpop.permute.xlu0 %1021 }
  0xa9   : > { %2071 = vmatmul.mubr.msk.bf16.vlgmr.msra.gmra.mrb[0].mxu1 %vm819_vm7, %v772_v60  ;;  %v1030_v17 = vsel %vm750_vm5, %v2446_v6, %v1022_v62 }
  0xaa   : > { %2053 = vmatmul.mubr.msk.bf16.gmra.mrb[8].mxu0 %vm819_vm7, %v795_v55  ;;  %2074 = vmatprep.mubr.msk.bf16.mxu1 %vm2355_vm4, %v2352_v0  ;;  %v1031_v5 = vsel %vm761_vm6, %v1030_v17, %v1028_v35 }
  0xab   : > { %2056 = vmatprep.mubr.msk.bf16.mxu0 %vm2355_vm4, %v2352_v0  ;;  %v1032_v20 = vpack.c.bf16 %v1031_v5, %v792_v11  ;;  %2117 = vmatpush3.bf16.msra.mxu1 %v2303_v21 }
  0xac   : > { %2118 = vmatprep.subr.bf16.mxu1 %v2304_v22 }
  0xaf   : > { %2119 = vmatpush3.bf16.msra.mxu1 %v2304_v22 }
  0xb1   : > { %2075 = vmatmul.mubr.msk.bf16.gmra.mrb[4].mxu1 %vm819_vm7, %v773_v7 }
  0xb2   : > { %2057 = vmatmul.mubr.msk.bf16.gmra.mrb[12].mxu0 %vm819_vm7, %v796_v3  ;;  %2078 = vmatprep.mubr.msk.bf16.mxu1 %vm2355_vm4, %v2352_v0 }
  0xb3   : > { %2060 = vmatprep.mubr.msk.bf16.mxu0 %vm2355_vm4, %v2352_v0 }
  0xb9   : > { %2079 = vmatmul.mubr.msk.bf16.gmra.mrb[8].mxu1 %vm819_vm7, %v774_v16 }
  0xba   : > { %2061 = vmatmul.mubr.msk.bf16.gmra.mrb[16].mxu0 %vm819_vm7, %v797_v13  ;;  %2082 = vmatprep.mubr.msk.bf16.mxu1 %vm2355_vm4, %v2352_v0 }
  0xbb   : > { %2096 = vmatprep.mubr.msk.bf16.mxu0 %vm2355_vm4, %v2352_v0 }
  0xc1   : > { %2083 = vmatmul.mubr.msk.bf16.gmra.mrb[12].mxu1 %vm819_vm7, %v775_v34 }
  0xc2   : > { %2097 = vmatmul.mubr.msk.bf16.vlgmr.msra.gmra.mrb[20].mxu0 %vm819_vm7, %v773_v7  ;;  %2086 = vmatprep.mubr.msk.bf16.mxu1 %vm2355_vm4, %v2352_v0 }
  0xc3   : > { %2100 = vmatprep.mubr.msk.bf16.mxu0 %vm2355_vm4, %v2352_v0 }
  0xc9   : > { %2087 = vmatmul.mubr.msk.bf16.gmra.mrb[16].mxu1 %vm819_vm7, %v776_v19 }
  0xca   : > { %2101 = vmatmul.mubr.msk.bf16.gmra.mrb[24].mxu0 %vm819_vm7, %v774_v16 }
  0xcb   : > { %2104 = vmatprep.mubr.msk.bf16.mxu0 %vm2355_vm4, %v2352_v0 }
  0xd2   : > { %2105 = vmatmul.mubr.msk.bf16.gmra.mrb[28].mxu0 %vm819_vm7, %v775_v34 }
  0xd3   : > { %2108 = vmatprep.mubr.msk.bf16.mxu0 %vm2355_vm4, %v2352_v0 }
  0xda   : > { %2109 = vmatmul.mubr.msk.bf16.gmra.mrb[32].mxu0 %vm819_vm7, %v776_v19 }
  0xdb   : > { %2112 = vmatprep.mubr.msk.bf16.mxu0 %vm2355_vm4, %v2352_v0 }
  0xe2   : > { %2113 = vmatmul.mubr.msk.bf16.gmra.mrb[36].mxu0 %vm819_vm7, %v1032_v20 }
 0x16d   : > { %v873_v25 = vpop.f32.mrb[0].mxu0 }
 0x16e   : > { %v2046_v26 = vpop.f32.mrb[1].mxu0 }
 0x16f   : > { %v876_v27 = vpop.f32.mrb[2].mxu0 }
 0x170   : > { %v2047_v28 = vpop.f32.mrb[3].mxu0 }
 0x175   : > { %v881_v0 = vpop.f32.mrb[4].mxu0 }
 0x176   : > { %v2050_v46 = vpop.f32.mrb[5].mxu0 }
 0x177   : > { %v884_v29 = vpop.f32.mrb[6].mxu0 }
 0x178   : > { %v2051_v30 = vpop.f32.mrb[7].mxu0 }
 0x17c   : > { %v977_v31 = vpop.f32.mrb[0].mxu1 }
 0x17d   : > { %v889_v32 = vpop.f32.mrb[8].mxu0  ;;  %v2072_v38 = vpop.f32.mrb[1].mxu1 }
 0x17e   : > { %v2054_v39 = vpop.f32.mrb[9].mxu0  ;;  %v980_v37 = vpop.f32.mrb[2].mxu1 }
 0x17f   : > { %v981_v40 = vadd.f32 %v980_v37, %v876_v27  ;;  %v892_v41 = vpop.f32.mrb[10].mxu0  ;;  %v2073_v42 = vpop.f32.mrb[3].mxu1 }
 0x180   : > { %v2055_v43 = vpop.f32.mrb[11].mxu0 }
 0x184   : > { %v985_v33 = vpop.f32.mrb[4].mxu1 }
 0x185   : > { %v986_v44 = vadd.f32 %v985_v33, %v881_v0  ;;  %v897_v36 = vpop.f32.mrb[12].mxu0  ;;  %v2076_v45 = vpop.f32.mrb[5].mxu1 }
 0x186   : > { %v2058_v47 = vpop.f32.mrb[13].mxu0  ;;  %v988_v48 = vpop.f32.mrb[6].mxu1 }
 0x187   : > { %v989_v49 = vadd.f32 %v988_v48, %v884_v29  ;;  %v900_v50 = vpop.f32.mrb[14].mxu0  ;;  %v2077_v51 = vpop.f32.mrb[7].mxu1 }
 0x188   : > { %v2059_v52 = vpop.f32.mrb[15].mxu0 }
 0x18c   : > { %v993_v59 = vpop.f32.mrb[8].mxu1 }
 0x18d   : > { %v994_v53 = vadd.f32 %v993_v59, %v889_v32  ;;  %v905_v54 = vpop.f32.mrb[16].mxu0  ;;  %v2080_v55 = vpop.f32.mrb[9].mxu1 }
 0x18e   : > { %v2062_v56 = vpop.f32.mrb[17].mxu0  ;;  %v996_v58 = vpop.f32.mrb[10].mxu1 }
 0x18f   : > { %v997_v57 = vadd.f32 %v996_v58, %v892_v41  ;;  %v908_v60 = vpop.f32.mrb[18].mxu0  ;;  %v2081_v35 = vpop.f32.mrb[11].mxu1 }
 0x190   : > { %v2063_v61 = vpop.f32.mrb[19].mxu0 }
 0x194   : > { %v1001_v62 = vpop.f32.mrb[12].mxu1 }
 0x195   : > { %v2680_v63 = vadd.f32 %v1001_v62, %v897_v36  ;;  %v2084_v17 = vpop.f32.mrb[13].mxu1  ;;  %v1088_v1 = vpop.f32.mrb[20].mxu0 }
 0x196   : > { %v1004_v5 = vpop.f32.mrb[14].mxu1  ;;  %v2098_v18 = vpop.f32.mrb[21].mxu0 }
 0x197   : > { %v2682_v24 = vadd.f32 %v1004_v5, %v900_v50  ;;  %v2085_v2 = vpop.f32.mrb[15].mxu1  ;;  %v1091_v3 = vpop.f32.mrb[22].mxu0 }
 0x198   : > { %v1128_v7 = vadd.f32 %v1091_v3, %v981_v40  ;;  %v2099_v8 = vpop.f32.mrb[23].mxu0 }
 0x19a   : > { %v1145_v23 = vadd.f32 %v2687_v4, %v1128_v7 }
 0x19c   : > { %v1185_v9 = vrot.slane %v1145_v23, 7  ;;  %v1009_v10 = vpop.f32.mrb[16].mxu1 }
 0x19d   : > { %v2690_v11 = vadd.f32 %v1009_v10, %v905_v54  ;;  %v2088_v12 = vpop.f32.mrb[17].mxu1  ;;  %v1096_v13 = vpop.f32.mrb[24].mxu0 }
 0x19e   : > { %v1129_v16 = vadd.f32 %v1096_v13, %v986_v44  ;;  %v1012_v34 = vpop.f32.mrb[18].mxu1  ;;  %v2102_v19 = vpop.f32.mrb[25].mxu0  ;;  %v2693_v22 = vsel %vm583_vm0, 0.0, %v1185_v9  ;;  %v1215_v25 = vsel %vm583_vm0, %v1185_v9, 0.0 }
 0x19f   : > { %v2089_v20 = vpop.f32.mrb[19].mxu1  ;;  %v1099_v21 = vpop.f32.mrb[26].mxu0  ;;  %v1243_v29 = vrot.slane %v2693_v22, 1  ;;  %v1244_v30 = vrot.slane %v1215_v25, 1  ;;  %v1291_v31 = vrot.slane %v2693_v22, 2  ;;  %v1292_v32 = vrot.slane %v1215_v25, 2 }
 0x1a0   : > { %v1146_v26 = vadd.f32 %v2687_v4, %v1129_v16  ;;  %v1130_v27 = vadd.f32 %v1099_v21, %v989_v49  ;;  %v2103_v28 = vpop.f32.mrb[27].mxu0 }
 0x1a1   : > { %v1245_v49 = vsel %vm628_vm1, %v1243_v29, %v1244_v30  ;;  %v1293_v50 = vsel %vm689_vm2, %v1291_v31, %v1292_v32 }
 0x1a2   : > { %v1186_v0 = vrot.slane %v1146_v26, 7  ;;  %v1147_v46 = vadd.f32 %v2687_v4, %v1130_v27 }
 0x1a4   : > { %v2701_v38 = vsel %vm583_vm0, 0.0, %v1186_v0  ;;  %v1216_v39 = vsel %vm583_vm0, %v1186_v0, 0.0  ;;  %v1187_v37 = vrot.slane %v1147_v46, 7 }
 0x1a5   : > { %v1246_v40 = vrot.slane %v2701_v38, 1  ;;  %v1247_v41 = vrot.slane %v1216_v39, 1  ;;  %v1294_v42 = vrot.slane %v2701_v38, 2  ;;  %v1295_v43 = vrot.slane %v1216_v39, 2  ;;  %v1104_v33 = vpop.f32.mrb[28].mxu0 }
 0x1a6   : > { %v1131_v44 = vadd.f32 %v1104_v33, %v994_v53  ;;  %v2106_v36 = vpop.f32.mrb[29].mxu0  ;;  %v2707_v45 = vsel %vm583_vm0, 0.0, %v1187_v37  ;;  %v1217_v47 = vsel %vm583_vm0, %v1187_v37, 0.0  ;;  %v2305_v53 = vld [vmem:[%s2947_s7 + $0x28] sm:$0xff]  }
 0x1a7   : > { %v1107_v48 = vpop.f32.mrb[30].mxu0  ;;  %v1248_v54 = vsel %vm628_vm1, %v1246_v40, %v1247_v41  ;;  %v1296_v55 = vsel %vm689_vm2, %v1294_v42, %v1295_v43  ;;  %2120 = vmatprep.subr.bf16.mxu1 %v2305_v53  ;;  %v1249_v61 = vrot.slane %v2707_v45, 1  ;;  %v1250_v62 = vrot.slane %v1217_v47, 1 }
 0x1a8   : > { %v1148_v51 = vadd.f32 %v2687_v4, %v1131_v44  ;;  %v1132_v52 = vadd.f32 %v1107_v48, %v997_v57  ;;  %v2107_v59 = vpop.f32.mrb[31].mxu0  ;;  %v2254_v56 = vpack.i.bf16 %v1248_v54, %v1245_v49  ;;  %v2259_v58 = vpack.i.bf16 %v1296_v55, %v1293_v50  ;;  %2121 = vmatpush3.bf16.msra.mxu1 %v2305_v53 }
 0x1a9   : > { %v1297_v57 = vrot.slane %v2707_v45, 2  ;;  %v1298_v17 = vrot.slane %v1217_v47, 2  ;;  %v1251_v34 = vsel %vm628_vm1, %v1249_v61, %v1250_v62 }
 0x1aa   : > { %v1188_v60 = vrot.slane %v1148_v51, 7  ;;  %v1149_v35 = vadd.f32 %v2687_v4, %v1132_v52  ;;  %2255 = vrot.lane.b32.xlu0 %v2254_v56, %s2356_s21  ;;  %v2760_v51 = vld [vmem:[%s2947_s7] sm:$0xff]  }
 0x1ab   : > { %v1299_v19 = vsel %vm689_vm2, %v1297_v57, %v1298_v17  ;;  %2130 = vmatprep.subr.bf16.mxu1 %v2760_v51 }
 0x1ac   : > { %v2723_v1 = vsel %vm583_vm0, 0.0, %v1188_v60  ;;  %v1218_v5 = vsel %vm583_vm0, %v1188_v60, 0.0  ;;  %v1189_v18 = vrot.slane %v1149_v35, 7 }
 0x1ad   : > { %v1252_v2 = vrot.slane %v2723_v1, 1  ;;  %v1253_v3 = vrot.slane %v1218_v5, 1  ;;  %v1300_v7 = vrot.slane %v2723_v1, 2  ;;  %v1301_v8 = vrot.slane %v1218_v5, 2  ;;  %v1112_v23 = vpop.f32.mrb[32].mxu0 }
 0x1ae   : > { %v1133_v9 = vadd.f32 %v1112_v23, %v2680_v63  ;;  %v2110_v10 = vpop.f32.mrb[33].mxu0  ;;  %v2730_v12 = vsel %vm583_vm0, 0.0, %v1189_v18  ;;  %v1219_v13 = vsel %vm583_vm0, %v1189_v18, 0.0  ;;  %2260 = vrot.lane.b32.xlu0 %v2259_v58, %s2357_s22 }
 0x1af   : > { %v1115_v16 = vpop.f32.mrb[34].mxu0  ;;  %v1254_v63 = vsel %vm628_vm1, %v1252_v2, %v1253_v3  ;;  %v1302_v26 = vsel %vm689_vm2, %v1300_v7, %v1301_v8  ;;  %v1255_v29 = vrot.slane %v2730_v12, 1  ;;  %v1256_v30 = vrot.slane %v1219_v13, 1 }
 0x1b0   : > { %v1150_v20 = vadd.f32 %v2687_v4, %v1133_v9  ;;  %v1134_v21 = vadd.f32 %v1115_v16, %v2682_v24  ;;  %v2111_v25 = vpop.f32.mrb[35].mxu0  ;;  %v2264_v27 = vpack.i.bf16 %v1254_v63, %v1251_v34  ;;  %v2269_v28 = vpack.i.bf16 %v1302_v26, %v1299_v19 }
 0x1b1   : > { %v1303_v31 = vrot.slane %v2730_v12, 2  ;;  %v1304_v32 = vrot.slane %v1219_v13, 2  ;;  %v1257_v49 = vsel %vm628_vm1, %v1255_v29, %v1256_v30 }
 0x1b2   : > { %v1190_v0 = vrot.slane %v1150_v20, 7  ;;  %v1151_v46 = vadd.f32 %v2687_v4, %v1134_v21  ;;  %2265 = vrot.lane.b32.xlu1 %v2264_v27, %s2356_s21 }
 0x1b3   : > { %v1305_v50 = vsel %vm689_vm2, %v1303_v31, %v1304_v32 }
 0x1b4   : > { %v2745_v24 = vsel %vm583_vm0, 0.0, %v1190_v0  ;;  %v1220_v39 = vsel %vm583_vm0, %v1190_v0, 0.0  ;;  %v1191_v37 = vrot.slane %v1151_v46, 7 }
 0x1b5   : > { %v1258_v40 = vrot.slane %v2745_v24, 1  ;;  %v1259_v41 = vrot.slane %v1220_v39, 1  ;;  %v1306_v42 = vrot.slane %v2745_v24, 2  ;;  %v1307_v43 = vrot.slane %v1220_v39, 2  ;;  %v1120_v33 = vpop.f32.mrb[36].mxu0 }
 0x1b6   : > { %v1135_v44 = vadd.f32 %v1120_v33, %v2690_v11  ;;  %v2114_v36 = vpop.f32.mrb[37].mxu0  ;;  %v2752_v47 = vsel %vm583_vm0, 0.0, %v1191_v37  ;;  %2270 = vrot.lane.b32.xlu1 %v2269_v28, %s2357_s22  ;;  %v1221_v52 = vsel %vm583_vm0, %v1191_v37, 0.0 }
 0x1b7   : > { %v1123_v48 = vpop.f32.mrb[38].mxu0  ;;  %v1260_v54 = vsel %vm628_vm1, %v1258_v40, %v1259_v41  ;;  %v1308_v55 = vsel %vm689_vm2, %v1306_v42, %v1307_v43  ;;  %v1261_v60 = vrot.slane %v2752_v47, 1  ;;  %v1262_v35 = vrot.slane %v1221_v52, 1  ;;  %v2307_v40 = vld [vmem:[%s2947_s7 + $0x8] sm:$0xff]  }
 0x1b8   : > { %v1152_v11 = vadd.f32 %v2687_v4, %v1135_v44  ;;  %v2115_v59 = vpop.f32.mrb[39].mxu0  ;;  %v2274_v53 = vpack.i.bf16 %v1260_v54, %v1257_v49  ;;  %v2279_v56 = vpack.i.bf16 %v1308_v55, %v1305_v50  ;;  %v1309_v61 = vrot.slane %v2752_v47, 2 }
 0x1b9   : > { %v1310_v62 = vrot.slane %v1221_v52, 2  ;;  %v1263_v3 = vsel %vm628_vm1, %v1261_v60, %v1262_v35  ;;  %v2309_v52 = vld [vmem:[%s2947_s7 + $0x30] sm:$0xff]  }
 0x1ba   : > { %v1192_v58 = vrot.slane %v1152_v11, 7  ;;  %2275 = vrot.lane.b32.xlu0 %v2274_v53, %s2356_s21 }
 0x1bb   : > { %v1311_v8 = vsel %vm689_vm2, %v1309_v61, %v1310_v62 }
 0x1bc   : > { %v2771_v4 = vsel %vm583_vm0, 0.0, %v1192_v58  ;;  %v1222_v57 = vsel %vm583_vm0, %v1192_v58, 0.0 }
 0x1bd   : > { %v1360_v17 = vrot.slane %v2771_v4, 1  ;;  %v1361_v5 = vrot.slane %v1222_v57, 1  ;;  %v1366_v18 = vrot.slane %v2771_v4, 2  ;;  %v1367_v2 = vrot.slane %v1222_v57, 2 }
 0x1be   : > { %2280 = vrot.lane.b32.xlu0 %v2279_v56, %s2357_s22 }
 0x1bf   : > { %v1362_v7 = vsel %vm628_vm1, %v1360_v17, %v1361_v5  ;;  %v1368_v23 = vsel %vm689_vm2, %v1366_v18, %v1367_v2  ;;  %v2311_v18 = vld [vmem:[%s2947_s7 + $0x40] sm:$0xff]  }
 0x1c0   : > { %v2284_v9 = vpack.i.bf16 %v1362_v7, %v1263_v3  ;;  %v2289_v10 = vpack.i.bf16 %v1368_v23, %v1311_v8 }
 0x1c2   : > { %2285 = vrot.lane.b32.xlu1 %v2284_v9, %s2356_s21  ;;  %1264 = vrot.lane.b32.xlu0 %v2458_v14, %s2356_s21 }
 0x1c6   : > { %2290 = vrot.lane.b32.xlu1 %v2289_v10, %s2357_s22  ;;  %1574 = vrot.lane.b32.xlu0 %v2458_v14, %s2356_s21  ;;  %v1966_v10 = vld [vmem:[%s2948_s8] ss:$0 sm:$0xff] }
 0x1ca   : > { %1312 = vrot.lane.b32.xlu1 %v2461_v15, %s2357_s22 }
 0x1ce   : > { %1580 = vrot.lane.b32.xlu1 %v2461_v15, %s2357_s22 }
 0x21c   : > { %v2256_v13 = vpop.permute.xlu0 %2255 }
 0x21d   : > { %v2258_v16 = vunpack.i.h.bf16 %v2256_v13  ;;  %v2257_v34 = vunpack.i.l.bf16 %v2256_v13 }
 0x21f   : > { %v1339_v25 = vsel %vm1336_vm8, %v2701_v38, %v2258_v16  ;;  %v1338_v14 = vsel %vm1336_vm8, %v2693_v22, %v2257_v34 }
 0x220   : > { %v2261_v19 = vpop.permute.xlu0 %2260 }
 0x221   : > { %v2263_v20 = vunpack.i.h.bf16 %v2261_v19  ;;  %v2262_v21 = vunpack.i.l.bf16 %v2261_v19 }
 0x223   : > { %v1347_v63 = vsel %vm1345_vm9, %v1338_v14, %v2262_v21  ;;  %v1348_v26 = vsel %vm1345_vm9, %v1339_v25, %v2263_v20 }
 0x224   : > { %v1374_v15 = vpack.c.bf16 %v1348_v26, %v1347_v63  ;;  %v2266_v27 = vpop.permute.xlu1 %2265 }
 0x225   : > { %v2268_v28 = vunpack.i.h.bf16 %v2266_v27  ;;  %v2267_v0 = vunpack.i.l.bf16 %v2266_v27 }
 0x226   : > { %2122 = vmatprep.mubr.msk.bf16.mxu1 %vm1396_vm10, %v1374_v15 }
 0x227   : > { %v1341_v38 = vsel %vm1336_vm8, %v2723_v1, %v2268_v28  ;;  %v1340_v22 = vsel %vm1336_vm8, %v2707_v45, %v2267_v0  ;;  %v2308_v45 = vld [vmem:[%s2947_s7 + $0x10] sm:$0xff]  }
 0x228   : > { %v2271_v46 = vpop.permute.xlu1 %2270 }
 0x229   : > { %v2273_v29 = vunpack.i.h.bf16 %v2271_v46  ;;  %v2272_v30 = vunpack.i.l.bf16 %v2271_v46 }
 0x22b   : > { %v1349_v31 = vsel %vm1345_vm9, %v1340_v22, %v2272_v30  ;;  %v1350_v32 = vsel %vm1345_vm9, %v1341_v38, %v2273_v29 }
 0x22c   : > { %v1375_v39 = vpack.c.bf16 %v1350_v32, %v1349_v31  ;;  %v2276_v37 = vpop.permute.xlu0 %2275 }
 0x22d   : > { %v2278_v41 = vunpack.i.h.bf16 %v2276_v37  ;;  %v2277_v42 = vunpack.i.l.bf16 %v2276_v37 }
 0x22e   : > { %2123 = vmatmul.mubr.msk.bf16.vlgmr.msra.gmra.mrb[20].mxu1 %vm1396_vm10, %v1375_v39 }
 0x22f   : > { %2131 = vmatpush3.bf16.msra.mxu1 %v2760_v51  ;;  %v1343_v44 = vsel %vm1336_vm8, %v2745_v24, %v2278_v41  ;;  %v1342_v36 = vsel %vm1336_vm8, %v2730_v12, %v2277_v42 }
 0x230   : > { %v2281_v1 = vpop.permute.xlu0 %2280  ;;  %2132 = vmatprep.subr.bf16.mxu1 %v2307_v40 }
 0x231   : > { %v2283_v43 = vunpack.i.h.bf16 %v2281_v1  ;;  %v2282_v33 = vunpack.i.l.bf16 %v2281_v1 }
 0x233   : > { %v1351_v48 = vsel %vm1345_vm9, %v1342_v36, %v2282_v33  ;;  %v1352_v49 = vsel %vm1345_vm9, %v1343_v44, %v2283_v43  ;;  %2133 = vmatpush3.bf16.msra.mxu1 %v2307_v40 }
 0x234   : > { %v2286_v50 = vpop.permute.xlu1 %2285  ;;  %v1376_v51 = vpack.c.bf16 %v1352_v49, %v1351_v48  ;;  %2134 = vmatprep.subr.bf16.mxu1 %v2308_v45  ;;  %v1265_v24 = vpop.permute.xlu0 %1264  ;;  %v1356_v5 = vpack.c.bf16 %v1351_v48, %v1350_v32 }
 0x235   : > { %v2288_v11 = vunpack.i.h.bf16 %v2286_v50  ;;  %v2287_v59 = vunpack.i.l.bf16 %v2286_v50  ;;  %v1337_v58 = vsel %vm1336_vm8, %v2446_v6, %v1265_v24 }
 0x236   : > { %2126 = vmatprep.mubr.msk.bf16.mxu1 %vm1396_vm10, %v1376_v51 }
 0x237   : > { %2135 = vmatpush3.bf16.msra.mxu1 %v2308_v45  ;;  %v1372_v53 = vsel %vm1336_vm8, %v2771_v4, %v2288_v11  ;;  %v1344_v56 = vsel %vm1336_vm8, %v2752_v47, %v2287_v59  ;;  %v1355_v4 = vpack.c.bf16 %v1349_v31, %v1348_v26  ;;  %v2310_v47 = vld [vmem:[%s2947_s7 + $0x38] sm:$0xff]  }
 0x238   : > { %v2291_v54 = vpop.permute.xlu1 %2290  ;;  %2144 = vmatprep.subr.bf16.mxu1 %v2309_v52  ;;  %v1575_v3 = vpop.permute.xlu0 %1574 }
 0x239   : > { %v2293_v12 = vunpack.i.h.bf16 %v2291_v54  ;;  %v2292_v55 = vunpack.i.l.bf16 %v2291_v54  ;;  %v1583_v7 = vsel %vm1336_vm8, %v2446_v6, %v1575_v3 }
 0x23b   : > { %v1353_v60 = vsel %vm1345_vm9, %v1344_v56, %v2292_v55  ;;  %v1373_v35 = vsel %vm1345_vm9, %v1372_v53, %v2293_v12 }
 0x23c   : > { %v1377_v61 = vpack.c.bf16 %v1373_v35, %v1353_v60  ;;  %v1313_v62 = vpop.permute.xlu1 %1312  ;;  %v1357_v2 = vpack.c.bf16 %v1353_v60, %v1352_v49 }
 0x23d   : > { %v1346_v57 = vsel %vm1345_vm9, %v1337_v58, %v1313_v62 }
 0x23e   : > { %v1354_v17 = vpack.c.bf16 %v1347_v63, %v1346_v57  ;;  %2127 = vmatmul.mubr.msk.bf16.gmra.mrb[24].mxu1 %vm1396_vm10, %v1377_v61 }
 0x240   : > { %2136 = vmatprep.mubr.msk.bf16.mxu1 %vm1396_vm10, %v1354_v17  ;;  %v1581_v8 = vpop.permute.xlu1 %1580 }
 0x241   : > { %v1584_v23 = vsel %vm1345_vm9, %v1583_v7, %v1581_v8 }
 0x242   : > { %v1585_v9 = vpack.c.bf16 %v1584_v23, %v1373_v35 }
 0x246   : > { %2137 = vmatmul.mubr.msk.bf16.vlgmr.msra.gmra.mrb[20].mxu1 %vm1396_vm10, %v1355_v4 }
 0x247   : > { %2145 = vmatpush3.bf16.msra.mxu1 %v2309_v52  ;;  %2140 = vmatprep.mubr.msk.bf16.mxu1 %vm1396_vm10, %v1356_v5 }
 0x248   : > { %2146 = vmatprep.subr.bf16.mxu1 %v2310_v47 }
 0x24b   : > { %2147 = vmatpush3.bf16.msra.mxu1 %v2310_v47 }
 0x24c   : > { %2148 = vmatprep.subr.bf16.mxu1 %v2311_v18 }
 0x24e   : > { %2141 = vmatmul.mubr.msk.bf16.gmra.mrb[24].mxu1 %vm1396_vm10, %v1357_v2 }
 0x24f   : > { %2150 = vmatprep.mubr.msk.bf16.mxu1 %vm1396_vm10, %v1355_v4  ;;  %2149 = vmatpush3.bf16.msra.mxu1 %v2311_v18 }
 0x256   : > { %2151 = vmatmul.mubr.msk.bf16.vlgmr.msra.gmra.mrb[20].mxu1 %vm1396_vm10, %v1356_v5 }
 0x257   : > { %2154 = vmatprep.mubr.msk.bf16.mxu1 %vm1396_vm10, %v1357_v2 }
 0x25e   : > { %2155 = vmatmul.mubr.msk.bf16.gmra.mrb[24].mxu1 %vm1396_vm10, %v1585_v9 }
 0x329   : > { %v2152_v13 = vpop.f32.mrb[20].mxu1 }
 0x32a   : > { %v2852_v16 = vadd.f32 %v2152_v13, %v1966_v10  ;;  %v1641_v34 = vpop.f32.mrb[21].mxu1 }
 0x32b   : > { %v2854_v19 = vadd.f32 %v1966_v10, %v1641_v34  ;;  %v2153_v6 = vpop.f32.mrb[22].mxu1 }
 0x32c   : > { %v1697_v20 = vmul.f32 %v2852_v16, %v2852_v16  ;;  %v2858_v21 = vadd.f32 %v2153_v6, %v1966_v10  ;;  %v1644_v25 = vpop.f32.mrb[23].mxu1 }
 0x32d   : > { %v1695_v14 = vmul.f32 %v2854_v19, %v2854_v19  ;;  %v2862_v63 = vadd.f32 %v1966_v10, %v1644_v25 }
 0x32e   : > { %v1705_v26 = vmul.f32 %v1697_v20, %v2852_v16  ;;  %v1698_v15 = vmul.f32 %v2858_v21, %v2858_v21 }
 0x32f   : > { %v1703_v27 = vmul.f32 %v1695_v14, %v2854_v19  ;;  %v1696_v28 = vmul.f32 %v2862_v63, %v2862_v63 }
 0x330   : > { %v1713_v0 = vmul.f32 0.044715, %v1705_v26  ;;  %v1706_v46 = vmul.f32 %v1698_v15, %v2858_v21 }
 0x331   : > { %v1711_v29 = vmul.f32 0.044715, %v1703_v27  ;;  %v1704_v30 = vmul.f32 %v1696_v28, %v2862_v63  ;;  %v2156_v38 = vpop.f32.mrb[24].mxu1 }
 0x332   : > { %v1721_v22 = vadd.f32 %v1713_v0, %v2852_v16  ;;  %v1714_v31 = vmul.f32 0.044715, %v1706_v46  ;;  %v2873_v32 = vadd.f32 %v2156_v38, %v1966_v10  ;;  %v1657_v39 = vpop.f32.mrb[25].mxu1 }
 0x333   : > { %v1719_v37 = vadd.f32 %v1711_v29, %v2854_v19  ;;  %v1712_v40 = vmul.f32 0.044715, %v1704_v30  ;;  %v2876_v41 = vadd.f32 %v1966_v10, %v1657_v39  ;;  %v2157_v42 = vpop.f32.mrb[26].mxu1 }
 0x334   : > { %v1729_v1 = vmul.f32 0.7978846, %v1721_v22  ;;  %v1722_v45 = vadd.f32 %v1714_v31, %v2858_v21  ;;  %v1701_v43 = vmul.f32 %v2873_v32, %v2873_v32  ;;  %v2881_v33 = vadd.f32 %v2157_v42, %v1966_v10  ;;  %v1660_v44 = vpop.f32.mrb[27].mxu1 }
 0x335   : > { %v1727_v36 = vmul.f32 0.7978846, %v1719_v37  ;;  %v1720_v48 = vadd.f32 %v1712_v40, %v2862_v63  ;;  %v1699_v49 = vmul.f32 %v2876_v41, %v2876_v41  ;;  %v2886_v50 = vadd.f32 %v1966_v10, %v1660_v44 }
 0x336   : > { %2312 = vtanh.f32 %v1729_v1  ;;  %v1730_v51 = vmul.f32 0.7978846, %v1722_v45  ;;  %v1709_v52 = vmul.f32 %v1701_v43, %v2873_v32  ;;  %v1702_v11 = vmul.f32 %v2881_v33, %v2881_v33 }
 0x337   : > { %2314 = vtanh.f32 %v1727_v36  ;;  %v1728_v59 = vmul.f32 0.7978846, %v1720_v48  ;;  %v1707_v24 = vmul.f32 %v1699_v49, %v2876_v41  ;;  %v1700_v54 = vmul.f32 %v2886_v50, %v2886_v50 }
 0x338   : > { %2316 = vtanh.f32 %v1730_v51  ;;  %v1717_v12 = vmul.f32 0.044715, %v1709_v52  ;;  %v1710_v55 = vmul.f32 %v1702_v11, %v2881_v33 }
 0x339   : > { %2318 = vtanh.f32 %v1728_v59  ;;  %v1715_v53 = vmul.f32 0.044715, %v1707_v24  ;;  %v1708_v56 = vmul.f32 %v1700_v54, %v2886_v50 }
 0x33a   : > { %v1725_v58 = vadd.f32 %v1717_v12, %v2873_v32  ;;  %v1718_v60 = vmul.f32 0.044715, %v1710_v55 }
 0x33b   : > { %v1723_v35 = vadd.f32 %v1715_v53, %v2876_v41  ;;  %v1716_v61 = vmul.f32 0.044715, %v1708_v56 }
 0x33c   : > { %v1733_v62 = vmul.f32 0.7978846, %v1725_v58  ;;  %v1726_v57 = vadd.f32 %v1718_v60, %v2881_v33 }
 0x33d   : > { %v1731_v17 = vmul.f32 0.7978846, %v1723_v35  ;;  %v1724_v4 = vadd.f32 %v1716_v61, %v2886_v50 }
 0x33e   : > { %2320 = vtanh.f32 %v1733_v62  ;;  %v1734_v47 = vmul.f32 0.7978846, %v1726_v57 }
 0x33f   : > { %2322 = vtanh.f32 %v1731_v17  ;;  %v1732_v5 = vmul.f32 0.7978846, %v1724_v4 }
 0x340   : > { %v2313_v18 = vpop.eup %2312  ;;  %2324 = vtanh.f32 %v1734_v47 }
 0x341   : > { %v2315_v2 = vpop.eup %2314  ;;  %v1745_v3 = vadd.f32 1.0, %v2313_v18  ;;  %2326 = vtanh.f32 %v1732_v5 }
 0x342   : > { %v2317_v7 = vpop.eup %2316  ;;  %v1743_v8 = vadd.f32 1.0, %v2315_v2 }
 0x343   : > { %v2319_v23 = vpop.eup %2318  ;;  %v1753_v9 = vmul.f32 0.5, %v1745_v3  ;;  %v1746_v10 = vadd.f32 1.0, %v2317_v7 }
 0x344   : > { %v1751_v13 = vmul.f32 0.5, %v1743_v8  ;;  %v1744_v34 = vadd.f32 1.0, %v2319_v23 }
 0x345   : > { %v1761_v6 = vmul.f32 %v1753_v9, %v2852_v16  ;;  %v1754_v20 = vmul.f32 0.5, %v1746_v10 }
 0x346   : > { %v1759_v25 = vmul.f32 %v1751_v13, %v2854_v19  ;;  %v1752_v14 = vmul.f32 0.5, %v1744_v34 }
 0x347   : > { %v1769_v26 = vpack.c.bf16 %v1761_v6, %v1761_v6  ;;  %v1762_v15 = vmul.f32 %v1754_v20, %v2858_v21 }
 0x348   : > { %v2321_v27 = vpop.eup %2320  ;;  %v1767_v16 = vpack.c.bf16 %v1759_v25, %v1759_v25  ;;  %v1760_v28 = vmul.f32 %v1752_v14, %v2862_v63 }
 0x349   : > { %v2323_v0 = vpop.eup %2322  ;;  %1778 = vst.msk [vmem:[%s2906_s19 + $0x8] sm:$0xf] %vm1775_vm11, %v1769_v26  ;;  %v1770_v46 = vpack.c.bf16 %v1762_v15, %v1762_v15  ;;  %v1749_v29 = vadd.f32 1.0, %v2321_v27 }
 0x34a   : > { %v2325_v30 = vpop.eup %2324  ;;  %1776 = vst.msk [vmem:[%s2906_s19] sm:$0xf] %vm1775_vm11, %v1767_v16  ;;  %v1768_v38 = vpack.c.bf16 %v1760_v28, %v1760_v28  ;;  %v1747_v19 = vadd.f32 1.0, %v2323_v0 }
 0x34b   : > { %v2327_v22 = vpop.eup %2326  ;;  %1779 = vst.msk [vmem:[%s2906_s19 + $0xc] sm:$0xf] %vm1775_vm11, %v1770_v46  ;;  %v1757_v21 = vmul.f32 0.5, %v1749_v29  ;;  %v1750_v31 = vadd.f32 1.0, %v2325_v30 }
 0x34c   : > { %1777 = vst.msk [vmem:[%s2906_s19 + $0x4] sm:$0xf] %vm1775_vm11, %v1768_v38  ;;  %v1755_v63 = vmul.f32 0.5, %v1747_v19  ;;  %v1748_v39 = vadd.f32 1.0, %v2327_v22 }
 0x34d   : > { %v1765_v37 = vmul.f32 %v1757_v21, %v2873_v32  ;;  %v1758_v40 = vmul.f32 0.5, %v1750_v31 }
 0x34e   : > { %v1763_v42 = vmul.f32 %v1755_v63, %v2876_v41  ;;  %v1756_v1 = vmul.f32 0.5, %v1748_v39 }
 0x34f   : > { %v1773_v45 = vpack.c.bf16 %v1765_v37, %v1765_v37  ;;  %v1766_v43 = vmul.f32 %v1758_v40, %v2881_v33 }
 0x350   : > { %v1771_v44 = vpack.c.bf16 %v1763_v42, %v1763_v42  ;;  %v1764_v36 = vmul.f32 %v1756_v1, %v2886_v50 }
 0x351   : > { %1782 = vst.msk [vmem:[%s2906_s19 + $0x18] sm:$0xf] %vm1775_vm11, %v1773_v45  ;;  %v1774_v48 = vpack.c.bf16 %v1766_v43, %v1766_v43 }
 0x352   : > { %1780 = vst.msk [vmem:[%s2906_s19 + $0x10] sm:$0xf] %vm1775_vm11, %v1771_v44  ;;  %v1772_v49 = vpack.c.bf16 %v1764_v36, %v1764_v36 }
 0x353   : > { %1783 = vst.msk [vmem:[%s2906_s19 + $0x1c] sm:$0xf] %vm1775_vm11, %v1774_v48 }
 0x354   : > { %1781 = vst.msk [vmem:[%s2906_s19 + $0x14] sm:$0xf] %vm1775_vm11, %v1772_v49 }
 0x355 PF: > { %s19_s4 = sadd.s32 1, %s2350_s4   ;;  %s2950_s28 = smov %s2346_s3 }
 0x356   : > { %p16_p5 = scmp.ge.s32.totalorder %s19_s4, 4   ;;  %s2951_s3 = smov %s2953_s29 }
 0x358   :  { %18 = sbr.rel (!%p16_p5) target bundleno = 2 (0x2), region = 92 }

// kernel: rt4ksr_rep_forward.11
= control target key start
LH: loop header
LB: loop body
LE: loop exit
PB: predicated region body
PF: predicated region fallthrough
CT: control target
= control target key end

     0   :  { %s2967_s23 = smov 0   ;;  %s2969_s24 = smov 0   ;;  %s3501_s0 = inlined_call_operand.vmem [shape: bf16[2,8,8,16], index: 0, kind: input, shape index: {}, may-alias: {0,1,2}]   ;;  %s3502_s1 = inlined_call_operand.vmem [shape: bf16[2,8,8,16], index: 1, kind: input, shape index: {}, may-alias: {0,1,2}]   ;;  %s3503_s2 = inlined_call_operand.vmem [shape: bf16[2,8,8,16], index: 2, kind: input, shape index: {}, may-alias: {0,1,2}]   ;;  %s3504_s3 = inlined_call_operand.vmem [shape: bf16[2,8,8,16], index: 3, kind: input, shape index: {}, may-alias: {3,4,5}]   ;;  %s3505_s4 = inlined_call_operand.vmem [shape: bf16[2,8,8,16], index: 4, kind: input, shape index: {}, may-alias: {3,4,5}]   ;;  %s3506_s5 = inlined_call_operand.vmem [shape: bf16[2,8,8,16], index: 5, kind: input, shape index: {}, may-alias: {3,4,5}]   ;;  %s3507_s6 = inlined_call_operand.<no memory space> [shape: f32[1,1], index: 6, kind: input, shape index: {}]   ;;  %s3508_s7 = inlined_call_operand.vmem [shape: f32[1,16], index: 7, kind: input, shape index: {}]   ;;  %s3509_s8 = inlined_call_operand.vmem [shape: f32[1,16], index: 8, kind: input, shape index: {}]   ;;  %s3510_s9 = inlined_call_operand.vmem [shape: bf16[144,16], index: 9, kind: input, shape index: {}]   ;;  %s3511_s10 = inlined_call_operand.vmem [shape: f32[1,16], index: 10, kind: input, shape index: {}]   ;;  %s3512_s11 = inlined_call_operand.vmem [shape: bf16[144,48], index: 11, kind: input, shape index: {}]   ;;  %s3513_s12 = inlined_call_operand.vmem [shape: f32[1,48], index: 12, kind: input, shape index: {}]   ;;  %s3514_s13 = inlined_call_operand.vmem [shape: f32[2,8,8,48], index: 13, kind: output, shape index: {}]  }
   0x1   :  { %v18_v0 = vstv %s3507_s6  ;;  %s2971_s25 = smov 0  }
   0x2   :  { %19 = vst [vmem:[#allocation2] sm:$0x1] %v18_v0 }
   0x3 LB: > { %s37_s6 = sadd.s32 1, %s2884_s24  ;;  %p2400_p0 = scmp.ge.s32.totalorder %s2888_s25, 1  ;;  %s2888_s25 = sphi %s2971_s25, %s25_s25   ;;  %s2884_s24 = sphi %s2969_s24, %s3516_s24   ;;  %s2880_s23 = sphi %s2967_s23, %s3515_s23  }
   0x4   : > { %p39_p1 = scmp.ge.s32.totalorder %s37_s6, 2  ;;  %p559_p2 = scmp.lt.s32.totalorder %s2888_s25, 3 }
   0x6   : > { %s3518_s6 = smov (%p39_p1, %s37_s6), 0  ;;  %p560_p3 = pnand %p2400_p0, %p559_p2 }
   0x7   : > { %p677_p4 = scmp.lt.s32.totalorder (!%p560_p3), %s2880_s23, 1  ;;  %vm792_vm0 = vcmask (!%p560_p3), 130048   ;;  %vm1108_vm1 = vcmask (!%p560_p3), 1040384   ;;  %vm1214_vm2 = vcmask (!%p560_p3), 1045504   ;;  %vm1153_vm3 = vcmask (!%p560_p3), 1046528   ;;  %s2893_s27 = smov (!%p560_p3), 16  }
   0x8   : > { %563 = sbr.rel (%p560_p3) target bundleno = 1178 (0x49a), region = 72  ;;  %vm2891_vm4 = vmmov (!%p560_p3), 0   ;;  %vm1285_vm5 = vcmask (!%p560_p3), 261120   ;;  %vm1340_vm6 = vcmask (!%p560_p3), 392192  }
   0x9   : > { %v775_v1 = vld [vmem:[#allocation2] sm:$0x1] (!%p560_p3) }
   0xa   : > { %2712 = vpush (!%p560_p3), %v775_v1 }
   0xf   : > { %s3520_s23 = smov (!%p677_p4, %s2880_s23), 1 }
  0x10   : > { %s2466_s26 = sshll.u32 %s3520_s23, 5  ;;  %s2474_s21 = sshll.u32 %s3520_s23, 6 }
  0x11   : > { %s698_s0 = scalar_lea.vmem %s3502_s1, %s2466_s26  ;;  %s2994_s14 = scalar_lea.vmem %s3505_s4, %s2466_s26 }
  0x12   : > { %v2525_v2 = vld [vmem:[%s698_s0 + $0x8] sm:$0xff]   ;;  %v2484_v3 = vld [vmem:[%s698_s0] sm:$0xff]   ;;  %v2526_v10 = vld [vmem:[%s698_s0 + $0x10] sm:$0xff]   ;;  %s2892_s26 = smov 32   ;;  %s772_s30 = scalar_lea.vmem %s3514_s13, %s2474_s21 }
  0x13   : > { %v2528_v4 = vld [vmem:[%s2994_s14 + $0x8] sm:$0xff]   ;;  %v2500_v5 = vld [vmem:[%s2994_s14] sm:$0xff]   ;;  %v2489_v6 = vunpack.c.l.bf16 %v2525_v2  ;;  %v2485_v7 = vunpack.c.l.bf16 %v2484_v3  ;;  %v2490_v8 = vunpack.c.h.bf16 %v2525_v2  ;;  %v2486_v9 = vunpack.c.h.bf16 %v2484_v3  ;;  %v2529_v17 = vld [vmem:[%s2994_s14 + $0x10] sm:$0xff]  }
  0x14   : > { %v2505_v11 = vunpack.c.l.bf16 %v2528_v4  ;;  %v2501_v12 = vunpack.c.l.bf16 %v2500_v5  ;;  %v2506_v13 = vunpack.c.h.bf16 %v2528_v4  ;;  %v2502_v15 = vunpack.c.h.bf16 %v2500_v5  ;;  %v2527_v23 = vld [vmem:[%s698_s0 + $0x18] sm:$0xff]  }
  0x15   : > { %v2494_v16 = vunpack.c.h.bf16 %v2526_v10  ;;  %v2493_v18 = vunpack.c.l.bf16 %v2526_v10  ;;  %v2510_v26 = vunpack.c.h.bf16 %v2529_v17  ;;  %v2509_v27 = vunpack.c.l.bf16 %v2529_v17  ;;  %v2530_v36 = vld [vmem:[%s2994_s14 + $0x18] sm:$0xff]  }
  0x16   : > { %v2498_v30 = vunpack.c.h.bf16 %v2527_v23  ;;  %v2497_v31 = vunpack.c.l.bf16 %v2527_v23  ;;  %v2514_v38 = vunpack.c.h.bf16 %v2530_v36  ;;  %v2513_v40 = vunpack.c.l.bf16 %v2530_v36 }
  0x3b   : > { %s2713_s2 = spop %2712 }
  0x3c   : > { %v781_v14 = vstv %s2713_s2 }
  0x3d   : > { %v854_v19 = vmul.f32 %v2489_v6, %v781_v14  ;;  %v852_v20 = vmul.f32 %v2485_v7, %v781_v14  ;;  %v855_v21 = vmul.f32 %v2490_v8, %v781_v14  ;;  %v853_v22 = vmul.f32 %v2486_v9, %v781_v14 }
  0x3e   : > { %v857_v28 = vmul.f32 %v2494_v16, %v781_v14  ;;  %v856_v29 = vmul.f32 %v2493_v18, %v781_v14  ;;  %v859_v37 = vmul.f32 %v2498_v30, %v781_v14  ;;  %v858_v39 = vmul.f32 %v2497_v31, %v781_v14 }
  0x3f   : > { %v878_v24 = vadd.f32 %v2505_v11, %v854_v19  ;;  %v876_v25 = vadd.f32 %v2501_v12, %v852_v20  ;;  %v879_v34 = vadd.f32 %v2506_v13, %v855_v21  ;;  %v877_v35 = vadd.f32 %v2502_v15, %v853_v22 }
  0x40   : > { %v881_v43 = vadd.f32 %v2510_v26, %v857_v28  ;;  %v880_v44 = vadd.f32 %v2509_v27, %v856_v29  ;;  %v883_v47 = vadd.f32 %v2514_v38, %v859_v37  ;;  %v882_v48 = vadd.f32 %v2513_v40, %v858_v39  ;;  %v2832_v28 = vld [vmem:[%s3510_s9 + $0x18] sm:$0xff]   ;;  %v2833_v29 = vld [vmem:[%s3510_s9 + $0x20] sm:$0xff]  }
  0x41   : > { %v890_v32 = vsel %vm792_vm0, %v878_v24, 0.0  ;;  %v884_v33 = vsel %vm792_vm0, %v876_v25, 0.0  ;;  %v893_v41 = vsel %vm792_vm0, %v879_v34, 0.0  ;;  %v887_v42 = vsel %vm792_vm0, %v877_v35, 0.0 }
  0x42   : > { %891 = vadd.xlane.f32.xlu1 %v890_v32  ;;  %885 = vadd.xlane.f32.xlu0 %v884_v33  ;;  %v899_v45 = vsel %vm792_vm0, %v881_v43, 0.0  ;;  %v896_v46 = vsel %vm792_vm0, %v880_v44, 0.0  ;;  %v905_v49 = vsel %vm792_vm0, %v883_v47, 0.0  ;;  %v902_v50 = vsel %vm792_vm0, %v882_v48, 0.0 }
  0x43   : > { %v2890_v27 = vmov 0.0  }
  0x44   : > { %2576 = vmatprep.subr.bf16.mxu0 %v2890_v27  ;;  %2602 = vmatprep.subr.bf16.mxu1 %v2890_v27 }
  0x45   : > { %2577 = vmatpush3.bf16.msra.mxu0 %v2832_v28  ;;  %2582 = vmatprep.mubr.msk.bf16.mxu0 %vm2891_vm4, %v2890_v27 }
  0x46   : > { %894 = vadd.xlane.f32.xlu1 %v893_v41  ;;  %888 = vadd.xlane.f32.xlu0 %v887_v42 }
  0x47   : > { %2578 = vmatprep.subr.bf16.mxu0 %v2890_v27  ;;  %2608 = vmatprep.mubr.msk.bf16.mxu1 %vm2891_vm4, %v2890_v27 }
  0x49   : > { %2579 = vmatpush3.bf16.msra.mxu0 %v2833_v29 }
  0x4a   : > { %900 = vadd.xlane.f32.xlu1 %v899_v45  ;;  %897 = vadd.xlane.f32.xlu0 %v896_v46 }
  0x4b   : > { %2580 = vmatprep.subr.bf16.mxu0 %v2890_v27 }
  0x4e   : > { %906 = vadd.xlane.f32.xlu1 %v905_v49  ;;  %903 = vadd.xlane.f32.xlu0 %v902_v50 }
  0xcf   : > { %v892_v51 = vpop.xlane.xlu1 %891  ;;  %v886_v52 = vpop.xlane.xlu0 %885 }
  0xd0   : > { %v910_v53 = vmul.f32 0.0625, %v892_v51  ;;  %v908_v54 = vmul.f32 0.0625, %v886_v52  ;;  %v3062_v51 = vld [vmem:[%s3508_s7] ss:$0 sm:$0xff] }
  0xd2   : > { %v3008_v55 = vsub.f32 %v878_v24, %v910_v53  ;;  %v3010_v56 = vsub.f32 %v876_v25, %v908_v54 }
  0xd3   : > { %v895_v57 = vpop.xlane.xlu1 %894  ;;  %v889_v58 = vpop.xlane.xlu0 %888 }
  0xd4   : > { %v911_v59 = vmul.f32 0.0625, %v895_v57  ;;  %v909_v60 = vmul.f32 0.0625, %v889_v58  ;;  %v924_v61 = vmul.f32 %v3010_v56, %v3010_v56  ;;  %v926_v1 = vmul.f32 %v3008_v55, %v3008_v55 }
  0xd6   : > { %v3014_v62 = vsub.f32 %v879_v34, %v911_v59  ;;  %v3016_v63 = vsub.f32 %v877_v35, %v909_v60  ;;  %v932_v0 = vsel %vm792_vm0, %v924_v61, 0.0  ;;  %v938_v10 = vsel %vm792_vm0, %v926_v1, 0.0  ;;  %v3072_v61 = vld [vmem:[%s3509_s8] ss:$0 sm:$0xff] }
  0xd7   : > { %v901_v2 = vpop.xlane.xlu1 %900  ;;  %933 = vadd.xlane.f32.xlu0 %v932_v0  ;;  %v898_v3 = vpop.xlane.xlu0 %897 }
  0xd8   : > { %v913_v4 = vmul.f32 0.0625, %v901_v2  ;;  %v912_v5 = vmul.f32 0.0625, %v898_v3  ;;  %v925_v6 = vmul.f32 %v3016_v63, %v3016_v63  ;;  %v927_v7 = vmul.f32 %v3014_v62, %v3014_v62 }
  0xda   : > { %v3025_v8 = vsub.f32 %v881_v43, %v913_v4  ;;  %v3027_v9 = vsub.f32 %v880_v44, %v912_v5  ;;  %v935_v11 = vsel %vm792_vm0, %v925_v6, 0.0  ;;  %v941_v17 = vsel %vm792_vm0, %v927_v7, 0.0  ;;  %v2834_v7 = vld [vmem:[%s3510_s9 + $0x28] sm:$0xff]  }
  0xdb   : > { %v907_v12 = vpop.xlane.xlu1 %906  ;;  %939 = vadd.xlane.f32.xlu0 %v938_v10  ;;  %936 = vadd.xlane.f32.xlu1 %v935_v11  ;;  %v904_v13 = vpop.xlane.xlu0 %903 }
  0xdc   : > { %v915_v14 = vmul.f32 0.0625, %v907_v12  ;;  %v914_v15 = vmul.f32 0.0625, %v904_v13  ;;  %v928_v16 = vmul.f32 %v3027_v9, %v3027_v9  ;;  %v929_v21 = vmul.f32 %v3025_v8, %v3025_v8  ;;  %2581 = vmatpush3.bf16.msra.mxu0 %v2834_v7 }
  0xdd   : > { %2628 = vmatprep.subr.bf16.mxu0 %v2890_v27 }
  0xde   : > { %v3034_v18 = vsub.f32 %v883_v47, %v915_v14  ;;  %v3036_v19 = vsub.f32 %v882_v48, %v914_v15  ;;  %v944_v20 = vsel %vm792_vm0, %v928_v16, 0.0  ;;  %v947_v23 = vsel %vm792_vm0, %v929_v21, 0.0 }
  0xdf   : > { %942 = vadd.xlane.f32.xlu1 %v941_v17  ;;  %945 = vadd.xlane.f32.xlu0 %v944_v20  ;;  %v1084_v47 = vrot.slane %v2890_v27, 7 }
  0xe0   : > { %v930_v22 = vmul.f32 %v3036_v19, %v3036_v19  ;;  %v931_v25 = vmul.f32 %v3034_v18, %v3034_v18 }
  0xe1   : > { %v3066_v58 = vsel %vm1108_vm1, 0.0, %v1084_v47  ;;  %v1121_v59 = vsel %vm1108_vm1, %v1084_v47, 0.0 }
  0xe2   : > { %v950_v24 = vsel %vm792_vm0, %v930_v22, 0.0  ;;  %v953_v26 = vsel %vm792_vm0, %v931_v25, 0.0  ;;  %v1216_v3 = vrot.slane %v1121_v59, 2  ;;  %v1154_v13 = vrot.slane %v3066_v58, 1 }
  0xe3   : > { %948 = vadd.xlane.f32.xlu1 %v947_v23  ;;  %951 = vadd.xlane.f32.xlu0 %v950_v24  ;;  %v1155_v14 = vrot.slane %v1121_v59, 1 }
  0xe5   : > { %v3099_v28 = vsel %vm1153_vm3, %v1154_v13, %v1155_v14 }
  0xe7   : > { %954 = vadd.xlane.f32.xlu1 %v953_v26 }
 0x164   : > { %v934_v30 = vpop.xlane.xlu0 %933 }
 0x165   : > { %v956_v31 = vmul.f32 0.0625, %v934_v30 }
 0x167   : > { %v964_v32 = vadd.f32 1e-06, %v956_v31 }
 0x168   : > { %v937_v33 = vpop.xlane.xlu1 %936  ;;  %v940_v34 = vpop.xlane.xlu0 %939 }
 0x169   : > { %2850 = vrsqrt.f32 %v964_v32  ;;  %v957_v35 = vmul.f32 0.0625, %v937_v33  ;;  %v958_v36 = vmul.f32 0.0625, %v940_v34 }
 0x16b   : > { %v965_v37 = vadd.f32 1e-06, %v957_v35  ;;  %v966_v38 = vadd.f32 1e-06, %v958_v36 }
 0x16c   : > { %v943_v39 = vpop.xlane.xlu1 %942  ;;  %v946_v40 = vpop.xlane.xlu0 %945 }
 0x16d   : > { %2852 = vrsqrt.f32 %v965_v37  ;;  %v959_v41 = vmul.f32 0.0625, %v943_v39  ;;  %v960_v42 = vmul.f32 0.0625, %v946_v40 }
 0x16e   : > { %2854 = vrsqrt.f32 %v966_v38 }
 0x16f   : > { %v967_v43 = vadd.f32 1e-06, %v959_v41  ;;  %v968_v44 = vadd.f32 1e-06, %v960_v42 }
 0x170   : > { %v949_v45 = vpop.xlane.xlu1 %948  ;;  %v952_v46 = vpop.xlane.xlu0 %951 }
 0x171   : > { %2856 = vrsqrt.f32 %v967_v43  ;;  %v961_v48 = vmul.f32 0.0625, %v949_v45  ;;  %v962_v49 = vmul.f32 0.0625, %v952_v46 }
 0x172   : > { %2858 = vrsqrt.f32 %v968_v44 }
 0x173   : > { %v2851_v50 = vpop.eup %2850  ;;  %v969_v52 = vadd.f32 1e-06, %v961_v48  ;;  %v970_v53 = vadd.f32 1e-06, %v962_v49 }
 0x174   : > { %v980_v54 = vmul.f32 %v2851_v50, %v3010_v56  ;;  %v955_v57 = vpop.xlane.xlu1 %954  ;;  %v1215_v56 = vrot.slane %v3066_v58, 2 }
 0x175   : > { %2860 = vrsqrt.f32 %v969_v52  ;;  %v963_v60 = vmul.f32 0.0625, %v955_v57 }
 0x176   : > { %v988_v0 = vmul.f32 %v3062_v51, %v980_v54  ;;  %2862 = vrsqrt.f32 %v970_v53  ;;  %v3086_v16 = vsel %vm1214_vm2, %v1215_v56, %v1216_v3 }
 0x177   : > { %v2853_v1 = vpop.eup %2852  ;;  %v971_v2 = vadd.f32 1e-06, %v963_v60 }
 0x178   : > { %v2855_v4 = vpop.eup %2854  ;;  %v981_v5 = vmul.f32 %v2853_v1, %v3016_v63  ;;  %v996_v6 = vadd.f32 %v3072_v61, %v988_v0 }
 0x179   : > { %v982_v10 = vmul.f32 %v2855_v4, %v3008_v55  ;;  %2864 = vrsqrt.f32 %v971_v2 }
 0x17a   : > { %v989_v11 = vmul.f32 %v3062_v51, %v981_v5  ;;  %v1086_v12 = vrot.slane %v996_v6, 7 }
 0x17b   : > { %v2857_v15 = vpop.eup %2856  ;;  %v990_v63 = vmul.f32 %v3062_v51, %v982_v10 }
 0x17c   : > { %v2859_v17 = vpop.eup %2858  ;;  %v983_v55 = vmul.f32 %v2857_v15, %v3014_v62  ;;  %v3091_v20 = vsel %vm1108_vm1, 0.0, %v1086_v12  ;;  %v1123_v21 = vsel %vm1108_vm1, %v1086_v12, 0.0  ;;  %v997_v22 = vadd.f32 %v3072_v61, %v989_v11 }
 0x17d   : > { %v984_v23 = vmul.f32 %v2859_v17, %v3027_v9  ;;  %v1221_v24 = vrot.slane %v3091_v20, 2  ;;  %v1222_v25 = vrot.slane %v1123_v21, 2  ;;  %v1160_v26 = vrot.slane %v3091_v20, 1 }
 0x17e   : > { %v1161_v29 = vrot.slane %v1123_v21, 1  ;;  %v998_v62 = vadd.f32 %v3072_v61, %v990_v63  ;;  %v1087_v30 = vrot.slane %v997_v22, 7  ;;  %v991_v32 = vmul.f32 %v3062_v51, %v983_v55  ;;  %v2836_v21 = vld [vmem:[%s3510_s9] sm:$0xff]  }
 0x17f   : > { %v2861_v31 = vpop.eup %2860  ;;  %v992_v33 = vmul.f32 %v3062_v51, %v984_v23  ;;  %v1223_v34 = vsel %vm1214_vm2, %v1221_v24, %v1222_v25  ;;  %2603 = vmatpush3.bf16.msra.mxu1 %v2836_v21 }
 0x180   : > { %v2863_v9 = vpop.eup %2862  ;;  %v985_v35 = vmul.f32 %v2861_v31, %v3025_v8  ;;  %v2747_v36 = vpack.i.bf16 %v1223_v34, %v3086_v16  ;;  %v1162_v37 = vsel %vm1153_vm3, %v1160_v26, %v1161_v29  ;;  %v1088_v38 = vrot.slane %v998_v62, 7  ;;  %2604 = vmatprep.subr.bf16.mxu1 %v2890_v27 }
 0x181   : > { %v986_v39 = vmul.f32 %v2863_v9, %v3036_v19  ;;  %v2742_v40 = vpack.i.bf16 %v1162_v37, %v3099_v28  ;;  %v3115_v41 = vsel %vm1108_vm1, 0.0, %v1087_v30  ;;  %v1124_v8 = vsel %vm1108_vm1, %v1087_v30, 0.0  ;;  %v2837_v37 = vld [vmem:[%s3510_s9 + $0x8] sm:$0xff]  }
 0x182   : > { %v993_v42 = vmul.f32 %v3062_v51, %v985_v35  ;;  %2748 = vrot.lane.b32.xlu1 %v2747_v36, %s2892_s26  ;;  %v3121_v43 = vsel %vm1108_vm1, 0.0, %v1088_v38  ;;  %v1125_v44 = vsel %vm1108_vm1, %v1088_v38, 0.0  ;;  %v1163_v45 = vrot.slane %v3115_v41, 1 }
 0x183   : > { %v2865_v19 = vpop.eup %2864  ;;  %v994_v46 = vmul.f32 %v3062_v51, %v986_v39  ;;  %2743 = vrot.lane.b32.xlu0 %v2742_v40, %s2893_s27  ;;  %v1164_v47 = vrot.slane %v1124_v8, 1  ;;  %v1166_v48 = vrot.slane %v3121_v43, 1  ;;  %v1167_v49 = vrot.slane %v1125_v44, 1  ;;  %2605 = vmatpush3.bf16.msra.mxu1 %v2837_v37 }
 0x184   : > { %v987_v50 = vmul.f32 %v2865_v19, %v3034_v18  ;;  %v1224_v52 = vrot.slane %v3115_v41, 2  ;;  %v1225_v53 = vrot.slane %v1124_v8, 2  ;;  %v1227_v54 = vrot.slane %v3121_v43, 2  ;;  %2606 = vmatprep.subr.bf16.mxu1 %v2890_v27 }
 0x185   : > { %v1165_v57 = vsel %vm1153_vm3, %v1163_v45, %v1164_v47  ;;  %v1168_v59 = vsel %vm1153_vm3, %v1166_v48, %v1167_v49  ;;  %v1228_v60 = vrot.slane %v1125_v44, 2  ;;  %v999_v0 = vadd.f32 %v3072_v61, %v991_v32 }
 0x186   : > { %v995_v1 = vmul.f32 %v3062_v51, %v987_v50  ;;  %v2752_v2 = vpack.i.bf16 %v1168_v59, %v1165_v57  ;;  %v1226_v56 = vsel %vm1214_vm2, %v1224_v52, %v1225_v53  ;;  %v1000_v3 = vadd.f32 %v3072_v61, %v992_v33  ;;  %v2839_v53 = vld [vmem:[%s3510_s9 + $0x10] sm:$0xff]  }
 0x187   : > { %v1229_v18 = vsel %vm1214_vm2, %v1227_v54, %v1228_v60  ;;  %v1089_v4 = vrot.slane %v999_v0, 7  ;;  %v1001_v5 = vadd.f32 %v3072_v61, %v993_v42  ;;  %v1002_v6 = vadd.f32 %v3072_v61, %v994_v46  ;;  %2607 = vmatpush3.bf16.msra.mxu1 %v2839_v53 }
 0x188   : > { %2753 = vrot.lane.b32.xlu1 %v2752_v2, %s2893_s27  ;;  %v2757_v7 = vpack.i.bf16 %v1229_v18, %v1226_v56  ;;  %v1090_v10 = vrot.slane %v1000_v3, 7  ;;  %v1003_v11 = vadd.f32 %v3072_v61, %v995_v1 }
 0x189   : > { %v3143_v51 = vsel %vm1108_vm1, 0.0, %v1089_v4  ;;  %v1126_v12 = vsel %vm1108_vm1, %v1089_v4, 0.0  ;;  %v1091_v13 = vrot.slane %v1001_v5, 7  ;;  %v1092_v14 = vrot.slane %v1002_v6, 7 }
 0x18a   : > { %v3147_v15 = vsel %vm1108_vm1, 0.0, %v1090_v10  ;;  %v1127_v63 = vsel %vm1108_vm1, %v1090_v10, 0.0  ;;  %v1169_v17 = vrot.slane %v3143_v51, 1  ;;  %v1170_v55 = vrot.slane %v1126_v12, 1 }
 0x18b   : > { %v1172_v61 = vrot.slane %v3147_v15, 1  ;;  %v1173_v22 = vrot.slane %v1127_v63, 1  ;;  %v1230_v23 = vrot.slane %v3143_v51, 2  ;;  %v1231_v24 = vrot.slane %v1126_v12, 2 }
 0x18c   : > { %2758 = vrot.lane.b32.xlu1 %v2757_v7, %s2892_s26  ;;  %v1171_v25 = vsel %vm1153_vm3, %v1169_v17, %v1170_v55  ;;  %v1233_v26 = vrot.slane %v3147_v15, 2  ;;  %v1234_v29 = vrot.slane %v1127_v63, 2  ;;  %v3160_v62 = vsel %vm1108_vm1, 0.0, %v1091_v13  ;;  %v2835_v55 = vld [vmem:[%s3510_s9 + $0x30] sm:$0xff]  }
 0x18d   : > { %v1174_v30 = vsel %vm1153_vm3, %v1172_v61, %v1173_v22  ;;  %v1232_v31 = vsel %vm1214_vm2, %v1230_v23, %v1231_v24  ;;  %v3165_v32 = vsel %vm1108_vm1, 0.0, %v1092_v14  ;;  %v1128_v33 = vsel %vm1108_vm1, %v1091_v13, 0.0  ;;  %v2838_v23 = vld [vmem:[%s3510_s9 + $0x38] sm:$0xff]  }
 0x18e   : > { %v2762_v34 = vpack.i.bf16 %v1174_v30, %v1171_v25  ;;  %v1235_v9 = vsel %vm1214_vm2, %v1233_v26, %v1234_v29  ;;  %v1129_v35 = vsel %vm1108_vm1, %v1092_v14, 0.0  ;;  %v1175_v36 = vrot.slane %v3160_v62, 1 }
 0x18f   : > { %v2767_v38 = vpack.i.bf16 %v1235_v9, %v1232_v31  ;;  %v1176_v39 = vrot.slane %v1128_v33, 1  ;;  %v1178_v40 = vrot.slane %v3165_v32, 1  ;;  %v1179_v8 = vrot.slane %v1129_v35, 1 }
 0x190   : > { %2763 = vrot.lane.b32.xlu0 %v2762_v34, %s2893_s27  ;;  %v1236_v42 = vrot.slane %v3160_v62, 2  ;;  %v1237_v44 = vrot.slane %v1128_v33, 2  ;;  %v1239_v45 = vrot.slane %v3165_v32, 2  ;;  %v1240_v19 = vrot.slane %v1129_v35, 2  ;;  %v2840_v34 = vld [vmem:[%s3510_s9 + $0x40] sm:$0xff]  }
 0x191   : > { %2768 = vrot.lane.b32.xlu1 %v2767_v38, %s2892_s26  ;;  %v1177_v46 = vsel %vm1153_vm3, %v1175_v36, %v1176_v39  ;;  %v1180_v47 = vsel %vm1153_vm3, %v1178_v40, %v1179_v8  ;;  %v1093_v48 = vrot.slane %v1003_v11, 7 }
 0x192   : > { %v2772_v49 = vpack.i.bf16 %v1180_v47, %v1177_v46  ;;  %v1238_v50 = vsel %vm1214_vm2, %v1236_v42, %v1237_v44  ;;  %v1241_v52 = vsel %vm1214_vm2, %v1239_v45, %v1240_v19 }
 0x193   : > { %v2777_v54 = vpack.i.bf16 %v1241_v52, %v1238_v50  ;;  %v3189_v57 = vsel %vm1108_vm1, 0.0, %v1093_v48  ;;  %v1130_v59 = vsel %vm1108_vm1, %v1093_v48, 0.0 }
 0x194   : > { %2773 = vrot.lane.b32.xlu0 %v2772_v49, %s2893_s27  ;;  %v1181_v60 = vrot.slane %v3189_v57, 1  ;;  %v1182_v0 = vrot.slane %v1130_v59, 1  ;;  %v1242_v1 = vrot.slane %v3189_v57, 2  ;;  %v1243_v2 = vrot.slane %v1130_v59, 2 }
 0x195   : > { %2778 = vrot.lane.b32.xlu1 %v2777_v54, %s2892_s26 }
 0x196   : > { %v1183_v56 = vsel %vm1153_vm3, %v1181_v60, %v1182_v0  ;;  %v1244_v3 = vsel %vm1214_vm2, %v1242_v1, %v1243_v2 }
 0x197   : > { %v2782_v18 = vpack.i.bf16 %v3099_v28, %v1183_v56  ;;  %v2787_v4 = vpack.i.bf16 %v3086_v16, %v1244_v3 }
 0x199   : > { %2783 = vrot.lane.b32.xlu0 %v2782_v18, %s2893_s27  ;;  %2788 = vrot.lane.b32.xlu1 %v2787_v4, %s2892_s26 }
 0x19d   : > { %1184 = vrot.lane.b32.xlu0 %v3099_v28, %s2893_s27  ;;  %1245 = vrot.lane.b32.xlu1 %v3086_v16, %s2892_s26 }
 0x1a1   : > { %1540 = vrot.lane.b32.xlu0 %v3099_v28, %s2893_s27  ;;  %1546 = vrot.lane.b32.xlu1 %v3086_v16, %s2892_s26 }
 0x1f4   : > { %v2749_v5 = vpop.permute.xlu1 %2748 }
 0x1f5   : > { %v2751_v6 = vunpack.i.h.bf16 %v2749_v5  ;;  %v2750_v7 = vunpack.i.l.bf16 %v2749_v5  ;;  %v2744_v10 = vpop.permute.xlu0 %2743 }
 0x1f6   : > { %v2746_v11 = vunpack.i.h.bf16 %v2744_v10  ;;  %v2745_v12 = vunpack.i.l.bf16 %v2744_v10 }
 0x1f8   : > { %v1277_v13 = vsel %vm792_vm0, %v3091_v20, %v2746_v11  ;;  %v1276_v14 = vsel %vm792_vm0, %v3066_v58, %v2745_v12 }
 0x1f9   : > { %v3215_v63 = vsel %vm1285_vm5, %v1276_v14, %v2750_v7  ;;  %v3218_v17 = vsel %vm1285_vm5, %v1277_v13, %v2751_v6 }
 0x1fa   : > { %v2754_v21 = vpop.permute.xlu1 %2753  ;;  %v1317_v61 = vpack.c.bf16 %v3218_v17, %v3215_v63 }
 0x1fb   : > { %v2756_v22 = vunpack.i.h.bf16 %v2754_v21  ;;  %v2755_v20 = vunpack.i.l.bf16 %v2754_v21 }
 0x1fc   : > { %2583 = vmatmul.mubr.msk.bf16.vlgmr.msra.gmra.mrb[0].mxu0 %vm1340_vm6, %v1317_v61  ;;  %v2841_v61 = vld [vmem:[%s3512_s11 + $0x18] sm:$0xff]  }
 0x1fd   : > { %2629 = vmatpush3.bf16.msra.mxu0 %v2835_v55  ;;  %2586 = vmatprep.mubr.msk.bf16.mxu0 %vm2891_vm4, %v2890_v27  ;;  %v1279_v29 = vsel %vm792_vm0, %v3121_v43, %v2756_v22  ;;  %v1278_v30 = vsel %vm792_vm0, %v3115_v41, %v2755_v20  ;;  %v2842_v22 = vld [vmem:[%s3512_s11 + $0x20] sm:$0xff]  }
 0x1fe   : > { %v2759_v24 = vpop.permute.xlu1 %2758  ;;  %2630 = vmatprep.subr.bf16.mxu0 %v2890_v27  ;;  %2654 = vmatprep.subr.bf16.mxu1 %v2841_v61 }
 0x1ff   : > { %v2761_v25 = vunpack.i.h.bf16 %v2759_v24  ;;  %v2760_v26 = vunpack.i.l.bf16 %v2759_v24 }
 0x201   : > { %v1289_v31 = vsel %vm1285_vm5, %v1278_v30, %v2760_v26  ;;  %v1290_v33 = vsel %vm1285_vm5, %v1279_v29, %v2761_v25  ;;  %2631 = vmatpush3.bf16.msra.mxu0 %v2838_v23 }
 0x202   : > { %v1318_v9 = vpack.c.bf16 %v1290_v33, %v1289_v31  ;;  %v2764_v35 = vpop.permute.xlu0 %2763  ;;  %2632 = vmatprep.subr.bf16.mxu0 %v2890_v27  ;;  %v1297_v10 = vpack.c.bf16 %v1289_v31, %v3218_v17 }
 0x203   : > { %v2766_v36 = vunpack.i.h.bf16 %v2764_v35  ;;  %v2765_v37 = vunpack.i.l.bf16 %v2764_v35  ;;  %v2769_v38 = vpop.permute.xlu1 %2768 }
 0x204   : > { %v2771_v43 = vunpack.i.h.bf16 %v2769_v38  ;;  %v2770_v39 = vunpack.i.l.bf16 %v2769_v38  ;;  %2587 = vmatmul.mubr.msk.bf16.gmra.mrb[4].mxu0 %vm1340_vm6, %v1318_v9 }
 0x205   : > { %2590 = vmatprep.mubr.msk.bf16.mxu0 %vm2891_vm4, %v2890_v27  ;;  %2633 = vmatpush3.bf16.msra.mxu0 %v2840_v34  ;;  %v1281_v41 = vsel %vm792_vm0, %v3147_v15, %v2766_v36  ;;  %v1280_v40 = vsel %vm792_vm0, %v3143_v51, %v2765_v37 }
 0x206   : > { %v2774_v8 = vpop.permute.xlu0 %2773  ;;  %v1291_v42 = vsel %vm1285_vm5, %v1280_v40, %v2770_v39  ;;  %v1292_v44 = vsel %vm1285_vm5, %v1281_v41, %v2771_v43 }
 0x207   : > { %v2779_v45 = vpop.permute.xlu1 %2778  ;;  %v1319_v19 = vpack.c.bf16 %v1292_v44, %v1291_v42  ;;  %v2776_v46 = vunpack.i.h.bf16 %v2774_v8  ;;  %v2775_v47 = vunpack.i.l.bf16 %v2774_v8 }
 0x208   : > { %v2781_v48 = vunpack.i.h.bf16 %v2779_v45  ;;  %v2780_v49 = vunpack.i.l.bf16 %v2779_v45 }
 0x209   : > { %v1283_v51 = vsel %vm792_vm0, %v3165_v32, %v2776_v46  ;;  %v1282_v15 = vsel %vm792_vm0, %v3160_v62, %v2775_v47 }
 0x20a   : > { %v1293_v53 = vsel %vm1285_vm5, %v1282_v15, %v2780_v49  ;;  %v1294_v54 = vsel %vm1285_vm5, %v1283_v51, %v2781_v48 }
 0x20b   : > { %v2784_v50 = vpop.permute.xlu0 %2783  ;;  %v2789_v52 = vpop.permute.xlu1 %2788  ;;  %v1320_v2 = vpack.c.bf16 %v1294_v54, %v1293_v53  ;;  %v1299_v12 = vpack.c.bf16 %v1293_v53, %v1292_v44 }
 0x20c   : > { %2591 = vmatmul.mubr.msk.bf16.gmra.mrb[8].mxu0 %vm1340_vm6, %v1319_v19  ;;  %v2786_v56 = vunpack.i.h.bf16 %v2784_v50  ;;  %v2785_v3 = vunpack.i.l.bf16 %v2784_v50  ;;  %v2791_v32 = vunpack.i.h.bf16 %v2789_v52  ;;  %v2790_v4 = vunpack.i.l.bf16 %v2789_v52 }
 0x20d   : > { %2594 = vmatprep.mubr.msk.bf16.mxu0 %vm2891_vm4, %v2890_v27 }
 0x20e   : > { %v1284_v62 = vsel %vm792_vm0, %v3189_v57, %v2785_v3  ;;  %v1315_v5 = vsel %vm792_vm0, %v3066_v58, %v2786_v56  ;;  %v1298_v57 = vpack.c.bf16 %v1291_v42, %v1290_v33 }
 0x20f   : > { %v1185_v59 = vpop.permute.xlu0 %1184  ;;  %v1246_v60 = vpop.permute.xlu1 %1245  ;;  %v1295_v6 = vsel %vm1285_vm5, %v1284_v62, %v2790_v4  ;;  %v1316_v7 = vsel %vm1285_vm5, %v1315_v5, %v2791_v32 }
 0x210   : > { %v1275_v0 = vsel %vm792_vm0, %v3066_v58, %v1185_v59  ;;  %v1321_v11 = vpack.c.bf16 %v1316_v7, %v1295_v6  ;;  %v1300_v13 = vpack.c.bf16 %v1295_v6, %v1294_v54 }
 0x211   : > { %v1286_v1 = vsel %vm1285_vm5, %v1275_v0, %v1246_v60 }
 0x212   : > { %v1296_v18 = vpack.c.bf16 %v3215_v63, %v1286_v1  ;;  %v3315_v1 = vld [vmem:[%s3511_s10] ss:$0 sm:$0xff] }
 0x213   : > { %v1541_v14 = vpop.permute.xlu0 %1540  ;;  %v1547_v17 = vpop.permute.xlu1 %1546 }
 0x214   : > { %2609 = vmatmul.mubr.msk.bf16.vlgmr.msra.gmra.mrb[0].mxu1 %vm1340_vm6, %v1296_v18  ;;  %2595 = vmatmul.mubr.msk.bf16.gmra.mrb[12].mxu0 %vm1340_vm6, %v1320_v2  ;;  %v1549_v63 = vsel %vm792_vm0, %v3066_v58, %v1541_v14 }
 0x215   : > { %2612 = vmatprep.mubr.msk.bf16.mxu1 %vm2891_vm4, %v2890_v27  ;;  %2598 = vmatprep.mubr.msk.bf16.mxu0 %vm2891_vm4, %v2890_v27  ;;  %v1550_v55 = vsel %vm1285_vm5, %v1549_v63, %v1547_v17 }
 0x216   : > { %v1551_v21 = vpack.c.bf16 %v1550_v55, %v1316_v7  ;;  %2655 = vmatpush3.bf16.msra.mxu1 %v2841_v61 }
 0x217   : > { %2656 = vmatprep.subr.bf16.mxu1 %v2842_v22 }
 0x21a   : > { %2657 = vmatpush3.bf16.msra.mxu1 %v2842_v22 }
 0x21c   : > { %2613 = vmatmul.mubr.msk.bf16.gmra.mrb[4].mxu1 %vm1340_vm6, %v1297_v10  ;;  %2599 = vmatmul.mubr.msk.bf16.gmra.mrb[16].mxu0 %vm1340_vm6, %v1321_v11 }
 0x21d   : > { %2616 = vmatprep.mubr.msk.bf16.mxu1 %vm2891_vm4, %v2890_v27  ;;  %2634 = vmatprep.mubr.msk.bf16.mxu0 %vm2891_vm4, %v2890_v27 }
 0x224   : > { %2617 = vmatmul.mubr.msk.bf16.gmra.mrb[8].mxu1 %vm1340_vm6, %v1298_v57  ;;  %2635 = vmatmul.mubr.msk.bf16.vlgmr.msra.gmra.mrb[20].mxu0 %vm1340_vm6, %v1297_v10 }
 0x225   : > { %2620 = vmatprep.mubr.msk.bf16.mxu1 %vm2891_vm4, %v2890_v27  ;;  %2638 = vmatprep.mubr.msk.bf16.mxu0 %vm2891_vm4, %v2890_v27 }
 0x22c   : > { %2621 = vmatmul.mubr.msk.bf16.gmra.mrb[12].mxu1 %vm1340_vm6, %v1299_v12  ;;  %2639 = vmatmul.mubr.msk.bf16.gmra.mrb[24].mxu0 %vm1340_vm6, %v1298_v57 }
 0x22d   : > { %2624 = vmatprep.mubr.msk.bf16.mxu1 %vm2891_vm4, %v2890_v27  ;;  %2642 = vmatprep.mubr.msk.bf16.mxu0 %vm2891_vm4, %v2890_v27 }
 0x234   : > { %2625 = vmatmul.mubr.msk.bf16.gmra.mrb[16].mxu1 %vm1340_vm6, %v1300_v13  ;;  %2643 = vmatmul.mubr.msk.bf16.gmra.mrb[28].mxu0 %vm1340_vm6, %v1299_v12 }
 0x235   : > { %2646 = vmatprep.mubr.msk.bf16.mxu0 %vm2891_vm4, %v2890_v27 }
 0x23c   : > { %2647 = vmatmul.mubr.msk.bf16.gmra.mrb[32].mxu0 %vm1340_vm6, %v1300_v13 }
 0x23d   : > { %2650 = vmatprep.mubr.msk.bf16.mxu0 %vm2891_vm4, %v2890_v27 }
 0x244   : > { %2651 = vmatmul.mubr.msk.bf16.gmra.mrb[36].mxu0 %vm1340_vm6, %v1551_v21 }
 0x2cf   : > { %v1390_v20 = vpop.f32.mrb[0].mxu0 }
 0x2d0   : > { %v2584_v23 = vpop.f32.mrb[1].mxu0 }
 0x2d1   : > { %v1393_v27 = vpop.f32.mrb[2].mxu0 }
 0x2d2   : > { %v2585_v24 = vpop.f32.mrb[3].mxu0 }
 0x2d7   : > { %v1398_v25 = vpop.f32.mrb[4].mxu0 }
 0x2d8   : > { %v2588_v26 = vpop.f32.mrb[5].mxu0 }
 0x2d9   : > { %v1401_v29 = vpop.f32.mrb[6].mxu0 }
 0x2da   : > { %v2589_v30 = vpop.f32.mrb[7].mxu0 }
 0x2df   : > { %v1406_v31 = vpop.f32.mrb[8].mxu0 }
 0x2e0   : > { %v2592_v33 = vpop.f32.mrb[9].mxu0 }
 0x2e1   : > { %v1409_v34 = vpop.f32.mrb[10].mxu0 }
 0x2e2   : > { %v2593_v9 = vpop.f32.mrb[11].mxu0 }
 0x2e7   : > { %v1496_v35 = vpop.f32.mrb[0].mxu1  ;;  %v1414_v36 = vpop.f32.mrb[12].mxu0 }
 0x2e8   : > { %v2610_v37 = vpop.f32.mrb[1].mxu1  ;;  %v2596_v38 = vpop.f32.mrb[13].mxu0 }
 0x2e9   : > { %v1499_v43 = vpop.f32.mrb[2].mxu1  ;;  %v1417_v39 = vpop.f32.mrb[14].mxu0 }
 0x2ea   : > { %v1500_v41 = vadd.f32 %v1499_v43, %v1393_v27  ;;  %v2611_v40 = vpop.f32.mrb[3].mxu1  ;;  %v2597_v8 = vpop.f32.mrb[15].mxu0 }
 0x2ef   : > { %v1504_v42 = vpop.f32.mrb[4].mxu1  ;;  %v1422_v44 = vpop.f32.mrb[16].mxu0 }
 0x2f0   : > { %v1505_v45 = vadd.f32 %v1504_v42, %v1398_v25  ;;  %v2614_v19 = vpop.f32.mrb[5].mxu1  ;;  %v2600_v46 = vpop.f32.mrb[17].mxu0 }
 0x2f1   : > { %v1507_v47 = vpop.f32.mrb[6].mxu1  ;;  %v1425_v48 = vpop.f32.mrb[18].mxu0 }
 0x2f2   : > { %v1508_v49 = vadd.f32 %v1507_v47, %v1401_v29  ;;  %v2615_v50 = vpop.f32.mrb[7].mxu1  ;;  %v2601_v52 = vpop.f32.mrb[19].mxu0 }
 0x2f3   : > { %v2843_v52 = vld [vmem:[%s3512_s11 + $0x28] sm:$0xff]  }
 0x2f4   : > { %2658 = vmatprep.subr.bf16.mxu1 %v2843_v52 }
 0x2f5   : > { %2659 = vmatpush3.bf16.msra.mxu1 %v2843_v52 }
 0x2f7   : > { %v1512_v51 = vpop.f32.mrb[8].mxu1  ;;  %v1607_v15 = vpop.f32.mrb[20].mxu0 }
 0x2f8   : > { %v1513_v53 = vadd.f32 %v1512_v51, %v1406_v31  ;;  %v2618_v54 = vpop.f32.mrb[9].mxu1  ;;  %v2636_v59 = vpop.f32.mrb[21].mxu0 }
 0x2f9   : > { %v1515_v60 = vpop.f32.mrb[10].mxu1  ;;  %v1610_v0 = vpop.f32.mrb[22].mxu0 }
 0x2fa   : > { %v1516_v2 = vadd.f32 %v1515_v60, %v1409_v34  ;;  %v2619_v56 = vpop.f32.mrb[11].mxu1  ;;  %v1647_v3 = vadd.f32 %v1610_v0, %v1500_v41  ;;  %v2637_v18 = vpop.f32.mrb[23].mxu0 }
 0x2fc   : > { %v1664_v32 = vadd.f32 %v3315_v1, %v1647_v3 }
 0x2fe   : > { %v1704_v4 = vrot.slane %v1664_v32, 7 }
 0x2ff   : > { %v1520_v62 = vpop.f32.mrb[12].mxu1  ;;  %v1615_v5 = vpop.f32.mrb[24].mxu0 }
 0x300   : > { %v3318_v6 = vadd.f32 %v1520_v62, %v1414_v36  ;;  %v2622_v7 = vpop.f32.mrb[13].mxu1  ;;  %v1648_v10 = vadd.f32 %v1615_v5, %v1505_v45  ;;  %v2640_v11 = vpop.f32.mrb[25].mxu0  ;;  %v3321_v57 = vsel %vm1108_vm1, 0.0, %v1704_v4  ;;  %v1734_v14 = vsel %vm1108_vm1, %v1704_v4, 0.0 }
 0x301   : > { %v1523_v12 = vpop.f32.mrb[14].mxu1  ;;  %v1618_v13 = vpop.f32.mrb[26].mxu0  ;;  %v1762_v23 = vrot.slane %v3321_v57, 1  ;;  %v1763_v27 = vrot.slane %v1734_v14, 1  ;;  %v1810_v24 = vrot.slane %v3321_v57, 2  ;;  %v1811_v25 = vrot.slane %v1734_v14, 2 }
 0x302   : > { %v3324_v63 = vadd.f32 %v1523_v12, %v1417_v39  ;;  %v2623_v17 = vpop.f32.mrb[15].mxu1  ;;  %v1665_v55 = vadd.f32 %v3315_v1, %v1648_v10  ;;  %v1649_v21 = vadd.f32 %v1618_v13, %v1508_v49  ;;  %v2641_v61 = vpop.f32.mrb[27].mxu0 }
 0x303   : > { %v1764_v45 = vsel %vm1153_vm3, %v1762_v23, %v1763_v27  ;;  %v1812_v19 = vsel %vm1214_vm2, %v1810_v24, %v1811_v25 }
 0x304   : > { %v1705_v22 = vrot.slane %v1665_v55, 7  ;;  %v1666_v20 = vadd.f32 %v3315_v1, %v1649_v21 }
 0x306   : > { %v3331_v26 = vsel %vm1108_vm1, 0.0, %v1705_v22  ;;  %v1735_v29 = vsel %vm1108_vm1, %v1705_v22, 0.0  ;;  %v1706_v30 = vrot.slane %v1666_v20, 7 }
 0x307   : > { %v1765_v31 = vrot.slane %v3331_v26, 1  ;;  %v1766_v33 = vrot.slane %v1735_v29, 1  ;;  %v1813_v34 = vrot.slane %v3331_v26, 2  ;;  %v1814_v9 = vrot.slane %v1735_v29, 2  ;;  %v1528_v35 = vpop.f32.mrb[16].mxu1  ;;  %v1623_v36 = vpop.f32.mrb[28].mxu0 }
 0x308   : > { %v3336_v37 = vadd.f32 %v1528_v35, %v1422_v44  ;;  %v2626_v38 = vpop.f32.mrb[17].mxu1  ;;  %v1650_v43 = vadd.f32 %v1623_v36, %v1513_v53  ;;  %v2644_v39 = vpop.f32.mrb[29].mxu0  ;;  %v3339_v41 = vsel %vm1108_vm1, 0.0, %v1706_v30  ;;  %v1736_v40 = vsel %vm1108_vm1, %v1706_v30, 0.0 }
 0x309   : > { %v1531_v8 = vpop.f32.mrb[18].mxu1  ;;  %v1626_v42 = vpop.f32.mrb[30].mxu0  ;;  %v1767_v49 = vsel %vm1153_vm3, %v1765_v31, %v1766_v33  ;;  %v1815_v50 = vsel %vm1214_vm2, %v1813_v34, %v1814_v9  ;;  %v1768_v59 = vrot.slane %v3339_v41, 1  ;;  %v1769_v60 = vrot.slane %v1736_v40, 1 }
 0x30a   : > { %v2627_v46 = vpop.f32.mrb[19].mxu1  ;;  %v1667_v47 = vadd.f32 %v3315_v1, %v1650_v43  ;;  %v1651_v48 = vadd.f32 %v1626_v42, %v1516_v2  ;;  %v2645_v44 = vpop.f32.mrb[31].mxu0  ;;  %v2792_v51 = vpack.i.bf16 %v1767_v49, %v1764_v45  ;;  %v2797_v15 = vpack.i.bf16 %v1815_v50, %v1812_v19 }
 0x30b   : > { %v1816_v0 = vrot.slane %v3339_v41, 2  ;;  %v1817_v2 = vrot.slane %v1736_v40, 2  ;;  %v1770_v17 = vsel %vm1153_vm3, %v1768_v59, %v1769_v60 }
 0x30c   : > { %v1707_v53 = vrot.slane %v1667_v47, 7  ;;  %v1668_v54 = vadd.f32 %v3315_v1, %v1651_v48  ;;  %2793 = vrot.lane.b32.xlu0 %v2792_v51, %s2893_s27  ;;  %v2844_v47 = vld [vmem:[%s3512_s11] sm:$0xff]  }
 0x30d   : > { %v1818_v55 = vsel %vm1214_vm2, %v1816_v0, %v1817_v2  ;;  %2668 = vmatprep.subr.bf16.mxu1 %v2844_v47 }
 0x30e   : > { %v3355_v56 = vsel %vm1108_vm1, 0.0, %v1707_v53  ;;  %v1737_v3 = vsel %vm1108_vm1, %v1707_v53, 0.0  ;;  %v1708_v18 = vrot.slane %v1668_v54, 7 }
 0x30f   : > { %v1771_v32 = vrot.slane %v3355_v56, 1  ;;  %v1772_v4 = vrot.slane %v1737_v3, 1  ;;  %v1819_v62 = vrot.slane %v3355_v56, 2  ;;  %v1820_v5 = vrot.slane %v1737_v3, 2  ;;  %v1631_v7 = vpop.f32.mrb[32].mxu0 }
 0x310   : > { %v1652_v10 = vadd.f32 %v1631_v7, %v3318_v6  ;;  %v2648_v11 = vpop.f32.mrb[33].mxu0  ;;  %v3362_v12 = vsel %vm1108_vm1, 0.0, %v1708_v18  ;;  %v1738_v13 = vsel %vm1108_vm1, %v1708_v18, 0.0  ;;  %2798 = vrot.lane.b32.xlu0 %v2797_v15, %s2892_s26 }
 0x311   : > { %v1634_v14 = vpop.f32.mrb[34].mxu0  ;;  %v1773_v6 = vsel %vm1153_vm3, %v1771_v32, %v1772_v4  ;;  %v1821_v20 = vsel %vm1214_vm2, %v1819_v62, %v1820_v5  ;;  %v1774_v29 = vrot.slane %v3362_v12, 1  ;;  %v1775_v30 = vrot.slane %v1738_v13, 1 }
 0x312   : > { %v1669_v21 = vadd.f32 %v3315_v1, %v1652_v10  ;;  %v1653_v61 = vadd.f32 %v1634_v14, %v3324_v63  ;;  %v2649_v22 = vpop.f32.mrb[35].mxu0  ;;  %v2802_v23 = vpack.i.bf16 %v1773_v6, %v1770_v17  ;;  %v2807_v27 = vpack.i.bf16 %v1821_v20, %v1818_v55 }
 0x313   : > { %v1822_v31 = vrot.slane %v3362_v12, 2  ;;  %v1823_v33 = vrot.slane %v1738_v13, 2  ;;  %v1776_v19 = vsel %vm1153_vm3, %v1774_v29, %v1775_v30 }
 0x314   : > { %v1709_v24 = vrot.slane %v1669_v21, 7  ;;  %v1670_v25 = vadd.f32 %v3315_v1, %v1653_v61  ;;  %2803 = vrot.lane.b32.xlu1 %v2802_v23, %s2893_s27 }
 0x315   : > { %v1824_v46 = vsel %vm1214_vm2, %v1822_v31, %v1823_v33 }
 0x316   : > { %v3377_v63 = vsel %vm1108_vm1, 0.0, %v1709_v24  ;;  %v1739_v34 = vsel %vm1108_vm1, %v1709_v24, 0.0  ;;  %v1710_v9 = vrot.slane %v1670_v25, 7 }
 0x317   : > { %v1777_v35 = vrot.slane %v3377_v63, 1  ;;  %v1778_v36 = vrot.slane %v1739_v34, 1  ;;  %v1825_v38 = vrot.slane %v3377_v63, 2  ;;  %v1826_v43 = vrot.slane %v1739_v34, 2  ;;  %v1639_v39 = vpop.f32.mrb[36].mxu0 }
 0x318   : > { %v1654_v40 = vadd.f32 %v1639_v39, %v3336_v37  ;;  %v2652_v8 = vpop.f32.mrb[37].mxu0  ;;  %v3384_v42 = vsel %vm1108_vm1, 0.0, %v1710_v9  ;;  %2808 = vrot.lane.b32.xlu1 %v2807_v27, %s2892_s26  ;;  %v1740_v48 = vsel %vm1108_vm1, %v1710_v9, 0.0 }
 0x319   : > { %v1642_v45 = vpop.f32.mrb[38].mxu0  ;;  %v1779_v49 = vsel %vm1153_vm3, %v1777_v35, %v1778_v36  ;;  %v1827_v50 = vsel %vm1214_vm2, %v1825_v38, %v1826_v43  ;;  %v1780_v53 = vrot.slane %v3384_v42, 1  ;;  %v1781_v54 = vrot.slane %v1740_v48, 1  ;;  %v2845_v35 = vld [vmem:[%s3512_s11 + $0x8] sm:$0xff]  }
 0x31a   : > { %v1671_v44 = vadd.f32 %v3315_v1, %v1654_v40  ;;  %v2653_v37 = vpop.f32.mrb[39].mxu0  ;;  %v2812_v52 = vpack.i.bf16 %v1779_v49, %v1776_v19  ;;  %v2817_v51 = vpack.i.bf16 %v1827_v50, %v1824_v46  ;;  %v1828_v59 = vrot.slane %v3384_v42, 2 }
 0x31b   : > { %v1829_v60 = vrot.slane %v1740_v48, 2  ;;  %v1782_v4 = vsel %vm1153_vm3, %v1780_v53, %v1781_v54  ;;  %v2847_v48 = vld [vmem:[%s3512_s11 + $0x30] sm:$0xff]  }
 0x31c   : > { %v1711_v15 = vrot.slane %v1671_v44, 7  ;;  %2813 = vrot.lane.b32.xlu0 %v2812_v52, %s2893_s27 }
 0x31d   : > { %v1830_v5 = vsel %vm1214_vm2, %v1828_v59, %v1829_v60 }
 0x31e   : > { %v3400_v0 = vsel %vm1108_vm1, 0.0, %v1711_v15  ;;  %v1741_v1 = vsel %vm1108_vm1, %v1711_v15, 0.0 }
 0x31f   : > { %v1877_v2 = vrot.slane %v3400_v0, 1  ;;  %v1878_v3 = vrot.slane %v1741_v1, 1  ;;  %v1883_v18 = vrot.slane %v3400_v0, 2  ;;  %v1884_v32 = vrot.slane %v1741_v1, 2 }
 0x320   : > { %2818 = vrot.lane.b32.xlu0 %v2817_v51, %s2892_s26 }
 0x321   : > { %v1879_v62 = vsel %vm1153_vm3, %v1877_v2, %v1878_v3  ;;  %v1885_v7 = vsel %vm1214_vm2, %v1883_v18, %v1884_v32  ;;  %v2849_v18 = vld [vmem:[%s3512_s11 + $0x40] sm:$0xff]  }
 0x322   : > { %v2822_v10 = vpack.i.bf16 %v1879_v62, %v1782_v4  ;;  %v2827_v11 = vpack.i.bf16 %v1885_v7, %v1830_v5 }
 0x324   : > { %2823 = vrot.lane.b32.xlu1 %v2822_v10, %s2893_s27  ;;  %1783 = vrot.lane.b32.xlu0 %v3099_v28, %s2893_s27 }
 0x328   : > { %2828 = vrot.lane.b32.xlu1 %v2827_v11, %s2892_s26  ;;  %2090 = vrot.lane.b32.xlu0 %v3099_v28, %s2893_s27  ;;  %v2463_v11 = vld [vmem:[%s3513_s12] ss:$0 sm:$0xff] }
 0x32c   : > { %1831 = vrot.lane.b32.xlu1 %v3086_v16, %s2892_s26 }
 0x330   : > { %2096 = vrot.lane.b32.xlu1 %v3086_v16, %s2892_s26 }
 0x37e   : > { %v2794_v13 = vpop.permute.xlu0 %2793 }
 0x37f   : > { %v2796_v14 = vunpack.i.h.bf16 %v2794_v13  ;;  %v2795_v17 = vunpack.i.l.bf16 %v2794_v13 }
 0x381   : > { %v1857_v22 = vsel %vm792_vm0, %v3331_v26, %v2796_v14  ;;  %v1856_v6 = vsel %vm792_vm0, %v3321_v57, %v2795_v17 }
 0x382   : > { %v2799_v55 = vpop.permute.xlu0 %2798 }
 0x383   : > { %v2801_v21 = vunpack.i.h.bf16 %v2799_v55  ;;  %v2800_v61 = vunpack.i.l.bf16 %v2799_v55 }
 0x385   : > { %v1864_v28 = vsel %vm1285_vm5, %v1856_v6, %v2800_v61  ;;  %v1865_v20 = vsel %vm1285_vm5, %v1857_v22, %v2801_v21 }
 0x386   : > { %v1891_v23 = vpack.c.bf16 %v1865_v20, %v1864_v28  ;;  %v2804_v27 = vpop.permute.xlu1 %2803 }
 0x387   : > { %v2806_v24 = vunpack.i.h.bf16 %v2804_v27  ;;  %v2805_v16 = vunpack.i.l.bf16 %v2804_v27 }
 0x388   : > { %2660 = vmatprep.mubr.msk.bf16.mxu1 %vm1340_vm6, %v1891_v23 }
 0x389   : > { %v1859_v31 = vsel %vm792_vm0, %v3355_v56, %v2806_v24  ;;  %v1858_v26 = vsel %vm792_vm0, %v3339_v41, %v2805_v16  ;;  %v2846_v41 = vld [vmem:[%s3512_s11 + $0x10] sm:$0xff]  }
 0x38a   : > { %v2809_v25 = vpop.permute.xlu1 %2808 }
 0x38b   : > { %v2811_v29 = vunpack.i.h.bf16 %v2809_v25  ;;  %v2810_v30 = vunpack.i.l.bf16 %v2809_v25 }
 0x38d   : > { %v1866_v57 = vsel %vm1285_vm5, %v1858_v26, %v2810_v30  ;;  %v1867_v33 = vsel %vm1285_vm5, %v1859_v31, %v2811_v29 }
 0x38e   : > { %v1892_v34 = vpack.c.bf16 %v1867_v33, %v1866_v57  ;;  %v2814_v9 = vpop.permute.xlu0 %2813 }
 0x38f   : > { %v2816_v36 = vunpack.i.h.bf16 %v2814_v9  ;;  %v2815_v38 = vunpack.i.l.bf16 %v2814_v9 }
 0x390   : > { %2661 = vmatmul.mubr.msk.bf16.vlgmr.msra.gmra.mrb[20].mxu1 %vm1340_vm6, %v1892_v34 }
 0x391   : > { %2669 = vmatpush3.bf16.msra.mxu1 %v2844_v47  ;;  %v1861_v40 = vsel %vm792_vm0, %v3377_v63, %v2816_v36  ;;  %v1860_v8 = vsel %vm792_vm0, %v3362_v12, %v2815_v38 }
 0x392   : > { %v2819_v43 = vpop.permute.xlu0 %2818  ;;  %2670 = vmatprep.subr.bf16.mxu1 %v2845_v35 }
 0x393   : > { %v2821_v56 = vunpack.i.h.bf16 %v2819_v43  ;;  %v2820_v39 = vunpack.i.l.bf16 %v2819_v43 }
 0x395   : > { %v1868_v45 = vsel %vm1285_vm5, %v1860_v8, %v2820_v39  ;;  %v1869_v19 = vsel %vm1285_vm5, %v1861_v40, %v2821_v56  ;;  %2671 = vmatpush3.bf16.msra.mxu1 %v2845_v35 }
 0x396   : > { %v2824_v46 = vpop.permute.xlu1 %2823  ;;  %v1893_v47 = vpack.c.bf16 %v1869_v19, %v1868_v45  ;;  %2672 = vmatprep.subr.bf16.mxu1 %v2846_v41  ;;  %v1784_v63 = vpop.permute.xlu0 %1783  ;;  %v1873_v3 = vpack.c.bf16 %v1868_v45, %v1867_v33 }
 0x397   : > { %v2826_v44 = vunpack.i.h.bf16 %v2824_v46  ;;  %v2825_v37 = vunpack.i.l.bf16 %v2824_v46  ;;  %v1855_v15 = vsel %vm792_vm0, %v3066_v58, %v1784_v63 }
 0x398   : > { %2664 = vmatprep.mubr.msk.bf16.mxu1 %vm1340_vm6, %v1893_v47 }
 0x399   : > { %2673 = vmatpush3.bf16.msra.mxu1 %v2846_v41  ;;  %v1889_v52 = vsel %vm792_vm0, %v3400_v0, %v2826_v44  ;;  %v1862_v51 = vsel %vm792_vm0, %v3384_v42, %v2825_v37  ;;  %v1872_v0 = vpack.c.bf16 %v1866_v57, %v1865_v20  ;;  %v2848_v42 = vld [vmem:[%s3512_s11 + $0x38] sm:$0xff]  }
 0x39a   : > { %v2829_v49 = vpop.permute.xlu1 %2828  ;;  %2682 = vmatprep.subr.bf16.mxu1 %v2847_v48  ;;  %v2091_v4 = vpop.permute.xlu0 %2090 }
 0x39b   : > { %v2831_v12 = vunpack.i.h.bf16 %v2829_v49  ;;  %v2830_v50 = vunpack.i.l.bf16 %v2829_v49  ;;  %v2099_v62 = vsel %vm792_vm0, %v3066_v58, %v2091_v4 }
 0x39d   : > { %v1870_v53 = vsel %vm1285_vm5, %v1862_v51, %v2830_v50  ;;  %v1890_v54 = vsel %vm1285_vm5, %v1889_v52, %v2831_v12 }
 0x39e   : > { %v1894_v59 = vpack.c.bf16 %v1890_v54, %v1870_v53  ;;  %v1832_v60 = vpop.permute.xlu1 %1831  ;;  %v1874_v32 = vpack.c.bf16 %v1870_v53, %v1869_v19 }
 0x39f   : > { %v1863_v1 = vsel %vm1285_vm5, %v1855_v15, %v1832_v60 }
 0x3a0   : > { %v1871_v2 = vpack.c.bf16 %v1864_v28, %v1863_v1  ;;  %2665 = vmatmul.mubr.msk.bf16.gmra.mrb[24].mxu1 %vm1340_vm6, %v1894_v59 }
 0x3a2   : > { %2674 = vmatprep.mubr.msk.bf16.mxu1 %vm1340_vm6, %v1871_v2  ;;  %v2097_v5 = vpop.permute.xlu1 %2096 }
 0x3a3   : > { %v2100_v7 = vsel %vm1285_vm5, %v2099_v62, %v2097_v5 }
 0x3a4   : > { %v2101_v10 = vpack.c.bf16 %v2100_v7, %v1890_v54 }
 0x3a8   : > { %2675 = vmatmul.mubr.msk.bf16.vlgmr.msra.gmra.mrb[20].mxu1 %vm1340_vm6, %v1872_v0 }
 0x3a9   : > { %2683 = vmatpush3.bf16.msra.mxu1 %v2847_v48  ;;  %2678 = vmatprep.mubr.msk.bf16.mxu1 %vm1340_vm6, %v1873_v3 }
 0x3aa   : > { %2684 = vmatprep.subr.bf16.mxu1 %v2848_v42 }
 0x3ad   : > { %2685 = vmatpush3.bf16.msra.mxu1 %v2848_v42 }
 0x3ae   : > { %2686 = vmatprep.subr.bf16.mxu1 %v2849_v18 }
 0x3b0   : > { %2679 = vmatmul.mubr.msk.bf16.gmra.mrb[24].mxu1 %vm1340_vm6, %v1874_v32 }
 0x3b1   : > { %2688 = vmatprep.mubr.msk.bf16.mxu1 %vm1340_vm6, %v1872_v0  ;;  %2687 = vmatpush3.bf16.msra.mxu1 %v2849_v18 }
 0x3b8   : > { %2689 = vmatmul.mubr.msk.bf16.vlgmr.msra.gmra.mrb[20].mxu1 %vm1340_vm6, %v1873_v3 }
 0x3b9   : > { %2692 = vmatprep.mubr.msk.bf16.mxu1 %vm1340_vm6, %v1874_v32 }
 0x3c0   : > { %2693 = vmatmul.mubr.msk.bf16.gmra.mrb[24].mxu1 %vm1340_vm6, %v2101_v10 }
 0x48b   : > { %v2690_v58 = vpop.f32.mrb[20].mxu1 }
 0x48c   : > { %v2205_v13 = vadd.f32 %v2690_v58, %v2463_v11  ;;  %v2157_v14 = vpop.f32.mrb[21].mxu1 }
 0x48d   : > { %v2203_v17 = vadd.f32 %v2463_v11, %v2157_v14  ;;  %v2691_v55 = vpop.f32.mrb[22].mxu1 }
 0x48e   : > { %2213 = vst.msk [vmem:[%s772_s30 + $0x10] sm:$0xff] %vm1340_vm6, %v2205_v13  ;;  %v2206_v21 = vadd.f32 %v2691_v55, %v2463_v11  ;;  %v2160_v61 = vpop.f32.mrb[23].mxu1 }
 0x48f   : > { %2211 = vst.msk [vmem:[%s772_s30] sm:$0xff] %vm1340_vm6, %v2203_v17  ;;  %v2204_v22 = vadd.f32 %v2463_v11, %v2160_v61 }
 0x490   : > { %2214 = vst.msk [vmem:[%s772_s30 + $0x18] sm:$0xff] %vm1340_vm6, %v2206_v21 }
 0x491   : > { %2212 = vst.msk [vmem:[%s772_s30 + $0x8] sm:$0xff] %vm1340_vm6, %v2204_v22 }
 0x493   : > { %v2694_v6 = vpop.f32.mrb[24].mxu1 }
 0x494   : > { %v2209_v28 = vadd.f32 %v2694_v6, %v2463_v11  ;;  %v2173_v20 = vpop.f32.mrb[25].mxu1 }
 0x495   : > { %v2207_v23 = vadd.f32 %v2463_v11, %v2173_v20  ;;  %v2695_v27 = vpop.f32.mrb[26].mxu1 }
 0x496   : > { %2217 = vst.msk [vmem:[%s772_s30 + $0x30] sm:$0xff] %vm1340_vm6, %v2209_v28  ;;  %v2210_v24 = vadd.f32 %v2695_v27, %v2463_v11  ;;  %v2176_v16 = vpop.f32.mrb[27].mxu1 }
 0x497   : > { %2215 = vst.msk [vmem:[%s772_s30 + $0x20] sm:$0xff] %vm1340_vm6, %v2207_v23  ;;  %v2208_v25 = vadd.f32 %v2463_v11, %v2176_v16 }
 0x498   : > { %2218 = vst.msk [vmem:[%s772_s30 + $0x38] sm:$0xff] %vm1340_vm6, %v2210_v24 }
 0x499   : > { %2216 = vst.msk [vmem:[%s772_s30 + $0x28] sm:$0xff] %vm1340_vm6, %v2208_v25 }
 0x49a PF: > { %s25_s25 = sadd.s32 1, %s2888_s25   ;;  %s3515_s23 = smov %s2884_s24 }
 0x49b   : > { %p22_p5 = scmp.ge.s32.totalorder %s25_s25, 4   ;;  %s3516_s24 = smov %s3518_s6 }
 0x49d   :  { %24 = sbr.rel (!%p22_p5) target bundleno = 3 (0x3), region = 117 }

</bundles_post_ra>
